<compile_context>
chip_gen: v7x
topology: tpu7x:2x2x1
jax: 0.10.0
libtpu: 0.0.40
codegen_flags: <defaults>
</compile_context>

<pallas_src>
import functools

import jax
import jax.numpy as jnp
import numpy as np
from jax.experimental import pallas as pl
from jax.experimental.pallas import tpu as pltpu

# ---- KAN hyper-parameters (efficient-kan defaults) -------------------------
GRID_SIZE = 5
SPLINE_ORDER = 3
GRID_RANGE = (-1.0, 1.0)
N_BASES = GRID_SIZE + SPLINE_ORDER              # 8 B-spline bases per input feature
N_GRID_PTS = GRID_SIZE + 2 * SPLINE_ORDER + 1   # 12 extended grid points
N_FEATS = N_BASES + 1                           # 8 basis blocks + 1 SiLU block

_H = (GRID_RANGE[1] - GRID_RANGE[0]) / GRID_SIZE
# Static uniform grid shared by all input features (compile-time Python floats).
_GRID = [GRID_RANGE[0] + _H * (i - SPLINE_ORDER) for i in range(N_GRID_PTS)]

LANE = 128          # TPU lane width; all in-kernel feature dims are padded to this


def _round_up(n, m):
    return ((n + m - 1) // m) * m


# ---- Fused kernel ----------------------------------------------------------
def _kan_layer(h_ref, in_p, w_ref, stage_ref, row_strip):
    """One KANLinear layer.

    h_ref:     activation ref; columns [0, in_p) hold the layer input (f32).
    w_ref:     (9*in_p, out_p) bf16 combined weight:
                 rows [j*in_p + f] = (spline_W * scaler)[o, f, j]  (basis-major),
                 rows [8*in_p + f] = base_W[o, f]  (both already transposed).
    stage_ref: (tb, 9*max_in_p) bf16 staging buffer for the deep contraction.
    Returns the (tb, out_p) f32 layer output.
    """
    tb = stage_ref.shape[0]

    # --- B-spline bases (Cox-de-Boor), strip-mined so each live array is a
    #     (row_strip, 128) f32 tile (1-2 vregs) regardless of tb / in_p.
    for r0 in range(0, tb, row_strip):
        for c0 in range(0, in_p, LANE):
            xc = h_ref[r0:r0 + row_strip, c0:c0 + LANE].astype(jnp.float32)
            # Degree-0 from 12 shared comparisons: B_i^0 = [x>=g_i] - [x>=g_{i+1}].
            step = [(xc >= g).astype(jnp.float32) for g in _GRID]
            bases = [step[i] - step[i + 1] for i in range(N_GRID_PTS - 1)]
            # Uniform grid: g[i+k]-g[i] == k*h for every i, so
            #   B_i^k = (xs - l_i)*B_i^{k-1} + (r_{i+1} - xs)*B_{i+1}^{k-1}
            # with xs = x/(k*h), l_i = g[i]/(k*h), r_i = 1 + g[i]/(k*h)
            # (all l_i / r_i are compile-time constants).
            for k in range(1, SPLINE_ORDER + 1):
                inv = 1.0 / (k * _H)
                xs = xc * inv
                final = (k == SPLINE_ORDER)
                nb = len(bases) - 1
                lef = [xs - _GRID[i] * inv for i in range(nb)]
                rig = [(1.0 + _GRID[i + 1] * inv) - xs for i in range(nb)]
                nxt = []
                for i in range(nb):
                    b = lef[i] * bases[i] + rig[i] * bases[i + 1]
                    if final:
                        # Basis-major column: static, lane-aligned (x128) offset
                        # -> unmasked aligned vector stores.
                        col = i * in_p + c0
                        stage_ref[r0:r0 + row_strip, col:col + LANE] = (
                            b.astype(stage_ref.dtype))
                    else:
                        nxt.append(b)
                bases = nxt

    # --- Base branch: SiLU(x) staged as the 9th in_p-wide column block.
    xf = h_ref[:, :in_p]
    stage_ref[:, N_BASES * in_p:N_FEATS * in_p] = (
        (xf * jax.nn.sigmoid(xf)).astype(stage_ref.dtype))

    # --- One deep MXU contraction: spline + base branches fused (f32 acc).
    return jnp.dot(stage_ref[:, :N_FEATS * in_p], w_ref[...],
                   preferred_element_type=jnp.float32)


def _kan_actor_kernel(n_actions, x_ref, *refs):
    """Fused 4-layer KAN actor + softmax for one batch tile, entirely in VMEM."""
    n_layers = len(refs) - 3
    w_refs = refs[:n_layers]
    o_ref = refs[n_layers]
    act_ref = refs[n_layers + 1]
    stage_ref = refs[n_layers + 2]

    tb = x_ref.shape[0]
    row_strip = 16 if tb % 16 == 0 else 8

    h_ref = x_ref                     # layer 0 reads straight from the input block
    out = None
    for l, w_ref in enumerate(w_refs):
        in_p = w_ref.shape[0] // N_FEATS
        out = _kan_layer(h_ref, in_p, w_ref, stage_ref, row_strip)
        if l + 1 < n_layers:
            act_ref[:, :out.shape[1]] = out   # inter-layer activations stay in VMEM
            h_ref = act_ref

    # nn.Softmax(dim=-1): padded logit columns are masked so the lane-dense
    # (x128) output stays exact; exact division (no approx reciprocal).
    col = jax.lax.broadcasted_iota(jnp.int32, out.shape, 1)
    logits = jnp.where(col < n_actions, out, jnp.float32(-1e30))
    logits = logits - jnp.max(logits, axis=-1, keepdims=True)
    e = jnp.exp(logits)
    o_ref[...] = (e / jnp.sum(e, axis=-1, keepdims=True)).astype(o_ref.dtype)


# ---- Host wrapper ------------------------------------------------------------
def kan_actor_forward(x, params, n_actions, *, tile_b=128):
    """x: (B, input_dims) -> categorical probabilities (B, n_actions)."""
    B, in_dims = x.shape
    n_layers = len(params)
    in_p0 = params[0].shape[0] // N_FEATS
    out_p_last = params[-1].shape[1]
    max_in_p = max(w.shape[0] // N_FEATS for w in params)
    assert n_actions <= out_p_last

    tb = min(tile_b, _round_up(B, 8))
    b_pad = _round_up(B, tb)
    # Prefer >= 2 grid steps so the "parallel" batch axis can span both v7x TCs.
    if b_pad == tb and tb >= 16:
        tb = _round_up(tb // 2, 8)
        b_pad = _round_up(B, tb)

    # Zero-pad batch (to the tile) and features (to the lane-aligned weight layout);
    # padded feature columns hit zero weight rows so they contribute nothing.
    xp = jnp.zeros((b_pad, in_p0), jnp.float32).at[:B, :in_dims].set(
        x.astype(jnp.float32))

    # VMEM budget: single-buffered resident bf16 weights + staging + activation
    # scratch + double-buffered I/O blocks, capped at 0.9x physical VMEM.
    weight_bytes = sum(int(w.size) * w.dtype.itemsize for w in params)
    stage_bytes = tb * N_FEATS * max_in_p * 2
    act_bytes = tb * max_in_p * 4
    io_bytes = 2 * tb * (in_p0 + out_p_last) * 4
    needed = weight_bytes + stage_bytes + act_bytes + io_bytes
    try:
        phys = pltpu.get_tpu_info().vmem_capacity_bytes
    except Exception:
        phys = 64 << 20                      # v7x per-TC capacity; safe fallback
    vmem_limit = int(min(max(needed + (16 << 20), 32 << 20), int(0.9 * phys)))

    out = pl.pallas_call(
        functools.partial(_kan_actor_kernel, n_actions),
        out_shape=jax.ShapeDtypeStruct((b_pad, out_p_last), jnp.float32),
        grid_spec=pltpu.PrefetchScalarGridSpec(
            num_scalar_prefetch=0,
            grid=(b_pad // tb,),
            in_specs=[pl.BlockSpec((tb, in_p0), lambda i: (i, 0))]
                    # Weights: whole-array, single-buffered, resident in VMEM
                    # (no per-step DMA / no double-buffering).
                    + [pl.BlockSpec(memory_space=pltpu.MemorySpace.VMEM)] * n_layers,
            out_specs=pl.BlockSpec((tb, out_p_last), lambda i: (i, 0)),
            scratch_shapes=[
                pltpu.VMEM((tb, max_in_p), jnp.float32),              # activations
                pltpu.VMEM((tb, N_FEATS * max_in_p), jnp.bfloat16),   # bases+SiLU
            ],
        ),
        compiler_params=pltpu.CompilerParams(
            dimension_semantics=("parallel",),
            vmem_limit_bytes=vmem_limit,
        ),
    )(xp, *params)
    return out[:B, :n_actions]


# ---- Parameter init (deterministic; pre-laid-out for the kernel) ------------
def init_kan_linear(key, in_dim, out_dim):
    """Kernel-layout combined weight, shape (9*in_p, out_p), bf16:
       rows [j*in_p + f] = (spline_W * spline_scaler)[o, f, j]   (basis-major)
       rows [8*in_p + f] = base_W[o, f]
       zero-padded to lane-aligned (x128) in_p / out_p.
    """
    in_p = _round_up(in_dim, LANE)
    out_p = _round_up(out_dim, LANE)
    k1, k2, k3 = jax.random.split(key, 3)
    s = 1.0 / np.sqrt(in_dim)
    base_w = jax.random.uniform(k1, (out_dim, in_dim), minval=-s, maxval=s)
    spline_w = jax.random.uniform(k2, (out_dim, in_dim, N_BASES),
                                  minval=-s, maxval=s) * (0.1 / GRID_SIZE)
    spline_scaler = jax.random.uniform(k3, (out_dim, in_dim), minval=-s, maxval=s)
    spline_ws = spline_w * spline_scaler[..., None]                 # (out, in, 8)

    blocks = jnp.zeros((N_FEATS, in_p, out_p), jnp.float32)
    blocks = blocks.at[:N_BASES, :in_dim, :out_dim].set(
        jnp.transpose(spline_ws, (2, 1, 0)))
    blocks = blocks.at[N_BASES, :in_dim, :out_dim].set(base_w.T)
    return blocks.reshape(N_FEATS * in_p, out_p).astype(jnp.bfloat16)


def init_kan_actor(key, n_actions, input_dims, fc1_dims, fc2_dims):
    # KAN([input_dims, fc1, fc2]) -> KAN([fc2, fc1, n_actions])
    widths = [(input_dims, fc1_dims), (fc1_dims, fc2_dims),
              (fc2_dims, fc1_dims), (fc1_dims, n_actions)]
    return [init_kan_linear(jax.random.fold_in(key, i), din, dout)
            for i, (din, dout) in enumerate(widths)]


# ---- Pure-JAX reference (same stored weights, f32 math) ----------------------
def kan_actor_reference(x, params, n_actions):
    g = jnp.asarray(_GRID, jnp.float32)
    in_p0 = params[0].shape[0] // N_FEATS
    B, d = x.shape
    h = jnp.zeros((B, in_p0), jnp.float32).at[:, :d].set(x.astype(jnp.float32))
    for w in params:
        in_p = w.shape[0] // N_FEATS
        xb = h[..., None]                                            # (B, in, 1)
        bases = ((xb >= g[:-1]) & (xb < g[1:])).astype(jnp.float32)  # (B, in, 11)
        for k in range(1, SPLINE_ORDER + 1):
            bases = ((xb - g[:-(k + 1)]) / (g[k:-1] - g[:-(k + 1)]) * bases[..., :-1]
                     + (g[k + 1:] - xb) / (g[k + 1:] - g[1:-k]) * bases[..., 1:])
        spl = jnp.transpose(bases, (0, 2, 1)).reshape(B, N_BASES * in_p)
        feats = jnp.concatenate([spl, h * jax.nn.sigmoid(h)], axis=-1)
        h = jnp.dot(feats, w.astype(jnp.float32))
    return jax.nn.softmax(h[:, :n_actions], axis=-1)


# ---- Demo --------------------------------------------------------------------
if __name__ == "__main__":
    BATCH = 2
    INPUT_DIMS = 16
    FC1_DIMS = 32      # small stand-ins for 512 / 1024
    FC2_DIMS = 64
    N_ACTIONS = 4

    root = jax.random.PRNGKey(0)
    kx, kp = jax.random.split(root)
    x = jax.random.normal(kx, (BATCH, INPUT_DIMS), dtype=jnp.float32)
    params = init_kan_actor(kp, N_ACTIONS, INPUT_DIMS, FC1_DIMS, FC2_DIMS)

    probs = jax.block_until_ready(kan_actor_forward(x, params, N_ACTIONS))
    ref = jax.block_until_ready(kan_actor_reference(x, params, N_ACTIONS))

    assert probs.shape == (BATCH, N_ACTIONS)
    assert bool(jnp.all(jnp.isfinite(probs)))
    assert bool(jnp.allclose(jnp.sum(probs, axis=-1), 1.0, atol=1e-3))
    assert bool(jnp.allclose(probs, ref, atol=5e-2))
    print("KERNEL_OK")
</pallas_src>

<mosaic_0001>
module attributes {stable_mosaic.version = 11 : i64} {
  func.func @_kan_actor_kernel(%arg0: i32, %arg1: memref<8x128xf32, #tpu.memory_space<vmem>>, %arg2: memref<1152x128xbf16, #tpu.memory_space<vmem>>, %arg3: memref<1152x128xbf16, #tpu.memory_space<vmem>>, %arg4: memref<1152x128xbf16, #tpu.memory_space<vmem>>, %arg5: memref<1152x128xbf16, #tpu.memory_space<vmem>>, %arg6: memref<8x128xf32, #tpu.memory_space<vmem>>, %arg7: memref<8x128xf32, #tpu.memory_space<vmem>>, %arg8: memref<8x1152xbf16, #tpu.memory_space<vmem>>) attributes {dimension_semantics = [#tpu.dimension_semantics<parallel>], iteration_bounds = array<i64: 1>, scalar_prefetch = 0 : i64, scratch_operands = 2 : i64, tpu.core_type = #tpu.core_type<tc>, window_params = [{transform_indices = @transform_0, window_bounds = array<i64: 8, 128>}, {pipeline_mode = #tpu.pipeline_mode<synchronous>, transform_indices = @transform_1, window_bounds = array<i64: 1152, 128>}, {pipeline_mode = #tpu.pipeline_mode<synchronous>, transform_indices = @transform_2, window_bounds = array<i64: 1152, 128>}, {pipeline_mode = #tpu.pipeline_mode<synchronous>, transform_indices = @transform_3, window_bounds = array<i64: 1152, 128>}, {pipeline_mode = #tpu.pipeline_mode<synchronous>, transform_indices = @transform_4, window_bounds = array<i64: 1152, 128>}, {transform_indices = @transform_5, window_bounds = array<i64: 8, 128>}]} {
    %c0 = arith.constant 0 : index
    %c0_0 = arith.constant 0 : index
    %0 = vector.load %arg1[%c0, %c0_0] : memref<8x128xf32, #tpu.memory_space<vmem>>, vector<8x128xf32>
    %cst = arith.constant -2.200000e+00 : f32
    %1 = vector.broadcast %cst : f32 to vector<8x128xf32>
    %2 = arith.cmpf oge, %0, %1 : vector<8x128xf32>
    %3 = arith.extui %2 : vector<8x128xi1> to vector<8x128xi32>
    %4 = arith.sitofp %3 : vector<8x128xi32> to vector<8x128xf32>
    %cst_1 = arith.constant -1.800000e+00 : f32
    %5 = vector.broadcast %cst_1 : f32 to vector<8x128xf32>
    %6 = arith.cmpf oge, %0, %5 : vector<8x128xf32>
    %7 = arith.extui %6 : vector<8x128xi1> to vector<8x128xi32>
    %8 = arith.sitofp %7 : vector<8x128xi32> to vector<8x128xf32>
    %cst_2 = arith.constant -1.400000e+00 : f32
    %9 = vector.broadcast %cst_2 : f32 to vector<8x128xf32>
    %10 = arith.cmpf oge, %0, %9 : vector<8x128xf32>
    %11 = arith.extui %10 : vector<8x128xi1> to vector<8x128xi32>
    %12 = arith.sitofp %11 : vector<8x128xi32> to vector<8x128xf32>
    %cst_3 = arith.constant -1.000000e+00 : f32
    %13 = vector.broadcast %cst_3 : f32 to vector<8x128xf32>
    %14 = arith.cmpf oge, %0, %13 : vector<8x128xf32>
    %15 = arith.extui %14 : vector<8x128xi1> to vector<8x128xi32>
    %16 = arith.sitofp %15 : vector<8x128xi32> to vector<8x128xf32>
    %cst_4 = arith.constant -6.000000e-01 : f32
    %17 = vector.broadcast %cst_4 : f32 to vector<8x128xf32>
    %18 = arith.cmpf oge, %0, %17 : vector<8x128xf32>
    %19 = arith.extui %18 : vector<8x128xi1> to vector<8x128xi32>
    %20 = arith.sitofp %19 : vector<8x128xi32> to vector<8x128xf32>
    %cst_5 = arith.constant -2.000000e-01 : f32
    %21 = vector.broadcast %cst_5 : f32 to vector<8x128xf32>
    %22 = arith.cmpf oge, %0, %21 : vector<8x128xf32>
    %23 = arith.extui %22 : vector<8x128xi1> to vector<8x128xi32>
    %24 = arith.sitofp %23 : vector<8x128xi32> to vector<8x128xf32>
    %cst_6 = arith.constant 2.000000e-01 : f32
    %25 = vector.broadcast %cst_6 : f32 to vector<8x128xf32>
    %26 = arith.cmpf oge, %0, %25 : vector<8x128xf32>
    %27 = arith.extui %26 : vector<8x128xi1> to vector<8x128xi32>
    %28 = arith.sitofp %27 : vector<8x128xi32> to vector<8x128xf32>
    %cst_7 = arith.constant 6.000000e-01 : f32
    %29 = vector.broadcast %cst_7 : f32 to vector<8x128xf32>
    %30 = arith.cmpf oge, %0, %29 : vector<8x128xf32>
    %31 = arith.extui %30 : vector<8x128xi1> to vector<8x128xi32>
    %32 = arith.sitofp %31 : vector<8x128xi32> to vector<8x128xf32>
    %cst_8 = arith.constant 1.000000e+00 : f32
    %33 = vector.broadcast %cst_8 : f32 to vector<8x128xf32>
    %34 = arith.cmpf oge, %0, %33 : vector<8x128xf32>
    %35 = arith.extui %34 : vector<8x128xi1> to vector<8x128xi32>
    %36 = arith.sitofp %35 : vector<8x128xi32> to vector<8x128xf32>
    %cst_9 = arith.constant 1.400000e+00 : f32
    %37 = vector.broadcast %cst_9 : f32 to vector<8x128xf32>
    %38 = arith.cmpf oge, %0, %37 : vector<8x128xf32>
    %39 = arith.extui %38 : vector<8x128xi1> to vector<8x128xi32>
    %40 = arith.sitofp %39 : vector<8x128xi32> to vector<8x128xf32>
    %cst_10 = arith.constant 1.800000e+00 : f32
    %41 = vector.broadcast %cst_10 : f32 to vector<8x128xf32>
    %42 = arith.cmpf oge, %0, %41 : vector<8x128xf32>
    %43 = arith.extui %42 : vector<8x128xi1> to vector<8x128xi32>
    %44 = arith.sitofp %43 : vector<8x128xi32> to vector<8x128xf32>
    %cst_11 = arith.constant 2.200000e+00 : f32
    %45 = vector.broadcast %cst_11 : f32 to vector<8x128xf32>
    %46 = arith.cmpf oge, %0, %45 : vector<8x128xf32>
    %47 = arith.extui %46 : vector<8x128xi1> to vector<8x128xi32>
    %48 = arith.sitofp %47 : vector<8x128xi32> to vector<8x128xf32>
    %49 = arith.subf %4, %8 : vector<8x128xf32>
    %50 = arith.subf %8, %12 : vector<8x128xf32>
    %51 = arith.subf %12, %16 : vector<8x128xf32>
    %52 = arith.subf %16, %20 : vector<8x128xf32>
    %53 = arith.subf %20, %24 : vector<8x128xf32>
    %54 = arith.subf %24, %28 : vector<8x128xf32>
    %55 = arith.subf %28, %32 : vector<8x128xf32>
    %56 = arith.subf %32, %36 : vector<8x128xf32>
    %57 = arith.subf %36, %40 : vector<8x128xf32>
    %58 = arith.subf %40, %44 : vector<8x128xf32>
    %59 = arith.subf %44, %48 : vector<8x128xf32>
    %cst_12 = arith.constant 2.500000e+00 : f32
    %60 = vector.broadcast %cst_12 : f32 to vector<8x128xf32>
    %61 = arith.mulf %0, %60 : vector<8x128xf32>
    %cst_13 = arith.constant -5.500000e+00 : f32
    %62 = vector.broadcast %cst_13 : f32 to vector<8x128xf32>
    %63 = arith.subf %61, %62 : vector<8x128xf32>
    %cst_14 = arith.constant -4.500000e+00 : f32
    %64 = vector.broadcast %cst_14 : f32 to vector<8x128xf32>
    %65 = arith.subf %61, %64 : vector<8x128xf32>
    %cst_15 = arith.constant -3.500000e+00 : f32
    %66 = vector.broadcast %cst_15 : f32 to vector<8x128xf32>
    %67 = arith.subf %61, %66 : vector<8x128xf32>
    %cst_16 = arith.constant -2.500000e+00 : f32
    %68 = vector.broadcast %cst_16 : f32 to vector<8x128xf32>
    %69 = arith.subf %61, %68 : vector<8x128xf32>
    %cst_17 = arith.constant -1.500000e+00 : f32
    %70 = vector.broadcast %cst_17 : f32 to vector<8x128xf32>
    %71 = arith.subf %61, %70 : vector<8x128xf32>
    %cst_18 = arith.constant -5.000000e-01 : f32
    %72 = vector.broadcast %cst_18 : f32 to vector<8x128xf32>
    %73 = arith.subf %61, %72 : vector<8x128xf32>
    %cst_19 = arith.constant 5.000000e-01 : f32
    %74 = vector.broadcast %cst_19 : f32 to vector<8x128xf32>
    %75 = arith.subf %61, %74 : vector<8x128xf32>
    %cst_20 = arith.constant 1.500000e+00 : f32
    %76 = vector.broadcast %cst_20 : f32 to vector<8x128xf32>
    %77 = arith.subf %61, %76 : vector<8x128xf32>
    %cst_21 = arith.constant 2.500000e+00 : f32
    %78 = vector.broadcast %cst_21 : f32 to vector<8x128xf32>
    %79 = arith.subf %61, %78 : vector<8x128xf32>
    %cst_22 = arith.constant 3.500000e+00 : f32
    %80 = vector.broadcast %cst_22 : f32 to vector<8x128xf32>
    %81 = arith.subf %61, %80 : vector<8x128xf32>
    %cst_23 = arith.constant -3.500000e+00 : f32
    %82 = vector.broadcast %cst_23 : f32 to vector<8x128xf32>
    %83 = arith.subf %82, %61 : vector<8x128xf32>
    %cst_24 = arith.constant -2.500000e+00 : f32
    %84 = vector.broadcast %cst_24 : f32 to vector<8x128xf32>
    %85 = arith.subf %84, %61 : vector<8x128xf32>
    %cst_25 = arith.constant -1.500000e+00 : f32
    %86 = vector.broadcast %cst_25 : f32 to vector<8x128xf32>
    %87 = arith.subf %86, %61 : vector<8x128xf32>
    %cst_26 = arith.constant -5.000000e-01 : f32
    %88 = vector.broadcast %cst_26 : f32 to vector<8x128xf32>
    %89 = arith.subf %88, %61 : vector<8x128xf32>
    %cst_27 = arith.constant 5.000000e-01 : f32
    %90 = vector.broadcast %cst_27 : f32 to vector<8x128xf32>
    %91 = arith.subf %90, %61 : vector<8x128xf32>
    %cst_28 = arith.constant 1.500000e+00 : f32
    %92 = vector.broadcast %cst_28 : f32 to vector<8x128xf32>
    %93 = arith.subf %92, %61 : vector<8x128xf32>
    %cst_29 = arith.constant 2.500000e+00 : f32
    %94 = vector.broadcast %cst_29 : f32 to vector<8x128xf32>
    %95 = arith.subf %94, %61 : vector<8x128xf32>
    %cst_30 = arith.constant 3.500000e+00 : f32
    %96 = vector.broadcast %cst_30 : f32 to vector<8x128xf32>
    %97 = arith.subf %96, %61 : vector<8x128xf32>
    %cst_31 = arith.constant 4.500000e+00 : f32
    %98 = vector.broadcast %cst_31 : f32 to vector<8x128xf32>
    %99 = arith.subf %98, %61 : vector<8x128xf32>
    %cst_32 = arith.constant 5.500000e+00 : f32
    %100 = vector.broadcast %cst_32 : f32 to vector<8x128xf32>
    %101 = arith.subf %100, %61 : vector<8x128xf32>
    %102 = arith.mulf %63, %49 : vector<8x128xf32>
    %103 = arith.mulf %83, %50 : vector<8x128xf32>
    %104 = arith.addf %102, %103 : vector<8x128xf32>
    %105 = arith.mulf %65, %50 : vector<8x128xf32>
    %106 = arith.mulf %85, %51 : vector<8x128xf32>
    %107 = arith.addf %105, %106 : vector<8x128xf32>
    %108 = arith.mulf %67, %51 : vector<8x128xf32>
    %109 = arith.mulf %87, %52 : vector<8x128xf32>
    %110 = arith.addf %108, %109 : vector<8x128xf32>
    %111 = arith.mulf %69, %52 : vector<8x128xf32>
    %112 = arith.mulf %89, %53 : vector<8x128xf32>
    %113 = arith.addf %111, %112 : vector<8x128xf32>
    %114 = arith.mulf %71, %53 : vector<8x128xf32>
    %115 = arith.mulf %91, %54 : vector<8x128xf32>
    %116 = arith.addf %114, %115 : vector<8x128xf32>
    %117 = arith.mulf %73, %54 : vector<8x128xf32>
    %118 = arith.mulf %93, %55 : vector<8x128xf32>
    %119 = arith.addf %117, %118 : vector<8x128xf32>
    %120 = arith.mulf %75, %55 : vector<8x128xf32>
    %121 = arith.mulf %95, %56 : vector<8x128xf32>
    %122 = arith.addf %120, %121 : vector<8x128xf32>
    %123 = arith.mulf %77, %56 : vector<8x128xf32>
    %124 = arith.mulf %97, %57 : vector<8x128xf32>
    %125 = arith.addf %123, %124 : vector<8x128xf32>
    %126 = arith.mulf %79, %57 : vector<8x128xf32>
    %127 = arith.mulf %99, %58 : vector<8x128xf32>
    %128 = arith.addf %126, %127 : vector<8x128xf32>
    %129 = arith.mulf %81, %58 : vector<8x128xf32>
    %130 = arith.mulf %101, %59 : vector<8x128xf32>
    %131 = arith.addf %129, %130 : vector<8x128xf32>
    %cst_33 = arith.constant 1.250000e+00 : f32
    %132 = vector.broadcast %cst_33 : f32 to vector<8x128xf32>
    %133 = arith.mulf %0, %132 : vector<8x128xf32>
    %cst_34 = arith.constant -2.750000e+00 : f32
    %134 = vector.broadcast %cst_34 : f32 to vector<8x128xf32>
    %135 = arith.subf %133, %134 : vector<8x128xf32>
    %cst_35 = arith.constant -2.250000e+00 : f32
    %136 = vector.broadcast %cst_35 : f32 to vector<8x128xf32>
    %137 = arith.subf %133, %136 : vector<8x128xf32>
    %cst_36 = arith.constant -1.750000e+00 : f32
    %138 = vector.broadcast %cst_36 : f32 to vector<8x128xf32>
    %139 = arith.subf %133, %138 : vector<8x128xf32>
    %cst_37 = arith.constant -1.250000e+00 : f32
    %140 = vector.broadcast %cst_37 : f32 to vector<8x128xf32>
    %141 = arith.subf %133, %140 : vector<8x128xf32>
    %cst_38 = arith.constant -7.500000e-01 : f32
    %142 = vector.broadcast %cst_38 : f32 to vector<8x128xf32>
    %143 = arith.subf %133, %142 : vector<8x128xf32>
    %cst_39 = arith.constant -2.500000e-01 : f32
    %144 = vector.broadcast %cst_39 : f32 to vector<8x128xf32>
    %145 = arith.subf %133, %144 : vector<8x128xf32>
    %cst_40 = arith.constant 2.500000e-01 : f32
    %146 = vector.broadcast %cst_40 : f32 to vector<8x128xf32>
    %147 = arith.subf %133, %146 : vector<8x128xf32>
    %cst_41 = arith.constant 7.500000e-01 : f32
    %148 = vector.broadcast %cst_41 : f32 to vector<8x128xf32>
    %149 = arith.subf %133, %148 : vector<8x128xf32>
    %cst_42 = arith.constant 1.250000e+00 : f32
    %150 = vector.broadcast %cst_42 : f32 to vector<8x128xf32>
    %151 = arith.subf %133, %150 : vector<8x128xf32>
    %cst_43 = arith.constant -1.250000e+00 : f32
    %152 = vector.broadcast %cst_43 : f32 to vector<8x128xf32>
    %153 = arith.subf %152, %133 : vector<8x128xf32>
    %cst_44 = arith.constant -7.500000e-01 : f32
    %154 = vector.broadcast %cst_44 : f32 to vector<8x128xf32>
    %155 = arith.subf %154, %133 : vector<8x128xf32>
    %cst_45 = arith.constant -2.500000e-01 : f32
    %156 = vector.broadcast %cst_45 : f32 to vector<8x128xf32>
    %157 = arith.subf %156, %133 : vector<8x128xf32>
    %cst_46 = arith.constant 2.500000e-01 : f32
    %158 = vector.broadcast %cst_46 : f32 to vector<8x128xf32>
    %159 = arith.subf %158, %133 : vector<8x128xf32>
    %cst_47 = arith.constant 7.500000e-01 : f32
    %160 = vector.broadcast %cst_47 : f32 to vector<8x128xf32>
    %161 = arith.subf %160, %133 : vector<8x128xf32>
    %cst_48 = arith.constant 1.250000e+00 : f32
    %162 = vector.broadcast %cst_48 : f32 to vector<8x128xf32>
    %163 = arith.subf %162, %133 : vector<8x128xf32>
    %cst_49 = arith.constant 1.750000e+00 : f32
    %164 = vector.broadcast %cst_49 : f32 to vector<8x128xf32>
    %165 = arith.subf %164, %133 : vector<8x128xf32>
    %cst_50 = arith.constant 2.250000e+00 : f32
    %166 = vector.broadcast %cst_50 : f32 to vector<8x128xf32>
    %167 = arith.subf %166, %133 : vector<8x128xf32>
    %cst_51 = arith.constant 2.750000e+00 : f32
    %168 = vector.broadcast %cst_51 : f32 to vector<8x128xf32>
    %169 = arith.subf %168, %133 : vector<8x128xf32>
    %170 = arith.mulf %135, %104 : vector<8x128xf32>
    %171 = arith.mulf %153, %107 : vector<8x128xf32>
    %172 = arith.addf %170, %171 : vector<8x128xf32>
    %173 = arith.mulf %137, %107 : vector<8x128xf32>
    %174 = arith.mulf %155, %110 : vector<8x128xf32>
    %175 = arith.addf %173, %174 : vector<8x128xf32>
    %176 = arith.mulf %139, %110 : vector<8x128xf32>
    %177 = arith.mulf %157, %113 : vector<8x128xf32>
    %178 = arith.addf %176, %177 : vector<8x128xf32>
    %179 = arith.mulf %141, %113 : vector<8x128xf32>
    %180 = arith.mulf %159, %116 : vector<8x128xf32>
    %181 = arith.addf %179, %180 : vector<8x128xf32>
    %182 = arith.mulf %143, %116 : vector<8x128xf32>
    %183 = arith.mulf %161, %119 : vector<8x128xf32>
    %184 = arith.addf %182, %183 : vector<8x128xf32>
    %185 = arith.mulf %145, %119 : vector<8x128xf32>
    %186 = arith.mulf %163, %122 : vector<8x128xf32>
    %187 = arith.addf %185, %186 : vector<8x128xf32>
    %188 = arith.mulf %147, %122 : vector<8x128xf32>
    %189 = arith.mulf %165, %125 : vector<8x128xf32>
    %190 = arith.addf %188, %189 : vector<8x128xf32>
    %191 = arith.mulf %149, %125 : vector<8x128xf32>
    %192 = arith.mulf %167, %128 : vector<8x128xf32>
    %193 = arith.addf %191, %192 : vector<8x128xf32>
    %194 = arith.mulf %151, %128 : vector<8x128xf32>
    %195 = arith.mulf %169, %131 : vector<8x128xf32>
    %196 = arith.addf %194, %195 : vector<8x128xf32>
    %cst_52 = arith.constant 0.833333313 : f32
    %197 = vector.broadcast %cst_52 : f32 to vector<8x128xf32>
    %198 = arith.mulf %0, %197 : vector<8x128xf32>
    %cst_53 = arith.constant -1.83333337 : f32
    %199 = vector.broadcast %cst_53 : f32 to vector<8x128xf32>
    %200 = arith.subf %198, %199 : vector<8x128xf32>
    %cst_54 = arith.constant -1.500000e+00 : f32
    %201 = vector.broadcast %cst_54 : f32 to vector<8x128xf32>
    %202 = arith.subf %198, %201 : vector<8x128xf32>
    %cst_55 = arith.constant -1.16666663 : f32
    %203 = vector.broadcast %cst_55 : f32 to vector<8x128xf32>
    %204 = arith.subf %198, %203 : vector<8x128xf32>
    %cst_56 = arith.constant -0.833333313 : f32
    %205 = vector.broadcast %cst_56 : f32 to vector<8x128xf32>
    %206 = arith.subf %198, %205 : vector<8x128xf32>
    %cst_57 = arith.constant -5.000000e-01 : f32
    %207 = vector.broadcast %cst_57 : f32 to vector<8x128xf32>
    %208 = arith.subf %198, %207 : vector<8x128xf32>
    %cst_58 = arith.constant -0.166666672 : f32
    %209 = vector.broadcast %cst_58 : f32 to vector<8x128xf32>
    %210 = arith.subf %198, %209 : vector<8x128xf32>
    %cst_59 = arith.constant 0.166666672 : f32
    %211 = vector.broadcast %cst_59 : f32 to vector<8x128xf32>
    %212 = arith.subf %198, %211 : vector<8x128xf32>
    %cst_60 = arith.constant 5.000000e-01 : f32
    %213 = vector.broadcast %cst_60 : f32 to vector<8x128xf32>
    %214 = arith.subf %198, %213 : vector<8x128xf32>
    %cst_61 = arith.constant -5.000000e-01 : f32
    %215 = vector.broadcast %cst_61 : f32 to vector<8x128xf32>
    %216 = arith.subf %215, %198 : vector<8x128xf32>
    %cst_62 = arith.constant -0.166666672 : f32
    %217 = vector.broadcast %cst_62 : f32 to vector<8x128xf32>
    %218 = arith.subf %217, %198 : vector<8x128xf32>
    %cst_63 = arith.constant 0.166666672 : f32
    %219 = vector.broadcast %cst_63 : f32 to vector<8x128xf32>
    %220 = arith.subf %219, %198 : vector<8x128xf32>
    %cst_64 = arith.constant 5.000000e-01 : f32
    %221 = vector.broadcast %cst_64 : f32 to vector<8x128xf32>
    %222 = arith.subf %221, %198 : vector<8x128xf32>
    %cst_65 = arith.constant 0.833333313 : f32
    %223 = vector.broadcast %cst_65 : f32 to vector<8x128xf32>
    %224 = arith.subf %223, %198 : vector<8x128xf32>
    %cst_66 = arith.constant 1.16666663 : f32
    %225 = vector.broadcast %cst_66 : f32 to vector<8x128xf32>
    %226 = arith.subf %225, %198 : vector<8x128xf32>
    %cst_67 = arith.constant 1.500000e+00 : f32
    %227 = vector.broadcast %cst_67 : f32 to vector<8x128xf32>
    %228 = arith.subf %227, %198 : vector<8x128xf32>
    %cst_68 = arith.constant 1.83333337 : f32
    %229 = vector.broadcast %cst_68 : f32 to vector<8x128xf32>
    %230 = arith.subf %229, %198 : vector<8x128xf32>
    %231 = arith.mulf %200, %172 : vector<8x128xf32>
    %232 = arith.mulf %216, %175 : vector<8x128xf32>
    %233 = arith.addf %231, %232 : vector<8x128xf32>
    %234 = arith.truncf %233 : vector<8x128xf32> to vector<8x128xbf16>
    %c0_69 = arith.constant 0 : index
    %c0_70 = arith.constant 0 : index
    %235 = vector.load %arg8[%c0_69, %c0_70] : memref<8x1152xbf16, #tpu.memory_space<vmem>>, vector<8x128xbf16>
    tpu.vector_store %arg8[%c0_69, %c0_70], %234 {strides = array<i32>} : memref<8x1152xbf16, #tpu.memory_space<vmem>>, vector<8x128xbf16>,
    %236 = arith.mulf %202, %175 : vector<8x128xf32>
    %237 = arith.mulf %218, %178 : vector<8x128xf32>
    %238 = arith.addf %236, %237 : vector<8x128xf32>
    %239 = arith.truncf %238 : vector<8x128xf32> to vector<8x128xbf16>
    %c0_71 = arith.constant 0 : index
    %c128 = arith.constant 128 : index
    %240 = vector.load %arg8[%c0_71, %c128] : memref<8x1152xbf16, #tpu.memory_space<vmem>>, vector<8x128xbf16>
    tpu.vector_store %arg8[%c0_71, %c128], %239 {strides = array<i32>} : memref<8x1152xbf16, #tpu.memory_space<vmem>>, vector<8x128xbf16>,
    %241 = arith.mulf %204, %178 : vector<8x128xf32>
    %242 = arith.mulf %220, %181 : vector<8x128xf32>
    %243 = arith.addf %241, %242 : vector<8x128xf32>
    %244 = arith.truncf %243 : vector<8x128xf32> to vector<8x128xbf16>
    %c0_72 = arith.constant 0 : index
    %c256 = arith.constant 256 : index
    %245 = vector.load %arg8[%c0_72, %c256] : memref<8x1152xbf16, #tpu.memory_space<vmem>>, vector<8x128xbf16>
    tpu.vector_store %arg8[%c0_72, %c256], %244 {strides = array<i32>} : memref<8x1152xbf16, #tpu.memory_space<vmem>>, vector<8x128xbf16>,
    %246 = arith.mulf %206, %181 : vector<8x128xf32>
    %247 = arith.mulf %222, %184 : vector<8x128xf32>
    %248 = arith.addf %246, %247 : vector<8x128xf32>
    %249 = arith.truncf %248 : vector<8x128xf32> to vector<8x128xbf16>
    %c0_73 = arith.constant 0 : index
    %c384 = arith.constant 384 : index
    %250 = vector.load %arg8[%c0_73, %c384] : memref<8x1152xbf16, #tpu.memory_space<vmem>>, vector<8x128xbf16>
    tpu.vector_store %arg8[%c0_73, %c384], %249 {strides = array<i32>} : memref<8x1152xbf16, #tpu.memory_space<vmem>>, vector<8x128xbf16>,
    %251 = arith.mulf %208, %184 : vector<8x128xf32>
    %252 = arith.mulf %224, %187 : vector<8x128xf32>
    %253 = arith.addf %251, %252 : vector<8x128xf32>
    %254 = arith.truncf %253 : vector<8x128xf32> to vector<8x128xbf16>
    %c0_74 = arith.constant 0 : index
    %c512 = arith.constant 512 : index
    %255 = vector.load %arg8[%c0_74, %c512] : memref<8x1152xbf16, #tpu.memory_space<vmem>>, vector<8x128xbf16>
    tpu.vector_store %arg8[%c0_74, %c512], %254 {strides = array<i32>} : memref<8x1152xbf16, #tpu.memory_space<vmem>>, vector<8x128xbf16>,
    %256 = arith.mulf %210, %187 : vector<8x128xf32>
    %257 = arith.mulf %226, %190 : vector<8x128xf32>
    %258 = arith.addf %256, %257 : vector<8x128xf32>
    %259 = arith.truncf %258 : vector<8x128xf32> to vector<8x128xbf16>
    %c0_75 = arith.constant 0 : index
    %c640 = arith.constant 640 : index
    %260 = vector.load %arg8[%c0_75, %c640] : memref<8x1152xbf16, #tpu.memory_space<vmem>>, vector<8x128xbf16>
    tpu.vector_store %arg8[%c0_75, %c640], %259 {strides = array<i32>} : memref<8x1152xbf16, #tpu.memory_space<vmem>>, vector<8x128xbf16>,
    %261 = arith.mulf %212, %190 : vector<8x128xf32>
    %262 = arith.mulf %228, %193 : vector<8x128xf32>
    %263 = arith.addf %261, %262 : vector<8x128xf32>
    %264 = arith.truncf %263 : vector<8x128xf32> to vector<8x128xbf16>
    %c0_76 = arith.constant 0 : index
    %c768 = arith.constant 768 : index
    %265 = vector.load %arg8[%c0_76, %c768] : memref<8x1152xbf16, #tpu.memory_space<vmem>>, vector<8x128xbf16>
    tpu.vector_store %arg8[%c0_76, %c768], %264 {strides = array<i32>} : memref<8x1152xbf16, #tpu.memory_space<vmem>>, vector<8x128xbf16>,
    %266 = arith.mulf %214, %193 : vector<8x128xf32>
    %267 = arith.mulf %230, %196 : vector<8x128xf32>
    %268 = arith.addf %266, %267 : vector<8x128xf32>
    %269 = arith.truncf %268 : vector<8x128xf32> to vector<8x128xbf16>
    %c0_77 = arith.constant 0 : index
    %c896 = arith.constant 896 : index
    %270 = vector.load %arg8[%c0_77, %c896] : memref<8x1152xbf16, #tpu.memory_space<vmem>>, vector<8x128xbf16>
    tpu.vector_store %arg8[%c0_77, %c896], %269 {strides = array<i32>} : memref<8x1152xbf16, #tpu.memory_space<vmem>>, vector<8x128xbf16>,
    %c0_78 = arith.constant 0 : index
    %c0_79 = arith.constant 0 : index
    %271 = vector.load %arg1[%c0_78, %c0_79] : memref<8x128xf32, #tpu.memory_space<vmem>>, vector<8x128xf32>
    %272 = arith.negf %271 : vector<8x128xf32>
    %273 = math.exp %272 : vector<8x128xf32>
    %cst_80 = arith.constant 1.000000e+00 : f32
    %274 = vector.broadcast %cst_80 : f32 to vector<8x128xf32>
    %275 = arith.addf %274, %273 : vector<8x128xf32>
    %276 = arith.divf %274, %275 : vector<8x128xf32>
    %277 = arith.mulf %271, %276 : vector<8x128xf32>
    %278 = arith.truncf %277 : vector<8x128xf32> to vector<8x128xbf16>
    %c0_81 = arith.constant 0 : index
    %c1024 = arith.constant 1024 : index
    %279 = vector.load %arg8[%c0_81, %c1024] : memref<8x1152xbf16, #tpu.memory_space<vmem>>, vector<8x128xbf16>
    tpu.vector_store %arg8[%c0_81, %c1024], %278 {strides = array<i32>} : memref<8x1152xbf16, #tpu.memory_space<vmem>>, vector<8x128xbf16>,
    %c0_82 = arith.constant 0 : index
    %c0_83 = arith.constant 0 : index
    %280 = vector.load %arg8[%c0_82, %c0_83] : memref<8x1152xbf16, #tpu.memory_space<vmem>>, vector<8x1152xbf16>
    %c0_84 = arith.constant 0 : index
    %c0_85 = arith.constant 0 : index
    %281 = vector.load %arg2[%c0_84, %c0_85] : memref<1152x128xbf16, #tpu.memory_space<vmem>>, vector<1152x128xbf16>
    %cst_86 = arith.constant dense<0.000000e+00> : vector<8x128xf32>
    %282 = tpu.matmul %280, %281, %cst_86 {dimension_numbers = #tpu.dot_dimension_numbers<[1], [0], [0], [1], [0, 0, 1, 1], [], []>} : vector<8x1152xbf16>, vector<1152x128xbf16>, vector<8x128xf32> -> vector<8x128xf32>
    %c0_87 = arith.constant 0 : index
    %c0_88 = arith.constant 0 : index
    %283 = vector.load %arg7[%c0_87, %c0_88] : memref<8x128xf32, #tpu.memory_space<vmem>>, vector<8x128xf32>
    tpu.vector_store %arg7[%c0_87, %c0_88], %282 {strides = array<i32>} : memref<8x128xf32, #tpu.memory_space<vmem>>, vector<8x128xf32>,
    %c0_89 = arith.constant 0 : index
    %c0_90 = arith.constant 0 : index
    %284 = vector.load %arg7[%c0_89, %c0_90] : memref<8x128xf32, #tpu.memory_space<vmem>>, vector<8x128xf32>
    %cst_91 = arith.constant -2.200000e+00 : f32
    %285 = vector.broadcast %cst_91 : f32 to vector<8x128xf32>
    %286 = arith.cmpf oge, %284, %285 : vector<8x128xf32>
    %287 = arith.extui %286 : vector<8x128xi1> to vector<8x128xi32>
    %288 = arith.sitofp %287 : vector<8x128xi32> to vector<8x128xf32>
    %cst_92 = arith.constant -1.800000e+00 : f32
    %289 = vector.broadcast %cst_92 : f32 to vector<8x128xf32>
    %290 = arith.cmpf oge, %284, %289 : vector<8x128xf32>
    %291 = arith.extui %290 : vector<8x128xi1> to vector<8x128xi32>
    %292 = arith.sitofp %291 : vector<8x128xi32> to vector<8x128xf32>
    %cst_93 = arith.constant -1.400000e+00 : f32
    %293 = vector.broadcast %cst_93 : f32 to vector<8x128xf32>
    %294 = arith.cmpf oge, %284, %293 : vector<8x128xf32>
    %295 = arith.extui %294 : vector<8x128xi1> to vector<8x128xi32>
    %296 = arith.sitofp %295 : vector<8x128xi32> to vector<8x128xf32>
    %cst_94 = arith.constant -1.000000e+00 : f32
    %297 = vector.broadcast %cst_94 : f32 to vector<8x128xf32>
    %298 = arith.cmpf oge, %284, %297 : vector<8x128xf32>
    %299 = arith.extui %298 : vector<8x128xi1> to vector<8x128xi32>
    %300 = arith.sitofp %299 : vector<8x128xi32> to vector<8x128xf32>
    %cst_95 = arith.constant -6.000000e-01 : f32
    %301 = vector.broadcast %cst_95 : f32 to vector<8x128xf32>
    %302 = arith.cmpf oge, %284, %301 : vector<8x128xf32>
    %303 = arith.extui %302 : vector<8x128xi1> to vector<8x128xi32>
    %304 = arith.sitofp %303 : vector<8x128xi32> to vector<8x128xf32>
    %cst_96 = arith.constant -2.000000e-01 : f32
    %305 = vector.broadcast %cst_96 : f32 to vector<8x128xf32>
    %306 = arith.cmpf oge, %284, %305 : vector<8x128xf32>
    %307 = arith.extui %306 : vector<8x128xi1> to vector<8x128xi32>
    %308 = arith.sitofp %307 : vector<8x128xi32> to vector<8x128xf32>
    %cst_97 = arith.constant 2.000000e-01 : f32
    %309 = vector.broadcast %cst_97 : f32 to vector<8x128xf32>
    %310 = arith.cmpf oge, %284, %309 : vector<8x128xf32>
    %311 = arith.extui %310 : vector<8x128xi1> to vector<8x128xi32>
    %312 = arith.sitofp %311 : vector<8x128xi32> to vector<8x128xf32>
    %cst_98 = arith.constant 6.000000e-01 : f32
    %313 = vector.broadcast %cst_98 : f32 to vector<8x128xf32>
    %314 = arith.cmpf oge, %284, %313 : vector<8x128xf32>
    %315 = arith.extui %314 : vector<8x128xi1> to vector<8x128xi32>
    %316 = arith.sitofp %315 : vector<8x128xi32> to vector<8x128xf32>
    %cst_99 = arith.constant 1.000000e+00 : f32
    %317 = vector.broadcast %cst_99 : f32 to vector<8x128xf32>
    %318 = arith.cmpf oge, %284, %317 : vector<8x128xf32>
    %319 = arith.extui %318 : vector<8x128xi1> to vector<8x128xi32>
    %320 = arith.sitofp %319 : vector<8x128xi32> to vector<8x128xf32>
    %cst_100 = arith.constant 1.400000e+00 : f32
    %321 = vector.broadcast %cst_100 : f32 to vector<8x128xf32>
    %322 = arith.cmpf oge, %284, %321 : vector<8x128xf32>
    %323 = arith.extui %322 : vector<8x128xi1> to vector<8x128xi32>
    %324 = arith.sitofp %323 : vector<8x128xi32> to vector<8x128xf32>
    %cst_101 = arith.constant 1.800000e+00 : f32
    %325 = vector.broadcast %cst_101 : f32 to vector<8x128xf32>
    %326 = arith.cmpf oge, %284, %325 : vector<8x128xf32>
    %327 = arith.extui %326 : vector<8x128xi1> to vector<8x128xi32>
    %328 = arith.sitofp %327 : vector<8x128xi32> to vector<8x128xf32>
    %cst_102 = arith.constant 2.200000e+00 : f32
    %329 = vector.broadcast %cst_102 : f32 to vector<8x128xf32>
    %330 = arith.cmpf oge, %284, %329 : vector<8x128xf32>
    %331 = arith.extui %330 : vector<8x128xi1> to vector<8x128xi32>
    %332 = arith.sitofp %331 : vector<8x128xi32> to vector<8x128xf32>
    %333 = arith.subf %288, %292 : vector<8x128xf32>
    %334 = arith.subf %292, %296 : vector<8x128xf32>
    %335 = arith.subf %296, %300 : vector<8x128xf32>
    %336 = arith.subf %300, %304 : vector<8x128xf32>
    %337 = arith.subf %304, %308 : vector<8x128xf32>
    %338 = arith.subf %308, %312 : vector<8x128xf32>
    %339 = arith.subf %312, %316 : vector<8x128xf32>
    %340 = arith.subf %316, %320 : vector<8x128xf32>
    %341 = arith.subf %320, %324 : vector<8x128xf32>
    %342 = arith.subf %324, %328 : vector<8x128xf32>
    %343 = arith.subf %328, %332 : vector<8x128xf32>
    %cst_103 = arith.constant 2.500000e+00 : f32
    %344 = vector.broadcast %cst_103 : f32 to vector<8x128xf32>
    %345 = arith.mulf %284, %344 : vector<8x128xf32>
    %cst_104 = arith.constant -5.500000e+00 : f32
    %346 = vector.broadcast %cst_104 : f32 to vector<8x128xf32>
    %347 = arith.subf %345, %346 : vector<8x128xf32>
    %cst_105 = arith.constant -4.500000e+00 : f32
    %348 = vector.broadcast %cst_105 : f32 to vector<8x128xf32>
    %349 = arith.subf %345, %348 : vector<8x128xf32>
    %cst_106 = arith.constant -3.500000e+00 : f32
    %350 = vector.broadcast %cst_106 : f32 to vector<8x128xf32>
    %351 = arith.subf %345, %350 : vector<8x128xf32>
    %cst_107 = arith.constant -2.500000e+00 : f32
    %352 = vector.broadcast %cst_107 : f32 to vector<8x128xf32>
    %353 = arith.subf %345, %352 : vector<8x128xf32>
    %cst_108 = arith.constant -1.500000e+00 : f32
    %354 = vector.broadcast %cst_108 : f32 to vector<8x128xf32>
    %355 = arith.subf %345, %354 : vector<8x128xf32>
    %cst_109 = arith.constant -5.000000e-01 : f32
    %356 = vector.broadcast %cst_109 : f32 to vector<8x128xf32>
    %357 = arith.subf %345, %356 : vector<8x128xf32>
    %cst_110 = arith.constant 5.000000e-01 : f32
    %358 = vector.broadcast %cst_110 : f32 to vector<8x128xf32>
    %359 = arith.subf %345, %358 : vector<8x128xf32>
    %cst_111 = arith.constant 1.500000e+00 : f32
    %360 = vector.broadcast %cst_111 : f32 to vector<8x128xf32>
    %361 = arith.subf %345, %360 : vector<8x128xf32>
    %cst_112 = arith.constant 2.500000e+00 : f32
    %362 = vector.broadcast %cst_112 : f32 to vector<8x128xf32>
    %363 = arith.subf %345, %362 : vector<8x128xf32>
    %cst_113 = arith.constant 3.500000e+00 : f32
    %364 = vector.broadcast %cst_113 : f32 to vector<8x128xf32>
    %365 = arith.subf %345, %364 : vector<8x128xf32>
    %cst_114 = arith.constant -3.500000e+00 : f32
    %366 = vector.broadcast %cst_114 : f32 to vector<8x128xf32>
    %367 = arith.subf %366, %345 : vector<8x128xf32>
    %cst_115 = arith.constant -2.500000e+00 : f32
    %368 = vector.broadcast %cst_115 : f32 to vector<8x128xf32>
    %369 = arith.subf %368, %345 : vector<8x128xf32>
    %cst_116 = arith.constant -1.500000e+00 : f32
    %370 = vector.broadcast %cst_116 : f32 to vector<8x128xf32>
    %371 = arith.subf %370, %345 : vector<8x128xf32>
    %cst_117 = arith.constant -5.000000e-01 : f32
    %372 = vector.broadcast %cst_117 : f32 to vector<8x128xf32>
    %373 = arith.subf %372, %345 : vector<8x128xf32>
    %cst_118 = arith.constant 5.000000e-01 : f32
    %374 = vector.broadcast %cst_118 : f32 to vector<8x128xf32>
    %375 = arith.subf %374, %345 : vector<8x128xf32>
    %cst_119 = arith.constant 1.500000e+00 : f32
    %376 = vector.broadcast %cst_119 : f32 to vector<8x128xf32>
    %377 = arith.subf %376, %345 : vector<8x128xf32>
    %cst_120 = arith.constant 2.500000e+00 : f32
    %378 = vector.broadcast %cst_120 : f32 to vector<8x128xf32>
    %379 = arith.subf %378, %345 : vector<8x128xf32>
    %cst_121 = arith.constant 3.500000e+00 : f32
    %380 = vector.broadcast %cst_121 : f32 to vector<8x128xf32>
    %381 = arith.subf %380, %345 : vector<8x128xf32>
    %cst_122 = arith.constant 4.500000e+00 : f32
    %382 = vector.broadcast %cst_122 : f32 to vector<8x128xf32>
    %383 = arith.subf %382, %345 : vector<8x128xf32>
    %cst_123 = arith.constant 5.500000e+00 : f32
    %384 = vector.broadcast %cst_123 : f32 to vector<8x128xf32>
    %385 = arith.subf %384, %345 : vector<8x128xf32>
    %386 = arith.mulf %347, %333 : vector<8x128xf32>
    %387 = arith.mulf %367, %334 : vector<8x128xf32>
    %388 = arith.addf %386, %387 : vector<8x128xf32>
    %389 = arith.mulf %349, %334 : vector<8x128xf32>
    %390 = arith.mulf %369, %335 : vector<8x128xf32>
    %391 = arith.addf %389, %390 : vector<8x128xf32>
    %392 = arith.mulf %351, %335 : vector<8x128xf32>
    %393 = arith.mulf %371, %336 : vector<8x128xf32>
    %394 = arith.addf %392, %393 : vector<8x128xf32>
    %395 = arith.mulf %353, %336 : vector<8x128xf32>
    %396 = arith.mulf %373, %337 : vector<8x128xf32>
    %397 = arith.addf %395, %396 : vector<8x128xf32>
    %398 = arith.mulf %355, %337 : vector<8x128xf32>
    %399 = arith.mulf %375, %338 : vector<8x128xf32>
    %400 = arith.addf %398, %399 : vector<8x128xf32>
    %401 = arith.mulf %357, %338 : vector<8x128xf32>
    %402 = arith.mulf %377, %339 : vector<8x128xf32>
    %403 = arith.addf %401, %402 : vector<8x128xf32>
    %404 = arith.mulf %359, %339 : vector<8x128xf32>
    %405 = arith.mulf %379, %340 : vector<8x128xf32>
    %406 = arith.addf %404, %405 : vector<8x128xf32>
    %407 = arith.mulf %361, %340 : vector<8x128xf32>
    %408 = arith.mulf %381, %341 : vector<8x128xf32>
    %409 = arith.addf %407, %408 : vector<8x128xf32>
    %410 = arith.mulf %363, %341 : vector<8x128xf32>
    %411 = arith.mulf %383, %342 : vector<8x128xf32>
    %412 = arith.addf %410, %411 : vector<8x128xf32>
    %413 = arith.mulf %365, %342 : vector<8x128xf32>
    %414 = arith.mulf %385, %343 : vector<8x128xf32>
    %415 = arith.addf %413, %414 : vector<8x128xf32>
    %cst_124 = arith.constant 1.250000e+00 : f32
    %416 = vector.broadcast %cst_124 : f32 to vector<8x128xf32>
    %417 = arith.mulf %284, %416 : vector<8x128xf32>
    %cst_125 = arith.constant -2.750000e+00 : f32
    %418 = vector.broadcast %cst_125 : f32 to vector<8x128xf32>
    %419 = arith.subf %417, %418 : vector<8x128xf32>
    %cst_126 = arith.constant -2.250000e+00 : f32
    %420 = vector.broadcast %cst_126 : f32 to vector<8x128xf32>
    %421 = arith.subf %417, %420 : vector<8x128xf32>
    %cst_127 = arith.constant -1.750000e+00 : f32
    %422 = vector.broadcast %cst_127 : f32 to vector<8x128xf32>
    %423 = arith.subf %417, %422 : vector<8x128xf32>
    %cst_128 = arith.constant -1.250000e+00 : f32
    %424 = vector.broadcast %cst_128 : f32 to vector<8x128xf32>
    %425 = arith.subf %417, %424 : vector<8x128xf32>
    %cst_129 = arith.constant -7.500000e-01 : f32
    %426 = vector.broadcast %cst_129 : f32 to vector<8x128xf32>
    %427 = arith.subf %417, %426 : vector<8x128xf32>
    %cst_130 = arith.constant -2.500000e-01 : f32
    %428 = vector.broadcast %cst_130 : f32 to vector<8x128xf32>
    %429 = arith.subf %417, %428 : vector<8x128xf32>
    %cst_131 = arith.constant 2.500000e-01 : f32
    %430 = vector.broadcast %cst_131 : f32 to vector<8x128xf32>
    %431 = arith.subf %417, %430 : vector<8x128xf32>
    %cst_132 = arith.constant 7.500000e-01 : f32
    %432 = vector.broadcast %cst_132 : f32 to vector<8x128xf32>
    %433 = arith.subf %417, %432 : vector<8x128xf32>
    %cst_133 = arith.constant 1.250000e+00 : f32
    %434 = vector.broadcast %cst_133 : f32 to vector<8x128xf32>
    %435 = arith.subf %417, %434 : vector<8x128xf32>
    %cst_134 = arith.constant -1.250000e+00 : f32
    %436 = vector.broadcast %cst_134 : f32 to vector<8x128xf32>
    %437 = arith.subf %436, %417 : vector<8x128xf32>
    %cst_135 = arith.constant -7.500000e-01 : f32
    %438 = vector.broadcast %cst_135 : f32 to vector<8x128xf32>
    %439 = arith.subf %438, %417 : vector<8x128xf32>
    %cst_136 = arith.constant -2.500000e-01 : f32
    %440 = vector.broadcast %cst_136 : f32 to vector<8x128xf32>
    %441 = arith.subf %440, %417 : vector<8x128xf32>
    %cst_137 = arith.constant 2.500000e-01 : f32
    %442 = vector.broadcast %cst_137 : f32 to vector<8x128xf32>
    %443 = arith.subf %442, %417 : vector<8x128xf32>
    %cst_138 = arith.constant 7.500000e-01 : f32
    %444 = vector.broadcast %cst_138 : f32 to vector<8x128xf32>
    %445 = arith.subf %444, %417 : vector<8x128xf32>
    %cst_139 = arith.constant 1.250000e+00 : f32
    %446 = vector.broadcast %cst_139 : f32 to vector<8x128xf32>
    %447 = arith.subf %446, %417 : vector<8x128xf32>
    %cst_140 = arith.constant 1.750000e+00 : f32
    %448 = vector.broadcast %cst_140 : f32 to vector<8x128xf32>
    %449 = arith.subf %448, %417 : vector<8x128xf32>
    %cst_141 = arith.constant 2.250000e+00 : f32
    %450 = vector.broadcast %cst_141 : f32 to vector<8x128xf32>
    %451 = arith.subf %450, %417 : vector<8x128xf32>
    %cst_142 = arith.constant 2.750000e+00 : f32
    %452 = vector.broadcast %cst_142 : f32 to vector<8x128xf32>
    %453 = arith.subf %452, %417 : vector<8x128xf32>
    %454 = arith.mulf %419, %388 : vector<8x128xf32>
    %455 = arith.mulf %437, %391 : vector<8x128xf32>
    %456 = arith.addf %454, %455 : vector<8x128xf32>
    %457 = arith.mulf %421, %391 : vector<8x128xf32>
    %458 = arith.mulf %439, %394 : vector<8x128xf32>
    %459 = arith.addf %457, %458 : vector<8x128xf32>
    %460 = arith.mulf %423, %394 : vector<8x128xf32>
    %461 = arith.mulf %441, %397 : vector<8x128xf32>
    %462 = arith.addf %460, %461 : vector<8x128xf32>
    %463 = arith.mulf %425, %397 : vector<8x128xf32>
    %464 = arith.mulf %443, %400 : vector<8x128xf32>
    %465 = arith.addf %463, %464 : vector<8x128xf32>
    %466 = arith.mulf %427, %400 : vector<8x128xf32>
    %467 = arith.mulf %445, %403 : vector<8x128xf32>
    %468 = arith.addf %466, %467 : vector<8x128xf32>
    %469 = arith.mulf %429, %403 : vector<8x128xf32>
    %470 = arith.mulf %447, %406 : vector<8x128xf32>
    %471 = arith.addf %469, %470 : vector<8x128xf32>
    %472 = arith.mulf %431, %406 : vector<8x128xf32>
    %473 = arith.mulf %449, %409 : vector<8x128xf32>
    %474 = arith.addf %472, %473 : vector<8x128xf32>
    %475 = arith.mulf %433, %409 : vector<8x128xf32>
    %476 = arith.mulf %451, %412 : vector<8x128xf32>
    %477 = arith.addf %475, %476 : vector<8x128xf32>
    %478 = arith.mulf %435, %412 : vector<8x128xf32>
    %479 = arith.mulf %453, %415 : vector<8x128xf32>
    %480 = arith.addf %478, %479 : vector<8x128xf32>
    %cst_143 = arith.constant 0.833333313 : f32
    %481 = vector.broadcast %cst_143 : f32 to vector<8x128xf32>
    %482 = arith.mulf %284, %481 : vector<8x128xf32>
    %cst_144 = arith.constant -1.83333337 : f32
    %483 = vector.broadcast %cst_144 : f32 to vector<8x128xf32>
    %484 = arith.subf %482, %483 : vector<8x128xf32>
    %cst_145 = arith.constant -1.500000e+00 : f32
    %485 = vector.broadcast %cst_145 : f32 to vector<8x128xf32>
    %486 = arith.subf %482, %485 : vector<8x128xf32>
    %cst_146 = arith.constant -1.16666663 : f32
    %487 = vector.broadcast %cst_146 : f32 to vector<8x128xf32>
    %488 = arith.subf %482, %487 : vector<8x128xf32>
    %cst_147 = arith.constant -0.833333313 : f32
    %489 = vector.broadcast %cst_147 : f32 to vector<8x128xf32>
    %490 = arith.subf %482, %489 : vector<8x128xf32>
    %cst_148 = arith.constant -5.000000e-01 : f32
    %491 = vector.broadcast %cst_148 : f32 to vector<8x128xf32>
    %492 = arith.subf %482, %491 : vector<8x128xf32>
    %cst_149 = arith.constant -0.166666672 : f32
    %493 = vector.broadcast %cst_149 : f32 to vector<8x128xf32>
    %494 = arith.subf %482, %493 : vector<8x128xf32>
    %cst_150 = arith.constant 0.166666672 : f32
    %495 = vector.broadcast %cst_150 : f32 to vector<8x128xf32>
    %496 = arith.subf %482, %495 : vector<8x128xf32>
    %cst_151 = arith.constant 5.000000e-01 : f32
    %497 = vector.broadcast %cst_151 : f32 to vector<8x128xf32>
    %498 = arith.subf %482, %497 : vector<8x128xf32>
    %cst_152 = arith.constant -5.000000e-01 : f32
    %499 = vector.broadcast %cst_152 : f32 to vector<8x128xf32>
    %500 = arith.subf %499, %482 : vector<8x128xf32>
    %cst_153 = arith.constant -0.166666672 : f32
    %501 = vector.broadcast %cst_153 : f32 to vector<8x128xf32>
    %502 = arith.subf %501, %482 : vector<8x128xf32>
    %cst_154 = arith.constant 0.166666672 : f32
    %503 = vector.broadcast %cst_154 : f32 to vector<8x128xf32>
    %504 = arith.subf %503, %482 : vector<8x128xf32>
    %cst_155 = arith.constant 5.000000e-01 : f32
    %505 = vector.broadcast %cst_155 : f32 to vector<8x128xf32>
    %506 = arith.subf %505, %482 : vector<8x128xf32>
    %cst_156 = arith.constant 0.833333313 : f32
    %507 = vector.broadcast %cst_156 : f32 to vector<8x128xf32>
    %508 = arith.subf %507, %482 : vector<8x128xf32>
    %cst_157 = arith.constant 1.16666663 : f32
    %509 = vector.broadcast %cst_157 : f32 to vector<8x128xf32>
    %510 = arith.subf %509, %482 : vector<8x128xf32>
    %cst_158 = arith.constant 1.500000e+00 : f32
    %511 = vector.broadcast %cst_158 : f32 to vector<8x128xf32>
    %512 = arith.subf %511, %482 : vector<8x128xf32>
    %cst_159 = arith.constant 1.83333337 : f32
    %513 = vector.broadcast %cst_159 : f32 to vector<8x128xf32>
    %514 = arith.subf %513, %482 : vector<8x128xf32>
    %515 = arith.mulf %484, %456 : vector<8x128xf32>
    %516 = arith.mulf %500, %459 : vector<8x128xf32>
    %517 = arith.addf %515, %516 : vector<8x128xf32>
    %518 = arith.truncf %517 : vector<8x128xf32> to vector<8x128xbf16>
    %c0_160 = arith.constant 0 : index
    %c0_161 = arith.constant 0 : index
    %519 = vector.load %arg8[%c0_160, %c0_161] : memref<8x1152xbf16, #tpu.memory_space<vmem>>, vector<8x128xbf16>
    tpu.vector_store %arg8[%c0_160, %c0_161], %518 {strides = array<i32>} : memref<8x1152xbf16, #tpu.memory_space<vmem>>, vector<8x128xbf16>,
    %520 = arith.mulf %486, %459 : vector<8x128xf32>
    %521 = arith.mulf %502, %462 : vector<8x128xf32>
    %522 = arith.addf %520, %521 : vector<8x128xf32>
    %523 = arith.truncf %522 : vector<8x128xf32> to vector<8x128xbf16>
    %c0_162 = arith.constant 0 : index
    %c128_163 = arith.constant 128 : index
    %524 = vector.load %arg8[%c0_162, %c128_163] : memref<8x1152xbf16, #tpu.memory_space<vmem>>, vector<8x128xbf16>
    tpu.vector_store %arg8[%c0_162, %c128_163], %523 {strides = array<i32>} : memref<8x1152xbf16, #tpu.memory_space<vmem>>, vector<8x128xbf16>,
    %525 = arith.mulf %488, %462 : vector<8x128xf32>
    %526 = arith.mulf %504, %465 : vector<8x128xf32>
    %527 = arith.addf %525, %526 : vector<8x128xf32>
    %528 = arith.truncf %527 : vector<8x128xf32> to vector<8x128xbf16>
    %c0_164 = arith.constant 0 : index
    %c256_165 = arith.constant 256 : index
    %529 = vector.load %arg8[%c0_164, %c256_165] : memref<8x1152xbf16, #tpu.memory_space<vmem>>, vector<8x128xbf16>
    tpu.vector_store %arg8[%c0_164, %c256_165], %528 {strides = array<i32>} : memref<8x1152xbf16, #tpu.memory_space<vmem>>, vector<8x128xbf16>,
    %530 = arith.mulf %490, %465 : vector<8x128xf32>
    %531 = arith.mulf %506, %468 : vector<8x128xf32>
    %532 = arith.addf %530, %531 : vector<8x128xf32>
    %533 = arith.truncf %532 : vector<8x128xf32> to vector<8x128xbf16>
    %c0_166 = arith.constant 0 : index
    %c384_167 = arith.constant 384 : index
    %534 = vector.load %arg8[%c0_166, %c384_167] : memref<8x1152xbf16, #tpu.memory_space<vmem>>, vector<8x128xbf16>
    tpu.vector_store %arg8[%c0_166, %c384_167], %533 {strides = array<i32>} : memref<8x1152xbf16, #tpu.memory_space<vmem>>, vector<8x128xbf16>,
    %535 = arith.mulf %492, %468 : vector<8x128xf32>
    %536 = arith.mulf %508, %471 : vector<8x128xf32>
    %537 = arith.addf %535, %536 : vector<8x128xf32>
    %538 = arith.truncf %537 : vector<8x128xf32> to vector<8x128xbf16>
    %c0_168 = arith.constant 0 : index
    %c512_169 = arith.constant 512 : index
    %539 = vector.load %arg8[%c0_168, %c512_169] : memref<8x1152xbf16, #tpu.memory_space<vmem>>, vector<8x128xbf16>
    tpu.vector_store %arg8[%c0_168, %c512_169], %538 {strides = array<i32>} : memref<8x1152xbf16, #tpu.memory_space<vmem>>, vector<8x128xbf16>,
    %540 = arith.mulf %494, %471 : vector<8x128xf32>
    %541 = arith.mulf %510, %474 : vector<8x128xf32>
    %542 = arith.addf %540, %541 : vector<8x128xf32>
    %543 = arith.truncf %542 : vector<8x128xf32> to vector<8x128xbf16>
    %c0_170 = arith.constant 0 : index
    %c640_171 = arith.constant 640 : index
    %544 = vector.load %arg8[%c0_170, %c640_171] : memref<8x1152xbf16, #tpu.memory_space<vmem>>, vector<8x128xbf16>
    tpu.vector_store %arg8[%c0_170, %c640_171], %543 {strides = array<i32>} : memref<8x1152xbf16, #tpu.memory_space<vmem>>, vector<8x128xbf16>,
    %545 = arith.mulf %496, %474 : vector<8x128xf32>
    %546 = arith.mulf %512, %477 : vector<8x128xf32>
    %547 = arith.addf %545, %546 : vector<8x128xf32>
    %548 = arith.truncf %547 : vector<8x128xf32> to vector<8x128xbf16>
    %c0_172 = arith.constant 0 : index
    %c768_173 = arith.constant 768 : index
    %549 = vector.load %arg8[%c0_172, %c768_173] : memref<8x1152xbf16, #tpu.memory_space<vmem>>, vector<8x128xbf16>
    tpu.vector_store %arg8[%c0_172, %c768_173], %548 {strides = array<i32>} : memref<8x1152xbf16, #tpu.memory_space<vmem>>, vector<8x128xbf16>,
    %550 = arith.mulf %498, %477 : vector<8x128xf32>
    %551 = arith.mulf %514, %480 : vector<8x128xf32>
    %552 = arith.addf %550, %551 : vector<8x128xf32>
    %553 = arith.truncf %552 : vector<8x128xf32> to vector<8x128xbf16>
    %c0_174 = arith.constant 0 : index
    %c896_175 = arith.constant 896 : index
    %554 = vector.load %arg8[%c0_174, %c896_175] : memref<8x1152xbf16, #tpu.memory_space<vmem>>, vector<8x128xbf16>
    tpu.vector_store %arg8[%c0_174, %c896_175], %553 {strides = array<i32>} : memref<8x1152xbf16, #tpu.memory_space<vmem>>, vector<8x128xbf16>,
    %c0_176 = arith.constant 0 : index
    %c0_177 = arith.constant 0 : index
    %555 = vector.load %arg7[%c0_176, %c0_177] : memref<8x128xf32, #tpu.memory_space<vmem>>, vector<8x128xf32>
    %556 = arith.negf %555 : vector<8x128xf32>
    %557 = math.exp %556 : vector<8x128xf32>
    %cst_178 = arith.constant 1.000000e+00 : f32
    %558 = vector.broadcast %cst_178 : f32 to vector<8x128xf32>
    %559 = arith.addf %558, %557 : vector<8x128xf32>
    %560 = arith.divf %558, %559 : vector<8x128xf32>
    %561 = arith.mulf %555, %560 : vector<8x128xf32>
    %562 = arith.truncf %561 : vector<8x128xf32> to vector<8x128xbf16>
    %c0_179 = arith.constant 0 : index
    %c1024_180 = arith.constant 1024 : index
    %563 = vector.load %arg8[%c0_179, %c1024_180] : memref<8x1152xbf16, #tpu.memory_space<vmem>>, vector<8x128xbf16>
    tpu.vector_store %arg8[%c0_179, %c1024_180], %562 {strides = array<i32>} : memref<8x1152xbf16, #tpu.memory_space<vmem>>, vector<8x128xbf16>,
    %c0_181 = arith.constant 0 : index
    %c0_182 = arith.constant 0 : index
    %564 = vector.load %arg8[%c0_181, %c0_182] : memref<8x1152xbf16, #tpu.memory_space<vmem>>, vector<8x1152xbf16>
    %c0_183 = arith.constant 0 : index
    %c0_184 = arith.constant 0 : index
    %565 = vector.load %arg3[%c0_183, %c0_184] : memref<1152x128xbf16, #tpu.memory_space<vmem>>, vector<1152x128xbf16>
    %cst_185 = arith.constant dense<0.000000e+00> : vector<8x128xf32>
    %566 = tpu.matmul %564, %565, %cst_185 {dimension_numbers = #tpu.dot_dimension_numbers<[1], [0], [0], [1], [0, 0, 1, 1], [], []>} : vector<8x1152xbf16>, vector<1152x128xbf16>, vector<8x128xf32> -> vector<8x128xf32>
    %c0_186 = arith.constant 0 : index
    %c0_187 = arith.constant 0 : index
    %567 = vector.load %arg7[%c0_186, %c0_187] : memref<8x128xf32, #tpu.memory_space<vmem>>, vector<8x128xf32>
    tpu.vector_store %arg7[%c0_186, %c0_187], %566 {strides = array<i32>} : memref<8x128xf32, #tpu.memory_space<vmem>>, vector<8x128xf32>,
    %c0_188 = arith.constant 0 : index
    %c0_189 = arith.constant 0 : index
    %568 = vector.load %arg7[%c0_188, %c0_189] : memref<8x128xf32, #tpu.memory_space<vmem>>, vector<8x128xf32>
    %cst_190 = arith.constant -2.200000e+00 : f32
    %569 = vector.broadcast %cst_190 : f32 to vector<8x128xf32>
    %570 = arith.cmpf oge, %568, %569 : vector<8x128xf32>
    %571 = arith.extui %570 : vector<8x128xi1> to vector<8x128xi32>
    %572 = arith.sitofp %571 : vector<8x128xi32> to vector<8x128xf32>
    %cst_191 = arith.constant -1.800000e+00 : f32
    %573 = vector.broadcast %cst_191 : f32 to vector<8x128xf32>
    %574 = arith.cmpf oge, %568, %573 : vector<8x128xf32>
    %575 = arith.extui %574 : vector<8x128xi1> to vector<8x128xi32>
    %576 = arith.sitofp %575 : vector<8x128xi32> to vector<8x128xf32>
    %cst_192 = arith.constant -1.400000e+00 : f32
    %577 = vector.broadcast %cst_192 : f32 to vector<8x128xf32>
    %578 = arith.cmpf oge, %568, %577 : vector<8x128xf32>
    %579 = arith.extui %578 : vector<8x128xi1> to vector<8x128xi32>
    %580 = arith.sitofp %579 : vector<8x128xi32> to vector<8x128xf32>
    %cst_193 = arith.constant -1.000000e+00 : f32
    %581 = vector.broadcast %cst_193 : f32 to vector<8x128xf32>
    %582 = arith.cmpf oge, %568, %581 : vector<8x128xf32>
    %583 = arith.extui %582 : vector<8x128xi1> to vector<8x128xi32>
    %584 = arith.sitofp %583 : vector<8x128xi32> to vector<8x128xf32>
    %cst_194 = arith.constant -6.000000e-01 : f32
    %585 = vector.broadcast %cst_194 : f32 to vector<8x128xf32>
    %586 = arith.cmpf oge, %568, %585 : vector<8x128xf32>
    %587 = arith.extui %586 : vector<8x128xi1> to vector<8x128xi32>
    %588 = arith.sitofp %587 : vector<8x128xi32> to vector<8x128xf32>
    %cst_195 = arith.constant -2.000000e-01 : f32
    %589 = vector.broadcast %cst_195 : f32 to vector<8x128xf32>
    %590 = arith.cmpf oge, %568, %589 : vector<8x128xf32>
    %591 = arith.extui %590 : vector<8x128xi1> to vector<8x128xi32>
    %592 = arith.sitofp %591 : vector<8x128xi32> to vector<8x128xf32>
    %cst_196 = arith.constant 2.000000e-01 : f32
    %593 = vector.broadcast %cst_196 : f32 to vector<8x128xf32>
    %594 = arith.cmpf oge, %568, %593 : vector<8x128xf32>
    %595 = arith.extui %594 : vector<8x128xi1> to vector<8x128xi32>
    %596 = arith.sitofp %595 : vector<8x128xi32> to vector<8x128xf32>
    %cst_197 = arith.constant 6.000000e-01 : f32
    %597 = vector.broadcast %cst_197 : f32 to vector<8x128xf32>
    %598 = arith.cmpf oge, %568, %597 : vector<8x128xf32>
    %599 = arith.extui %598 : vector<8x128xi1> to vector<8x128xi32>
    %600 = arith.sitofp %599 : vector<8x128xi32> to vector<8x128xf32>
    %cst_198 = arith.constant 1.000000e+00 : f32
    %601 = vector.broadcast %cst_198 : f32 to vector<8x128xf32>
    %602 = arith.cmpf oge, %568, %601 : vector<8x128xf32>
    %603 = arith.extui %602 : vector<8x128xi1> to vector<8x128xi32>
    %604 = arith.sitofp %603 : vector<8x128xi32> to vector<8x128xf32>
    %cst_199 = arith.constant 1.400000e+00 : f32
    %605 = vector.broadcast %cst_199 : f32 to vector<8x128xf32>
    %606 = arith.cmpf oge, %568, %605 : vector<8x128xf32>
    %607 = arith.extui %606 : vector<8x128xi1> to vector<8x128xi32>
    %608 = arith.sitofp %607 : vector<8x128xi32> to vector<8x128xf32>
    %cst_200 = arith.constant 1.800000e+00 : f32
    %609 = vector.broadcast %cst_200 : f32 to vector<8x128xf32>
    %610 = arith.cmpf oge, %568, %609 : vector<8x128xf32>
    %611 = arith.extui %610 : vector<8x128xi1> to vector<8x128xi32>
    %612 = arith.sitofp %611 : vector<8x128xi32> to vector<8x128xf32>
    %cst_201 = arith.constant 2.200000e+00 : f32
    %613 = vector.broadcast %cst_201 : f32 to vector<8x128xf32>
    %614 = arith.cmpf oge, %568, %613 : vector<8x128xf32>
    %615 = arith.extui %614 : vector<8x128xi1> to vector<8x128xi32>
    %616 = arith.sitofp %615 : vector<8x128xi32> to vector<8x128xf32>
    %617 = arith.subf %572, %576 : vector<8x128xf32>
    %618 = arith.subf %576, %580 : vector<8x128xf32>
    %619 = arith.subf %580, %584 : vector<8x128xf32>
    %620 = arith.subf %584, %588 : vector<8x128xf32>
    %621 = arith.subf %588, %592 : vector<8x128xf32>
    %622 = arith.subf %592, %596 : vector<8x128xf32>
    %623 = arith.subf %596, %600 : vector<8x128xf32>
    %624 = arith.subf %600, %604 : vector<8x128xf32>
    %625 = arith.subf %604, %608 : vector<8x128xf32>
    %626 = arith.subf %608, %612 : vector<8x128xf32>
    %627 = arith.subf %612, %616 : vector<8x128xf32>
    %cst_202 = arith.constant 2.500000e+00 : f32
    %628 = vector.broadcast %cst_202 : f32 to vector<8x128xf32>
    %629 = arith.mulf %568, %628 : vector<8x128xf32>
    %cst_203 = arith.constant -5.500000e+00 : f32
    %630 = vector.broadcast %cst_203 : f32 to vector<8x128xf32>
    %631 = arith.subf %629, %630 : vector<8x128xf32>
    %cst_204 = arith.constant -4.500000e+00 : f32
    %632 = vector.broadcast %cst_204 : f32 to vector<8x128xf32>
    %633 = arith.subf %629, %632 : vector<8x128xf32>
    %cst_205 = arith.constant -3.500000e+00 : f32
    %634 = vector.broadcast %cst_205 : f32 to vector<8x128xf32>
    %635 = arith.subf %629, %634 : vector<8x128xf32>
    %cst_206 = arith.constant -2.500000e+00 : f32
    %636 = vector.broadcast %cst_206 : f32 to vector<8x128xf32>
    %637 = arith.subf %629, %636 : vector<8x128xf32>
    %cst_207 = arith.constant -1.500000e+00 : f32
    %638 = vector.broadcast %cst_207 : f32 to vector<8x128xf32>
    %639 = arith.subf %629, %638 : vector<8x128xf32>
    %cst_208 = arith.constant -5.000000e-01 : f32
    %640 = vector.broadcast %cst_208 : f32 to vector<8x128xf32>
    %641 = arith.subf %629, %640 : vector<8x128xf32>
    %cst_209 = arith.constant 5.000000e-01 : f32
    %642 = vector.broadcast %cst_209 : f32 to vector<8x128xf32>
    %643 = arith.subf %629, %642 : vector<8x128xf32>
    %cst_210 = arith.constant 1.500000e+00 : f32
    %644 = vector.broadcast %cst_210 : f32 to vector<8x128xf32>
    %645 = arith.subf %629, %644 : vector<8x128xf32>
    %cst_211 = arith.constant 2.500000e+00 : f32
    %646 = vector.broadcast %cst_211 : f32 to vector<8x128xf32>
    %647 = arith.subf %629, %646 : vector<8x128xf32>
    %cst_212 = arith.constant 3.500000e+00 : f32
    %648 = vector.broadcast %cst_212 : f32 to vector<8x128xf32>
    %649 = arith.subf %629, %648 : vector<8x128xf32>
    %cst_213 = arith.constant -3.500000e+00 : f32
    %650 = vector.broadcast %cst_213 : f32 to vector<8x128xf32>
    %651 = arith.subf %650, %629 : vector<8x128xf32>
    %cst_214 = arith.constant -2.500000e+00 : f32
    %652 = vector.broadcast %cst_214 : f32 to vector<8x128xf32>
    %653 = arith.subf %652, %629 : vector<8x128xf32>
    %cst_215 = arith.constant -1.500000e+00 : f32
    %654 = vector.broadcast %cst_215 : f32 to vector<8x128xf32>
    %655 = arith.subf %654, %629 : vector<8x128xf32>
    %cst_216 = arith.constant -5.000000e-01 : f32
    %656 = vector.broadcast %cst_216 : f32 to vector<8x128xf32>
    %657 = arith.subf %656, %629 : vector<8x128xf32>
    %cst_217 = arith.constant 5.000000e-01 : f32
    %658 = vector.broadcast %cst_217 : f32 to vector<8x128xf32>
    %659 = arith.subf %658, %629 : vector<8x128xf32>
    %cst_218 = arith.constant 1.500000e+00 : f32
    %660 = vector.broadcast %cst_218 : f32 to vector<8x128xf32>
    %661 = arith.subf %660, %629 : vector<8x128xf32>
    %cst_219 = arith.constant 2.500000e+00 : f32
    %662 = vector.broadcast %cst_219 : f32 to vector<8x128xf32>
    %663 = arith.subf %662, %629 : vector<8x128xf32>
    %cst_220 = arith.constant 3.500000e+00 : f32
    %664 = vector.broadcast %cst_220 : f32 to vector<8x128xf32>
    %665 = arith.subf %664, %629 : vector<8x128xf32>
    %cst_221 = arith.constant 4.500000e+00 : f32
    %666 = vector.broadcast %cst_221 : f32 to vector<8x128xf32>
    %667 = arith.subf %666, %629 : vector<8x128xf32>
    %cst_222 = arith.constant 5.500000e+00 : f32
    %668 = vector.broadcast %cst_222 : f32 to vector<8x128xf32>
    %669 = arith.subf %668, %629 : vector<8x128xf32>
    %670 = arith.mulf %631, %617 : vector<8x128xf32>
    %671 = arith.mulf %651, %618 : vector<8x128xf32>
    %672 = arith.addf %670, %671 : vector<8x128xf32>
    %673 = arith.mulf %633, %618 : vector<8x128xf32>
    %674 = arith.mulf %653, %619 : vector<8x128xf32>
    %675 = arith.addf %673, %674 : vector<8x128xf32>
    %676 = arith.mulf %635, %619 : vector<8x128xf32>
    %677 = arith.mulf %655, %620 : vector<8x128xf32>
    %678 = arith.addf %676, %677 : vector<8x128xf32>
    %679 = arith.mulf %637, %620 : vector<8x128xf32>
    %680 = arith.mulf %657, %621 : vector<8x128xf32>
    %681 = arith.addf %679, %680 : vector<8x128xf32>
    %682 = arith.mulf %639, %621 : vector<8x128xf32>
    %683 = arith.mulf %659, %622 : vector<8x128xf32>
    %684 = arith.addf %682, %683 : vector<8x128xf32>
    %685 = arith.mulf %641, %622 : vector<8x128xf32>
    %686 = arith.mulf %661, %623 : vector<8x128xf32>
    %687 = arith.addf %685, %686 : vector<8x128xf32>
    %688 = arith.mulf %643, %623 : vector<8x128xf32>
    %689 = arith.mulf %663, %624 : vector<8x128xf32>
    %690 = arith.addf %688, %689 : vector<8x128xf32>
    %691 = arith.mulf %645, %624 : vector<8x128xf32>
    %692 = arith.mulf %665, %625 : vector<8x128xf32>
    %693 = arith.addf %691, %692 : vector<8x128xf32>
    %694 = arith.mulf %647, %625 : vector<8x128xf32>
    %695 = arith.mulf %667, %626 : vector<8x128xf32>
    %696 = arith.addf %694, %695 : vector<8x128xf32>
    %697 = arith.mulf %649, %626 : vector<8x128xf32>
    %698 = arith.mulf %669, %627 : vector<8x128xf32>
    %699 = arith.addf %697, %698 : vector<8x128xf32>
    %cst_223 = arith.constant 1.250000e+00 : f32
    %700 = vector.broadcast %cst_223 : f32 to vector<8x128xf32>
    %701 = arith.mulf %568, %700 : vector<8x128xf32>
    %cst_224 = arith.constant -2.750000e+00 : f32
    %702 = vector.broadcast %cst_224 : f32 to vector<8x128xf32>
    %703 = arith.subf %701, %702 : vector<8x128xf32>
    %cst_225 = arith.constant -2.250000e+00 : f32
    %704 = vector.broadcast %cst_225 : f32 to vector<8x128xf32>
    %705 = arith.subf %701, %704 : vector<8x128xf32>
    %cst_226 = arith.constant -1.750000e+00 : f32
    %706 = vector.broadcast %cst_226 : f32 to vector<8x128xf32>
    %707 = arith.subf %701, %706 : vector<8x128xf32>
    %cst_227 = arith.constant -1.250000e+00 : f32
    %708 = vector.broadcast %cst_227 : f32 to vector<8x128xf32>
    %709 = arith.subf %701, %708 : vector<8x128xf32>
    %cst_228 = arith.constant -7.500000e-01 : f32
    %710 = vector.broadcast %cst_228 : f32 to vector<8x128xf32>
    %711 = arith.subf %701, %710 : vector<8x128xf32>
    %cst_229 = arith.constant -2.500000e-01 : f32
    %712 = vector.broadcast %cst_229 : f32 to vector<8x128xf32>
    %713 = arith.subf %701, %712 : vector<8x128xf32>
    %cst_230 = arith.constant 2.500000e-01 : f32
    %714 = vector.broadcast %cst_230 : f32 to vector<8x128xf32>
    %715 = arith.subf %701, %714 : vector<8x128xf32>
    %cst_231 = arith.constant 7.500000e-01 : f32
    %716 = vector.broadcast %cst_231 : f32 to vector<8x128xf32>
    %717 = arith.subf %701, %716 : vector<8x128xf32>
    %cst_232 = arith.constant 1.250000e+00 : f32
    %718 = vector.broadcast %cst_232 : f32 to vector<8x128xf32>
    %719 = arith.subf %701, %718 : vector<8x128xf32>
    %cst_233 = arith.constant -1.250000e+00 : f32
    %720 = vector.broadcast %cst_233 : f32 to vector<8x128xf32>
    %721 = arith.subf %720, %701 : vector<8x128xf32>
    %cst_234 = arith.constant -7.500000e-01 : f32
    %722 = vector.broadcast %cst_234 : f32 to vector<8x128xf32>
    %723 = arith.subf %722, %701 : vector<8x128xf32>
    %cst_235 = arith.constant -2.500000e-01 : f32
    %724 = vector.broadcast %cst_235 : f32 to vector<8x128xf32>
    %725 = arith.subf %724, %701 : vector<8x128xf32>
    %cst_236 = arith.constant 2.500000e-01 : f32
    %726 = vector.broadcast %cst_236 : f32 to vector<8x128xf32>
    %727 = arith.subf %726, %701 : vector<8x128xf32>
    %cst_237 = arith.constant 7.500000e-01 : f32
    %728 = vector.broadcast %cst_237 : f32 to vector<8x128xf32>
    %729 = arith.subf %728, %701 : vector<8x128xf32>
    %cst_238 = arith.constant 1.250000e+00 : f32
    %730 = vector.broadcast %cst_238 : f32 to vector<8x128xf32>
    %731 = arith.subf %730, %701 : vector<8x128xf32>
    %cst_239 = arith.constant 1.750000e+00 : f32
    %732 = vector.broadcast %cst_239 : f32 to vector<8x128xf32>
    %733 = arith.subf %732, %701 : vector<8x128xf32>
    %cst_240 = arith.constant 2.250000e+00 : f32
    %734 = vector.broadcast %cst_240 : f32 to vector<8x128xf32>
    %735 = arith.subf %734, %701 : vector<8x128xf32>
    %cst_241 = arith.constant 2.750000e+00 : f32
    %736 = vector.broadcast %cst_241 : f32 to vector<8x128xf32>
    %737 = arith.subf %736, %701 : vector<8x128xf32>
    %738 = arith.mulf %703, %672 : vector<8x128xf32>
    %739 = arith.mulf %721, %675 : vector<8x128xf32>
    %740 = arith.addf %738, %739 : vector<8x128xf32>
    %741 = arith.mulf %705, %675 : vector<8x128xf32>
    %742 = arith.mulf %723, %678 : vector<8x128xf32>
    %743 = arith.addf %741, %742 : vector<8x128xf32>
    %744 = arith.mulf %707, %678 : vector<8x128xf32>
    %745 = arith.mulf %725, %681 : vector<8x128xf32>
    %746 = arith.addf %744, %745 : vector<8x128xf32>
    %747 = arith.mulf %709, %681 : vector<8x128xf32>
    %748 = arith.mulf %727, %684 : vector<8x128xf32>
    %749 = arith.addf %747, %748 : vector<8x128xf32>
    %750 = arith.mulf %711, %684 : vector<8x128xf32>
    %751 = arith.mulf %729, %687 : vector<8x128xf32>
    %752 = arith.addf %750, %751 : vector<8x128xf32>
    %753 = arith.mulf %713, %687 : vector<8x128xf32>
    %754 = arith.mulf %731, %690 : vector<8x128xf32>
    %755 = arith.addf %753, %754 : vector<8x128xf32>
    %756 = arith.mulf %715, %690 : vector<8x128xf32>
    %757 = arith.mulf %733, %693 : vector<8x128xf32>
    %758 = arith.addf %756, %757 : vector<8x128xf32>
    %759 = arith.mulf %717, %693 : vector<8x128xf32>
    %760 = arith.mulf %735, %696 : vector<8x128xf32>
    %761 = arith.addf %759, %760 : vector<8x128xf32>
    %762 = arith.mulf %719, %696 : vector<8x128xf32>
    %763 = arith.mulf %737, %699 : vector<8x128xf32>
    %764 = arith.addf %762, %763 : vector<8x128xf32>
    %cst_242 = arith.constant 0.833333313 : f32
    %765 = vector.broadcast %cst_242 : f32 to vector<8x128xf32>
    %766 = arith.mulf %568, %765 : vector<8x128xf32>
    %cst_243 = arith.constant -1.83333337 : f32
    %767 = vector.broadcast %cst_243 : f32 to vector<8x128xf32>
    %768 = arith.subf %766, %767 : vector<8x128xf32>
    %cst_244 = arith.constant -1.500000e+00 : f32
    %769 = vector.broadcast %cst_244 : f32 to vector<8x128xf32>
    %770 = arith.subf %766, %769 : vector<8x128xf32>
    %cst_245 = arith.constant -1.16666663 : f32
    %771 = vector.broadcast %cst_245 : f32 to vector<8x128xf32>
    %772 = arith.subf %766, %771 : vector<8x128xf32>
    %cst_246 = arith.constant -0.833333313 : f32
    %773 = vector.broadcast %cst_246 : f32 to vector<8x128xf32>
    %774 = arith.subf %766, %773 : vector<8x128xf32>
    %cst_247 = arith.constant -5.000000e-01 : f32
    %775 = vector.broadcast %cst_247 : f32 to vector<8x128xf32>
    %776 = arith.subf %766, %775 : vector<8x128xf32>
    %cst_248 = arith.constant -0.166666672 : f32
    %777 = vector.broadcast %cst_248 : f32 to vector<8x128xf32>
    %778 = arith.subf %766, %777 : vector<8x128xf32>
    %cst_249 = arith.constant 0.166666672 : f32
    %779 = vector.broadcast %cst_249 : f32 to vector<8x128xf32>
    %780 = arith.subf %766, %779 : vector<8x128xf32>
    %cst_250 = arith.constant 5.000000e-01 : f32
    %781 = vector.broadcast %cst_250 : f32 to vector<8x128xf32>
    %782 = arith.subf %766, %781 : vector<8x128xf32>
    %cst_251 = arith.constant -5.000000e-01 : f32
    %783 = vector.broadcast %cst_251 : f32 to vector<8x128xf32>
    %784 = arith.subf %783, %766 : vector<8x128xf32>
    %cst_252 = arith.constant -0.166666672 : f32
    %785 = vector.broadcast %cst_252 : f32 to vector<8x128xf32>
    %786 = arith.subf %785, %766 : vector<8x128xf32>
    %cst_253 = arith.constant 0.166666672 : f32
    %787 = vector.broadcast %cst_253 : f32 to vector<8x128xf32>
    %788 = arith.subf %787, %766 : vector<8x128xf32>
    %cst_254 = arith.constant 5.000000e-01 : f32
    %789 = vector.broadcast %cst_254 : f32 to vector<8x128xf32>
    %790 = arith.subf %789, %766 : vector<8x128xf32>
    %cst_255 = arith.constant 0.833333313 : f32
    %791 = vector.broadcast %cst_255 : f32 to vector<8x128xf32>
    %792 = arith.subf %791, %766 : vector<8x128xf32>
    %cst_256 = arith.constant 1.16666663 : f32
    %793 = vector.broadcast %cst_256 : f32 to vector<8x128xf32>
    %794 = arith.subf %793, %766 : vector<8x128xf32>
    %cst_257 = arith.constant 1.500000e+00 : f32
    %795 = vector.broadcast %cst_257 : f32 to vector<8x128xf32>
    %796 = arith.subf %795, %766 : vector<8x128xf32>
    %cst_258 = arith.constant 1.83333337 : f32
    %797 = vector.broadcast %cst_258 : f32 to vector<8x128xf32>
    %798 = arith.subf %797, %766 : vector<8x128xf32>
    %799 = arith.mulf %768, %740 : vector<8x128xf32>
    %800 = arith.mulf %784, %743 : vector<8x128xf32>
    %801 = arith.addf %799, %800 : vector<8x128xf32>
    %802 = arith.truncf %801 : vector<8x128xf32> to vector<8x128xbf16>
    %c0_259 = arith.constant 0 : index
    %c0_260 = arith.constant 0 : index
    %803 = vector.load %arg8[%c0_259, %c0_260] : memref<8x1152xbf16, #tpu.memory_space<vmem>>, vector<8x128xbf16>
    tpu.vector_store %arg8[%c0_259, %c0_260], %802 {strides = array<i32>} : memref<8x1152xbf16, #tpu.memory_space<vmem>>, vector<8x128xbf16>,
    %804 = arith.mulf %770, %743 : vector<8x128xf32>
    %805 = arith.mulf %786, %746 : vector<8x128xf32>
    %806 = arith.addf %804, %805 : vector<8x128xf32>
    %807 = arith.truncf %806 : vector<8x128xf32> to vector<8x128xbf16>
    %c0_261 = arith.constant 0 : index
    %c128_262 = arith.constant 128 : index
    %808 = vector.load %arg8[%c0_261, %c128_262] : memref<8x1152xbf16, #tpu.memory_space<vmem>>, vector<8x128xbf16>
    tpu.vector_store %arg8[%c0_261, %c128_262], %807 {strides = array<i32>} : memref<8x1152xbf16, #tpu.memory_space<vmem>>, vector<8x128xbf16>,
    %809 = arith.mulf %772, %746 : vector<8x128xf32>
    %810 = arith.mulf %788, %749 : vector<8x128xf32>
    %811 = arith.addf %809, %810 : vector<8x128xf32>
    %812 = arith.truncf %811 : vector<8x128xf32> to vector<8x128xbf16>
    %c0_263 = arith.constant 0 : index
    %c256_264 = arith.constant 256 : index
    %813 = vector.load %arg8[%c0_263, %c256_264] : memref<8x1152xbf16, #tpu.memory_space<vmem>>, vector<8x128xbf16>
    tpu.vector_store %arg8[%c0_263, %c256_264], %812 {strides = array<i32>} : memref<8x1152xbf16, #tpu.memory_space<vmem>>, vector<8x128xbf16>,
    %814 = arith.mulf %774, %749 : vector<8x128xf32>
    %815 = arith.mulf %790, %752 : vector<8x128xf32>
    %816 = arith.addf %814, %815 : vector<8x128xf32>
    %817 = arith.truncf %816 : vector<8x128xf32> to vector<8x128xbf16>
    %c0_265 = arith.constant 0 : index
    %c384_266 = arith.constant 384 : index
    %818 = vector.load %arg8[%c0_265, %c384_266] : memref<8x1152xbf16, #tpu.memory_space<vmem>>, vector<8x128xbf16>
    tpu.vector_store %arg8[%c0_265, %c384_266], %817 {strides = array<i32>} : memref<8x1152xbf16, #tpu.memory_space<vmem>>, vector<8x128xbf16>,
    %819 = arith.mulf %776, %752 : vector<8x128xf32>
    %820 = arith.mulf %792, %755 : vector<8x128xf32>
    %821 = arith.addf %819, %820 : vector<8x128xf32>
    %822 = arith.truncf %821 : vector<8x128xf32> to vector<8x128xbf16>
    %c0_267 = arith.constant 0 : index
    %c512_268 = arith.constant 512 : index
    %823 = vector.load %arg8[%c0_267, %c512_268] : memref<8x1152xbf16, #tpu.memory_space<vmem>>, vector<8x128xbf16>
    tpu.vector_store %arg8[%c0_267, %c512_268], %822 {strides = array<i32>} : memref<8x1152xbf16, #tpu.memory_space<vmem>>, vector<8x128xbf16>,
    %824 = arith.mulf %778, %755 : vector<8x128xf32>
    %825 = arith.mulf %794, %758 : vector<8x128xf32>
    %826 = arith.addf %824, %825 : vector<8x128xf32>
    %827 = arith.truncf %826 : vector<8x128xf32> to vector<8x128xbf16>
    %c0_269 = arith.constant 0 : index
    %c640_270 = arith.constant 640 : index
    %828 = vector.load %arg8[%c0_269, %c640_270] : memref<8x1152xbf16, #tpu.memory_space<vmem>>, vector<8x128xbf16>
    tpu.vector_store %arg8[%c0_269, %c640_270], %827 {strides = array<i32>} : memref<8x1152xbf16, #tpu.memory_space<vmem>>, vector<8x128xbf16>,
    %829 = arith.mulf %780, %758 : vector<8x128xf32>
    %830 = arith.mulf %796, %761 : vector<8x128xf32>
    %831 = arith.addf %829, %830 : vector<8x128xf32>
    %832 = arith.truncf %831 : vector<8x128xf32> to vector<8x128xbf16>
    %c0_271 = arith.constant 0 : index
    %c768_272 = arith.constant 768 : index
    %833 = vector.load %arg8[%c0_271, %c768_272] : memref<8x1152xbf16, #tpu.memory_space<vmem>>, vector<8x128xbf16>
    tpu.vector_store %arg8[%c0_271, %c768_272], %832 {strides = array<i32>} : memref<8x1152xbf16, #tpu.memory_space<vmem>>, vector<8x128xbf16>,
    %834 = arith.mulf %782, %761 : vector<8x128xf32>
    %835 = arith.mulf %798, %764 : vector<8x128xf32>
    %836 = arith.addf %834, %835 : vector<8x128xf32>
    %837 = arith.truncf %836 : vector<8x128xf32> to vector<8x128xbf16>
    %c0_273 = arith.constant 0 : index
    %c896_274 = arith.constant 896 : index
    %838 = vector.load %arg8[%c0_273, %c896_274] : memref<8x1152xbf16, #tpu.memory_space<vmem>>, vector<8x128xbf16>
    tpu.vector_store %arg8[%c0_273, %c896_274], %837 {strides = array<i32>} : memref<8x1152xbf16, #tpu.memory_space<vmem>>, vector<8x128xbf16>,
    %c0_275 = arith.constant 0 : index
    %c0_276 = arith.constant 0 : index
    %839 = vector.load %arg7[%c0_275, %c0_276] : memref<8x128xf32, #tpu.memory_space<vmem>>, vector<8x128xf32>
    %840 = arith.negf %839 : vector<8x128xf32>
    %841 = math.exp %840 : vector<8x128xf32>
    %cst_277 = arith.constant 1.000000e+00 : f32
    %842 = vector.broadcast %cst_277 : f32 to vector<8x128xf32>
    %843 = arith.addf %842, %841 : vector<8x128xf32>
    %844 = arith.divf %842, %843 : vector<8x128xf32>
    %845 = arith.mulf %839, %844 : vector<8x128xf32>
    %846 = arith.truncf %845 : vector<8x128xf32> to vector<8x128xbf16>
    %c0_278 = arith.constant 0 : index
    %c1024_279 = arith.constant 1024 : index
    %847 = vector.load %arg8[%c0_278, %c1024_279] : memref<8x1152xbf16, #tpu.memory_space<vmem>>, vector<8x128xbf16>
    tpu.vector_store %arg8[%c0_278, %c1024_279], %846 {strides = array<i32>} : memref<8x1152xbf16, #tpu.memory_space<vmem>>, vector<8x128xbf16>,
    %c0_280 = arith.constant 0 : index
    %c0_281 = arith.constant 0 : index
    %848 = vector.load %arg8[%c0_280, %c0_281] : memref<8x1152xbf16, #tpu.memory_space<vmem>>, vector<8x1152xbf16>
    %c0_282 = arith.constant 0 : index
    %c0_283 = arith.constant 0 : index
    %849 = vector.load %arg4[%c0_282, %c0_283] : memref<1152x128xbf16, #tpu.memory_space<vmem>>, vector<1152x128xbf16>
    %cst_284 = arith.constant dense<0.000000e+00> : vector<8x128xf32>
    %850 = tpu.matmul %848, %849, %cst_284 {dimension_numbers = #tpu.dot_dimension_numbers<[1], [0], [0], [1], [0, 0, 1, 1], [], []>} : vector<8x1152xbf16>, vector<1152x128xbf16>, vector<8x128xf32> -> vector<8x128xf32>
    %c0_285 = arith.constant 0 : index
    %c0_286 = arith.constant 0 : index
    %851 = vector.load %arg7[%c0_285, %c0_286] : memref<8x128xf32, #tpu.memory_space<vmem>>, vector<8x128xf32>
    tpu.vector_store %arg7[%c0_285, %c0_286], %850 {strides = array<i32>} : memref<8x128xf32, #tpu.memory_space<vmem>>, vector<8x128xf32>,
    %c0_287 = arith.constant 0 : index
    %c0_288 = arith.constant 0 : index
    %852 = vector.load %arg7[%c0_287, %c0_288] : memref<8x128xf32, #tpu.memory_space<vmem>>, vector<8x128xf32>
    %cst_289 = arith.constant -2.200000e+00 : f32
    %853 = vector.broadcast %cst_289 : f32 to vector<8x128xf32>
    %854 = arith.cmpf oge, %852, %853 : vector<8x128xf32>
    %855 = arith.extui %854 : vector<8x128xi1> to vector<8x128xi32>
    %856 = arith.sitofp %855 : vector<8x128xi32> to vector<8x128xf32>
    %cst_290 = arith.constant -1.800000e+00 : f32
    %857 = vector.broadcast %cst_290 : f32 to vector<8x128xf32>
    %858 = arith.cmpf oge, %852, %857 : vector<8x128xf32>
    %859 = arith.extui %858 : vector<8x128xi1> to vector<8x128xi32>
    %860 = arith.sitofp %859 : vector<8x128xi32> to vector<8x128xf32>
    %cst_291 = arith.constant -1.400000e+00 : f32
    %861 = vector.broadcast %cst_291 : f32 to vector<8x128xf32>
    %862 = arith.cmpf oge, %852, %861 : vector<8x128xf32>
    %863 = arith.extui %862 : vector<8x128xi1> to vector<8x128xi32>
    %864 = arith.sitofp %863 : vector<8x128xi32> to vector<8x128xf32>
    %cst_292 = arith.constant -1.000000e+00 : f32
    %865 = vector.broadcast %cst_292 : f32 to vector<8x128xf32>
    %866 = arith.cmpf oge, %852, %865 : vector<8x128xf32>
    %867 = arith.extui %866 : vector<8x128xi1> to vector<8x128xi32>
    %868 = arith.sitofp %867 : vector<8x128xi32> to vector<8x128xf32>
    %cst_293 = arith.constant -6.000000e-01 : f32
    %869 = vector.broadcast %cst_293 : f32 to vector<8x128xf32>
    %870 = arith.cmpf oge, %852, %869 : vector<8x128xf32>
    %871 = arith.extui %870 : vector<8x128xi1> to vector<8x128xi32>
    %872 = arith.sitofp %871 : vector<8x128xi32> to vector<8x128xf32>
    %cst_294 = arith.constant -2.000000e-01 : f32
    %873 = vector.broadcast %cst_294 : f32 to vector<8x128xf32>
    %874 = arith.cmpf oge, %852, %873 : vector<8x128xf32>
    %875 = arith.extui %874 : vector<8x128xi1> to vector<8x128xi32>
    %876 = arith.sitofp %875 : vector<8x128xi32> to vector<8x128xf32>
    %cst_295 = arith.constant 2.000000e-01 : f32
    %877 = vector.broadcast %cst_295 : f32 to vector<8x128xf32>
    %878 = arith.cmpf oge, %852, %877 : vector<8x128xf32>
    %879 = arith.extui %878 : vector<8x128xi1> to vector<8x128xi32>
    %880 = arith.sitofp %879 : vector<8x128xi32> to vector<8x128xf32>
    %cst_296 = arith.constant 6.000000e-01 : f32
    %881 = vector.broadcast %cst_296 : f32 to vector<8x128xf32>
    %882 = arith.cmpf oge, %852, %881 : vector<8x128xf32>
    %883 = arith.extui %882 : vector<8x128xi1> to vector<8x128xi32>
    %884 = arith.sitofp %883 : vector<8x128xi32> to vector<8x128xf32>
    %cst_297 = arith.constant 1.000000e+00 : f32
    %885 = vector.broadcast %cst_297 : f32 to vector<8x128xf32>
    %886 = arith.cmpf oge, %852, %885 : vector<8x128xf32>
    %887 = arith.extui %886 : vector<8x128xi1> to vector<8x128xi32>
    %888 = arith.sitofp %887 : vector<8x128xi32> to vector<8x128xf32>
    %cst_298 = arith.constant 1.400000e+00 : f32
    %889 = vector.broadcast %cst_298 : f32 to vector<8x128xf32>
    %890 = arith.cmpf oge, %852, %889 : vector<8x128xf32>
    %891 = arith.extui %890 : vector<8x128xi1> to vector<8x128xi32>
    %892 = arith.sitofp %891 : vector<8x128xi32> to vector<8x128xf32>
    %cst_299 = arith.constant 1.800000e+00 : f32
    %893 = vector.broadcast %cst_299 : f32 to vector<8x128xf32>
    %894 = arith.cmpf oge, %852, %893 : vector<8x128xf32>
    %895 = arith.extui %894 : vector<8x128xi1> to vector<8x128xi32>
    %896 = arith.sitofp %895 : vector<8x128xi32> to vector<8x128xf32>
    %cst_300 = arith.constant 2.200000e+00 : f32
    %897 = vector.broadcast %cst_300 : f32 to vector<8x128xf32>
    %898 = arith.cmpf oge, %852, %897 : vector<8x128xf32>
    %899 = arith.extui %898 : vector<8x128xi1> to vector<8x128xi32>
    %900 = arith.sitofp %899 : vector<8x128xi32> to vector<8x128xf32>
    %901 = arith.subf %856, %860 : vector<8x128xf32>
    %902 = arith.subf %860, %864 : vector<8x128xf32>
    %903 = arith.subf %864, %868 : vector<8x128xf32>
    %904 = arith.subf %868, %872 : vector<8x128xf32>
    %905 = arith.subf %872, %876 : vector<8x128xf32>
    %906 = arith.subf %876, %880 : vector<8x128xf32>
    %907 = arith.subf %880, %884 : vector<8x128xf32>
    %908 = arith.subf %884, %888 : vector<8x128xf32>
    %909 = arith.subf %888, %892 : vector<8x128xf32>
    %910 = arith.subf %892, %896 : vector<8x128xf32>
    %911 = arith.subf %896, %900 : vector<8x128xf32>
    %cst_301 = arith.constant 2.500000e+00 : f32
    %912 = vector.broadcast %cst_301 : f32 to vector<8x128xf32>
    %913 = arith.mulf %852, %912 : vector<8x128xf32>
    %cst_302 = arith.constant -5.500000e+00 : f32
    %914 = vector.broadcast %cst_302 : f32 to vector<8x128xf32>
    %915 = arith.subf %913, %914 : vector<8x128xf32>
    %cst_303 = arith.constant -4.500000e+00 : f32
    %916 = vector.broadcast %cst_303 : f32 to vector<8x128xf32>
    %917 = arith.subf %913, %916 : vector<8x128xf32>
    %cst_304 = arith.constant -3.500000e+00 : f32
    %918 = vector.broadcast %cst_304 : f32 to vector<8x128xf32>
    %919 = arith.subf %913, %918 : vector<8x128xf32>
    %cst_305 = arith.constant -2.500000e+00 : f32
    %920 = vector.broadcast %cst_305 : f32 to vector<8x128xf32>
    %921 = arith.subf %913, %920 : vector<8x128xf32>
    %cst_306 = arith.constant -1.500000e+00 : f32
    %922 = vector.broadcast %cst_306 : f32 to vector<8x128xf32>
    %923 = arith.subf %913, %922 : vector<8x128xf32>
    %cst_307 = arith.constant -5.000000e-01 : f32
    %924 = vector.broadcast %cst_307 : f32 to vector<8x128xf32>
    %925 = arith.subf %913, %924 : vector<8x128xf32>
    %cst_308 = arith.constant 5.000000e-01 : f32
    %926 = vector.broadcast %cst_308 : f32 to vector<8x128xf32>
    %927 = arith.subf %913, %926 : vector<8x128xf32>
    %cst_309 = arith.constant 1.500000e+00 : f32
    %928 = vector.broadcast %cst_309 : f32 to vector<8x128xf32>
    %929 = arith.subf %913, %928 : vector<8x128xf32>
    %cst_310 = arith.constant 2.500000e+00 : f32
    %930 = vector.broadcast %cst_310 : f32 to vector<8x128xf32>
    %931 = arith.subf %913, %930 : vector<8x128xf32>
    %cst_311 = arith.constant 3.500000e+00 : f32
    %932 = vector.broadcast %cst_311 : f32 to vector<8x128xf32>
    %933 = arith.subf %913, %932 : vector<8x128xf32>
    %cst_312 = arith.constant -3.500000e+00 : f32
    %934 = vector.broadcast %cst_312 : f32 to vector<8x128xf32>
    %935 = arith.subf %934, %913 : vector<8x128xf32>
    %cst_313 = arith.constant -2.500000e+00 : f32
    %936 = vector.broadcast %cst_313 : f32 to vector<8x128xf32>
    %937 = arith.subf %936, %913 : vector<8x128xf32>
    %cst_314 = arith.constant -1.500000e+00 : f32
    %938 = vector.broadcast %cst_314 : f32 to vector<8x128xf32>
    %939 = arith.subf %938, %913 : vector<8x128xf32>
    %cst_315 = arith.constant -5.000000e-01 : f32
    %940 = vector.broadcast %cst_315 : f32 to vector<8x128xf32>
    %941 = arith.subf %940, %913 : vector<8x128xf32>
    %cst_316 = arith.constant 5.000000e-01 : f32
    %942 = vector.broadcast %cst_316 : f32 to vector<8x128xf32>
    %943 = arith.subf %942, %913 : vector<8x128xf32>
    %cst_317 = arith.constant 1.500000e+00 : f32
    %944 = vector.broadcast %cst_317 : f32 to vector<8x128xf32>
    %945 = arith.subf %944, %913 : vector<8x128xf32>
    %cst_318 = arith.constant 2.500000e+00 : f32
    %946 = vector.broadcast %cst_318 : f32 to vector<8x128xf32>
    %947 = arith.subf %946, %913 : vector<8x128xf32>
    %cst_319 = arith.constant 3.500000e+00 : f32
    %948 = vector.broadcast %cst_319 : f32 to vector<8x128xf32>
    %949 = arith.subf %948, %913 : vector<8x128xf32>
    %cst_320 = arith.constant 4.500000e+00 : f32
    %950 = vector.broadcast %cst_320 : f32 to vector<8x128xf32>
    %951 = arith.subf %950, %913 : vector<8x128xf32>
    %cst_321 = arith.constant 5.500000e+00 : f32
    %952 = vector.broadcast %cst_321 : f32 to vector<8x128xf32>
    %953 = arith.subf %952, %913 : vector<8x128xf32>
    %954 = arith.mulf %915, %901 : vector<8x128xf32>
    %955 = arith.mulf %935, %902 : vector<8x128xf32>
    %956 = arith.addf %954, %955 : vector<8x128xf32>
    %957 = arith.mulf %917, %902 : vector<8x128xf32>
    %958 = arith.mulf %937, %903 : vector<8x128xf32>
    %959 = arith.addf %957, %958 : vector<8x128xf32>
    %960 = arith.mulf %919, %903 : vector<8x128xf32>
    %961 = arith.mulf %939, %904 : vector<8x128xf32>
    %962 = arith.addf %960, %961 : vector<8x128xf32>
    %963 = arith.mulf %921, %904 : vector<8x128xf32>
    %964 = arith.mulf %941, %905 : vector<8x128xf32>
    %965 = arith.addf %963, %964 : vector<8x128xf32>
    %966 = arith.mulf %923, %905 : vector<8x128xf32>
    %967 = arith.mulf %943, %906 : vector<8x128xf32>
    %968 = arith.addf %966, %967 : vector<8x128xf32>
    %969 = arith.mulf %925, %906 : vector<8x128xf32>
    %970 = arith.mulf %945, %907 : vector<8x128xf32>
    %971 = arith.addf %969, %970 : vector<8x128xf32>
    %972 = arith.mulf %927, %907 : vector<8x128xf32>
    %973 = arith.mulf %947, %908 : vector<8x128xf32>
    %974 = arith.addf %972, %973 : vector<8x128xf32>
    %975 = arith.mulf %929, %908 : vector<8x128xf32>
    %976 = arith.mulf %949, %909 : vector<8x128xf32>
    %977 = arith.addf %975, %976 : vector<8x128xf32>
    %978 = arith.mulf %931, %909 : vector<8x128xf32>
    %979 = arith.mulf %951, %910 : vector<8x128xf32>
    %980 = arith.addf %978, %979 : vector<8x128xf32>
    %981 = arith.mulf %933, %910 : vector<8x128xf32>
    %982 = arith.mulf %953, %911 : vector<8x128xf32>
    %983 = arith.addf %981, %982 : vector<8x128xf32>
    %cst_322 = arith.constant 1.250000e+00 : f32
    %984 = vector.broadcast %cst_322 : f32 to vector<8x128xf32>
    %985 = arith.mulf %852, %984 : vector<8x128xf32>
    %cst_323 = arith.constant -2.750000e+00 : f32
    %986 = vector.broadcast %cst_323 : f32 to vector<8x128xf32>
    %987 = arith.subf %985, %986 : vector<8x128xf32>
    %cst_324 = arith.constant -2.250000e+00 : f32
    %988 = vector.broadcast %cst_324 : f32 to vector<8x128xf32>
    %989 = arith.subf %985, %988 : vector<8x128xf32>
    %cst_325 = arith.constant -1.750000e+00 : f32
    %990 = vector.broadcast %cst_325 : f32 to vector<8x128xf32>
    %991 = arith.subf %985, %990 : vector<8x128xf32>
    %cst_326 = arith.constant -1.250000e+00 : f32
    %992 = vector.broadcast %cst_326 : f32 to vector<8x128xf32>
    %993 = arith.subf %985, %992 : vector<8x128xf32>
    %cst_327 = arith.constant -7.500000e-01 : f32
    %994 = vector.broadcast %cst_327 : f32 to vector<8x128xf32>
    %995 = arith.subf %985, %994 : vector<8x128xf32>
    %cst_328 = arith.constant -2.500000e-01 : f32
    %996 = vector.broadcast %cst_328 : f32 to vector<8x128xf32>
    %997 = arith.subf %985, %996 : vector<8x128xf32>
    %cst_329 = arith.constant 2.500000e-01 : f32
    %998 = vector.broadcast %cst_329 : f32 to vector<8x128xf32>
    %999 = arith.subf %985, %998 : vector<8x128xf32>
    %cst_330 = arith.constant 7.500000e-01 : f32
    %1000 = vector.broadcast %cst_330 : f32 to vector<8x128xf32>
    %1001 = arith.subf %985, %1000 : vector<8x128xf32>
    %cst_331 = arith.constant 1.250000e+00 : f32
    %1002 = vector.broadcast %cst_331 : f32 to vector<8x128xf32>
    %1003 = arith.subf %985, %1002 : vector<8x128xf32>
    %cst_332 = arith.constant -1.250000e+00 : f32
    %1004 = vector.broadcast %cst_332 : f32 to vector<8x128xf32>
    %1005 = arith.subf %1004, %985 : vector<8x128xf32>
    %cst_333 = arith.constant -7.500000e-01 : f32
    %1006 = vector.broadcast %cst_333 : f32 to vector<8x128xf32>
    %1007 = arith.subf %1006, %985 : vector<8x128xf32>
    %cst_334 = arith.constant -2.500000e-01 : f32
    %1008 = vector.broadcast %cst_334 : f32 to vector<8x128xf32>
    %1009 = arith.subf %1008, %985 : vector<8x128xf32>
    %cst_335 = arith.constant 2.500000e-01 : f32
    %1010 = vector.broadcast %cst_335 : f32 to vector<8x128xf32>
    %1011 = arith.subf %1010, %985 : vector<8x128xf32>
    %cst_336 = arith.constant 7.500000e-01 : f32
    %1012 = vector.broadcast %cst_336 : f32 to vector<8x128xf32>
    %1013 = arith.subf %1012, %985 : vector<8x128xf32>
    %cst_337 = arith.constant 1.250000e+00 : f32
    %1014 = vector.broadcast %cst_337 : f32 to vector<8x128xf32>
    %1015 = arith.subf %1014, %985 : vector<8x128xf32>
    %cst_338 = arith.constant 1.750000e+00 : f32
    %1016 = vector.broadcast %cst_338 : f32 to vector<8x128xf32>
    %1017 = arith.subf %1016, %985 : vector<8x128xf32>
    %cst_339 = arith.constant 2.250000e+00 : f32
    %1018 = vector.broadcast %cst_339 : f32 to vector<8x128xf32>
    %1019 = arith.subf %1018, %985 : vector<8x128xf32>
    %cst_340 = arith.constant 2.750000e+00 : f32
    %1020 = vector.broadcast %cst_340 : f32 to vector<8x128xf32>
    %1021 = arith.subf %1020, %985 : vector<8x128xf32>
    %1022 = arith.mulf %987, %956 : vector<8x128xf32>
    %1023 = arith.mulf %1005, %959 : vector<8x128xf32>
    %1024 = arith.addf %1022, %1023 : vector<8x128xf32>
    %1025 = arith.mulf %989, %959 : vector<8x128xf32>
    %1026 = arith.mulf %1007, %962 : vector<8x128xf32>
    %1027 = arith.addf %1025, %1026 : vector<8x128xf32>
    %1028 = arith.mulf %991, %962 : vector<8x128xf32>
    %1029 = arith.mulf %1009, %965 : vector<8x128xf32>
    %1030 = arith.addf %1028, %1029 : vector<8x128xf32>
    %1031 = arith.mulf %993, %965 : vector<8x128xf32>
    %1032 = arith.mulf %1011, %968 : vector<8x128xf32>
    %1033 = arith.addf %1031, %1032 : vector<8x128xf32>
    %1034 = arith.mulf %995, %968 : vector<8x128xf32>
    %1035 = arith.mulf %1013, %971 : vector<8x128xf32>
    %1036 = arith.addf %1034, %1035 : vector<8x128xf32>
    %1037 = arith.mulf %997, %971 : vector<8x128xf32>
    %1038 = arith.mulf %1015, %974 : vector<8x128xf32>
    %1039 = arith.addf %1037, %1038 : vector<8x128xf32>
    %1040 = arith.mulf %999, %974 : vector<8x128xf32>
    %1041 = arith.mulf %1017, %977 : vector<8x128xf32>
    %1042 = arith.addf %1040, %1041 : vector<8x128xf32>
    %1043 = arith.mulf %1001, %977 : vector<8x128xf32>
    %1044 = arith.mulf %1019, %980 : vector<8x128xf32>
    %1045 = arith.addf %1043, %1044 : vector<8x128xf32>
    %1046 = arith.mulf %1003, %980 : vector<8x128xf32>
    %1047 = arith.mulf %1021, %983 : vector<8x128xf32>
    %1048 = arith.addf %1046, %1047 : vector<8x128xf32>
    %cst_341 = arith.constant 0.833333313 : f32
    %1049 = vector.broadcast %cst_341 : f32 to vector<8x128xf32>
    %1050 = arith.mulf %852, %1049 : vector<8x128xf32>
    %cst_342 = arith.constant -1.83333337 : f32
    %1051 = vector.broadcast %cst_342 : f32 to vector<8x128xf32>
    %1052 = arith.subf %1050, %1051 : vector<8x128xf32>
    %cst_343 = arith.constant -1.500000e+00 : f32
    %1053 = vector.broadcast %cst_343 : f32 to vector<8x128xf32>
    %1054 = arith.subf %1050, %1053 : vector<8x128xf32>
    %cst_344 = arith.constant -1.16666663 : f32
    %1055 = vector.broadcast %cst_344 : f32 to vector<8x128xf32>
    %1056 = arith.subf %1050, %1055 : vector<8x128xf32>
    %cst_345 = arith.constant -0.833333313 : f32
    %1057 = vector.broadcast %cst_345 : f32 to vector<8x128xf32>
    %1058 = arith.subf %1050, %1057 : vector<8x128xf32>
    %cst_346 = arith.constant -5.000000e-01 : f32
    %1059 = vector.broadcast %cst_346 : f32 to vector<8x128xf32>
    %1060 = arith.subf %1050, %1059 : vector<8x128xf32>
    %cst_347 = arith.constant -0.166666672 : f32
    %1061 = vector.broadcast %cst_347 : f32 to vector<8x128xf32>
    %1062 = arith.subf %1050, %1061 : vector<8x128xf32>
    %cst_348 = arith.constant 0.166666672 : f32
    %1063 = vector.broadcast %cst_348 : f32 to vector<8x128xf32>
    %1064 = arith.subf %1050, %1063 : vector<8x128xf32>
    %cst_349 = arith.constant 5.000000e-01 : f32
    %1065 = vector.broadcast %cst_349 : f32 to vector<8x128xf32>
    %1066 = arith.subf %1050, %1065 : vector<8x128xf32>
    %cst_350 = arith.constant -5.000000e-01 : f32
    %1067 = vector.broadcast %cst_350 : f32 to vector<8x128xf32>
    %1068 = arith.subf %1067, %1050 : vector<8x128xf32>
    %cst_351 = arith.constant -0.166666672 : f32
    %1069 = vector.broadcast %cst_351 : f32 to vector<8x128xf32>
    %1070 = arith.subf %1069, %1050 : vector<8x128xf32>
    %cst_352 = arith.constant 0.166666672 : f32
    %1071 = vector.broadcast %cst_352 : f32 to vector<8x128xf32>
    %1072 = arith.subf %1071, %1050 : vector<8x128xf32>
    %cst_353 = arith.constant 5.000000e-01 : f32
    %1073 = vector.broadcast %cst_353 : f32 to vector<8x128xf32>
    %1074 = arith.subf %1073, %1050 : vector<8x128xf32>
    %cst_354 = arith.constant 0.833333313 : f32
    %1075 = vector.broadcast %cst_354 : f32 to vector<8x128xf32>
    %1076 = arith.subf %1075, %1050 : vector<8x128xf32>
    %cst_355 = arith.constant 1.16666663 : f32
    %1077 = vector.broadcast %cst_355 : f32 to vector<8x128xf32>
    %1078 = arith.subf %1077, %1050 : vector<8x128xf32>
    %cst_356 = arith.constant 1.500000e+00 : f32
    %1079 = vector.broadcast %cst_356 : f32 to vector<8x128xf32>
    %1080 = arith.subf %1079, %1050 : vector<8x128xf32>
    %cst_357 = arith.constant 1.83333337 : f32
    %1081 = vector.broadcast %cst_357 : f32 to vector<8x128xf32>
    %1082 = arith.subf %1081, %1050 : vector<8x128xf32>
    %1083 = arith.mulf %1052, %1024 : vector<8x128xf32>
    %1084 = arith.mulf %1068, %1027 : vector<8x128xf32>
    %1085 = arith.addf %1083, %1084 : vector<8x128xf32>
    %1086 = arith.truncf %1085 : vector<8x128xf32> to vector<8x128xbf16>
    %c0_358 = arith.constant 0 : index
    %c0_359 = arith.constant 0 : index
    %1087 = vector.load %arg8[%c0_358, %c0_359] : memref<8x1152xbf16, #tpu.memory_space<vmem>>, vector<8x128xbf16>
    tpu.vector_store %arg8[%c0_358, %c0_359], %1086 {strides = array<i32>} : memref<8x1152xbf16, #tpu.memory_space<vmem>>, vector<8x128xbf16>,
    %1088 = arith.mulf %1054, %1027 : vector<8x128xf32>
    %1089 = arith.mulf %1070, %1030 : vector<8x128xf32>
    %1090 = arith.addf %1088, %1089 : vector<8x128xf32>
    %1091 = arith.truncf %1090 : vector<8x128xf32> to vector<8x128xbf16>
    %c0_360 = arith.constant 0 : index
    %c128_361 = arith.constant 128 : index
    %1092 = vector.load %arg8[%c0_360, %c128_361] : memref<8x1152xbf16, #tpu.memory_space<vmem>>, vector<8x128xbf16>
    tpu.vector_store %arg8[%c0_360, %c128_361], %1091 {strides = array<i32>} : memref<8x1152xbf16, #tpu.memory_space<vmem>>, vector<8x128xbf16>,
    %1093 = arith.mulf %1056, %1030 : vector<8x128xf32>
    %1094 = arith.mulf %1072, %1033 : vector<8x128xf32>
    %1095 = arith.addf %1093, %1094 : vector<8x128xf32>
    %1096 = arith.truncf %1095 : vector<8x128xf32> to vector<8x128xbf16>
    %c0_362 = arith.constant 0 : index
    %c256_363 = arith.constant 256 : index
    %1097 = vector.load %arg8[%c0_362, %c256_363] : memref<8x1152xbf16, #tpu.memory_space<vmem>>, vector<8x128xbf16>
    tpu.vector_store %arg8[%c0_362, %c256_363], %1096 {strides = array<i32>} : memref<8x1152xbf16, #tpu.memory_space<vmem>>, vector<8x128xbf16>,
    %1098 = arith.mulf %1058, %1033 : vector<8x128xf32>
    %1099 = arith.mulf %1074, %1036 : vector<8x128xf32>
    %1100 = arith.addf %1098, %1099 : vector<8x128xf32>
    %1101 = arith.truncf %1100 : vector<8x128xf32> to vector<8x128xbf16>
    %c0_364 = arith.constant 0 : index
    %c384_365 = arith.constant 384 : index
    %1102 = vector.load %arg8[%c0_364, %c384_365] : memref<8x1152xbf16, #tpu.memory_space<vmem>>, vector<8x128xbf16>
    tpu.vector_store %arg8[%c0_364, %c384_365], %1101 {strides = array<i32>} : memref<8x1152xbf16, #tpu.memory_space<vmem>>, vector<8x128xbf16>,
    %1103 = arith.mulf %1060, %1036 : vector<8x128xf32>
    %1104 = arith.mulf %1076, %1039 : vector<8x128xf32>
    %1105 = arith.addf %1103, %1104 : vector<8x128xf32>
    %1106 = arith.truncf %1105 : vector<8x128xf32> to vector<8x128xbf16>
    %c0_366 = arith.constant 0 : index
    %c512_367 = arith.constant 512 : index
    %1107 = vector.load %arg8[%c0_366, %c512_367] : memref<8x1152xbf16, #tpu.memory_space<vmem>>, vector<8x128xbf16>
    tpu.vector_store %arg8[%c0_366, %c512_367], %1106 {strides = array<i32>} : memref<8x1152xbf16, #tpu.memory_space<vmem>>, vector<8x128xbf16>,
    %1108 = arith.mulf %1062, %1039 : vector<8x128xf32>
    %1109 = arith.mulf %1078, %1042 : vector<8x128xf32>
    %1110 = arith.addf %1108, %1109 : vector<8x128xf32>
    %1111 = arith.truncf %1110 : vector<8x128xf32> to vector<8x128xbf16>
    %c0_368 = arith.constant 0 : index
    %c640_369 = arith.constant 640 : index
    %1112 = vector.load %arg8[%c0_368, %c640_369] : memref<8x1152xbf16, #tpu.memory_space<vmem>>, vector<8x128xbf16>
    tpu.vector_store %arg8[%c0_368, %c640_369], %1111 {strides = array<i32>} : memref<8x1152xbf16, #tpu.memory_space<vmem>>, vector<8x128xbf16>,
    %1113 = arith.mulf %1064, %1042 : vector<8x128xf32>
    %1114 = arith.mulf %1080, %1045 : vector<8x128xf32>
    %1115 = arith.addf %1113, %1114 : vector<8x128xf32>
    %1116 = arith.truncf %1115 : vector<8x128xf32> to vector<8x128xbf16>
    %c0_370 = arith.constant 0 : index
    %c768_371 = arith.constant 768 : index
    %1117 = vector.load %arg8[%c0_370, %c768_371] : memref<8x1152xbf16, #tpu.memory_space<vmem>>, vector<8x128xbf16>
    tpu.vector_store %arg8[%c0_370, %c768_371], %1116 {strides = array<i32>} : memref<8x1152xbf16, #tpu.memory_space<vmem>>, vector<8x128xbf16>,
    %1118 = arith.mulf %1066, %1045 : vector<8x128xf32>
    %1119 = arith.mulf %1082, %1048 : vector<8x128xf32>
    %1120 = arith.addf %1118, %1119 : vector<8x128xf32>
    %1121 = arith.truncf %1120 : vector<8x128xf32> to vector<8x128xbf16>
    %c0_372 = arith.constant 0 : index
    %c896_373 = arith.constant 896 : index
    %1122 = vector.load %arg8[%c0_372, %c896_373] : memref<8x1152xbf16, #tpu.memory_space<vmem>>, vector<8x128xbf16>
    tpu.vector_store %arg8[%c0_372, %c896_373], %1121 {strides = array<i32>} : memref<8x1152xbf16, #tpu.memory_space<vmem>>, vector<8x128xbf16>,
    %c0_374 = arith.constant 0 : index
    %c0_375 = arith.constant 0 : index
    %1123 = vector.load %arg7[%c0_374, %c0_375] : memref<8x128xf32, #tpu.memory_space<vmem>>, vector<8x128xf32>
    %1124 = arith.negf %1123 : vector<8x128xf32>
    %1125 = math.exp %1124 : vector<8x128xf32>
    %cst_376 = arith.constant 1.000000e+00 : f32
    %1126 = vector.broadcast %cst_376 : f32 to vector<8x128xf32>
    %1127 = arith.addf %1126, %1125 : vector<8x128xf32>
    %1128 = arith.divf %1126, %1127 : vector<8x128xf32>
    %1129 = arith.mulf %1123, %1128 : vector<8x128xf32>
    %1130 = arith.truncf %1129 : vector<8x128xf32> to vector<8x128xbf16>
    %c0_377 = arith.constant 0 : index
    %c1024_378 = arith.constant 1024 : index
    %1131 = vector.load %arg8[%c0_377, %c1024_378] : memref<8x1152xbf16, #tpu.memory_space<vmem>>, vector<8x128xbf16>
    tpu.vector_store %arg8[%c0_377, %c1024_378], %1130 {strides = array<i32>} : memref<8x1152xbf16, #tpu.memory_space<vmem>>, vector<8x128xbf16>,
    %c0_379 = arith.constant 0 : index
    %c0_380 = arith.constant 0 : index
    %1132 = vector.load %arg8[%c0_379, %c0_380] : memref<8x1152xbf16, #tpu.memory_space<vmem>>, vector<8x1152xbf16>
    %c0_381 = arith.constant 0 : index
    %c0_382 = arith.constant 0 : index
    %1133 = vector.load %arg5[%c0_381, %c0_382] : memref<1152x128xbf16, #tpu.memory_space<vmem>>, vector<1152x128xbf16>
    %cst_383 = arith.constant dense<0.000000e+00> : vector<8x128xf32>
    %1134 = tpu.matmul %1132, %1133, %cst_383 {dimension_numbers = #tpu.dot_dimension_numbers<[1], [0], [0], [1], [0, 0, 1, 1], [], []>} : vector<8x1152xbf16>, vector<1152x128xbf16>, vector<8x128xf32> -> vector<8x128xf32>
    %1135 = tpu.iota {dimensions = array<i32: 1>} : vector<8x128xi32>
    %c4_i32 = arith.constant 4 : i32
    %1136 = vector.broadcast %c4_i32 : i32 to vector<8x128xi32>
    %1137 = arith.cmpi slt, %1135, %1136 : vector<8x128xi32>
    %cst_384 = arith.constant -1.000000e+30 : f32
    %1138 = vector.broadcast %cst_384 : f32 to vector<8x128xf32>
    %1139 = arith.select %1137, %1134, %1138 : vector<8x128xi1>, vector<8x128xf32>
    %cst_385 = arith.constant dense<0xFF800000> : vector<8xf32>
    %1140 = vector.multi_reduction <maximumf>, %1139, %cst_385 [1] : vector<8x128xf32> to vector<8xf32>
    %1141 = vector.shape_cast %1140 : vector<8xf32> to vector<8x1xf32>
    %1142 = vector.broadcast %1141 : vector<8x1xf32> to vector<8x128xf32>
    %1143 = arith.subf %1139, %1142 : vector<8x128xf32>
    %1144 = math.exp %1143 : vector<8x128xf32>
    %cst_386 = arith.constant dense<0.000000e+00> : vector<8xf32>
    %1145 = vector.multi_reduction <add>, %1144, %cst_386 [1] : vector<8x128xf32> to vector<8xf32>
    %1146 = vector.shape_cast %1145 : vector<8xf32> to vector<8x1xf32>
    %1147 = vector.broadcast %1146 : vector<8x1xf32> to vector<8x128xf32>
    %1148 = arith.divf %1144, %1147 : vector<8x128xf32>
    %c0_387 = arith.constant 0 : index
    %c0_388 = arith.constant 0 : index
    %1149 = vector.load %arg6[%c0_387, %c0_388] : memref<8x128xf32, #tpu.memory_space<vmem>>, vector<8x128xf32>
    tpu.vector_store %arg6[%c0_387, %c0_388], %1148 {strides = array<i32>} : memref<8x128xf32, #tpu.memory_space<vmem>>, vector<8x128xf32>,
    return
  }
  func.func @transform_0(%arg0: i32) -> (i32, i32) {
    %c0_i32 = arith.constant 0 : i32
    %c0_i32_0 = arith.constant 0 : i32
    return %arg0, %c0_i32 : i32, i32
  }
  func.func @transform_1(%arg0: i32) -> (i32, i32) {
    %c0_i32 = arith.constant 0 : i32
    %c0_i32_0 = arith.constant 0 : i32
    %c0_i32_1 = arith.constant 0 : i32
    return %c0_i32, %c0_i32_0 : i32, i32
  }
  func.func @transform_2(%arg0: i32) -> (i32, i32) {
    %c0_i32 = arith.constant 0 : i32
    %c0_i32_0 = arith.constant 0 : i32
    %c0_i32_1 = arith.constant 0 : i32
    return %c0_i32, %c0_i32_0 : i32, i32
  }
  func.func @transform_3(%arg0: i32) -> (i32, i32) {
    %c0_i32 = arith.constant 0 : i32
    %c0_i32_0 = arith.constant 0 : i32
    %c0_i32_1 = arith.constant 0 : i32
    return %c0_i32, %c0_i32_0 : i32, i32
  }
  func.func @transform_4(%arg0: i32) -> (i32, i32) {
    %c0_i32 = arith.constant 0 : i32
    %c0_i32_0 = arith.constant 0 : i32
    %c0_i32_1 = arith.constant 0 : i32
    return %c0_i32, %c0_i32_0 : i32, i32
  }
  func.func @transform_5(%arg0: i32) -> (i32, i32) {
    %c0_i32 = arith.constant 0 : i32
    %c0_i32_0 = arith.constant 0 : i32
    return %arg0, %c0_i32 : i32, i32
  }
}

</mosaic_0001>

<bundles_post_ra>
// kernel: tpu_custom_call.1
= control target key start
LH: loop header
LB: loop body
LE: loop exit
PB: predicated region body
PF: predicated region fallthrough
CT: control target
= control target key end

     0   :  { %10 = vsyncpa [#allocation5], 0  ;;  %s6200_s0 = inlined_call_operand.hbm [shape: f32[8,128], index: 0, kind: input, shape index: {}]   ;;  %s6201_s1 = inlined_call_operand.hbm [shape: bf16[1152,128], index: 1, kind: input, shape index: {}]   ;;  %s6202_s2 = inlined_call_operand.hbm [shape: bf16[1152,128], index: 2, kind: input, shape index: {}]   ;;  %s6203_s3 = inlined_call_operand.hbm [shape: bf16[1152,128], index: 3, kind: input, shape index: {}]   ;;  %s6204_s4 = inlined_call_operand.hbm [shape: bf16[1152,128], index: 4, kind: input, shape index: {}]   ;;  %s6205_s5 = inlined_call_operand.hbm [shape: f32[8,128], index: 5, kind: output, shape index: {}]  }
   0x1   :  { %11 = vsyncpa [#allocation8], 0 }
   0x2   :  { %12 = vsyncpa [#allocation11], 0 }
   0x3   :  { %13 = vsyncpa [#allocation6], 0  ;;  %s5668_s18 = smov [#allocation7]   ;;  %s5528_s22 = scalar_lea.hbm %s6201_s1, 9216 }
   0x4   :  { %s29_s19 = sshll.u32 %s5668_s18, 4  ;;  %p5529_p0 = scmp.ne.s32.totalorder %s6201_s1, %s5528_s22  ;;  %s30_s19 = int_to_ptr.vmem [resolvable:$true] %s29_s19 }
   0x5   :  { %p5532_p1 = scmp.lt.u32.totalorder %s5528_s22, %s6201_s1 }
   0x7   :  { %p5534_p2 = pnand %p5532_p1, %p5529_p0 }
   0x9   :  { %5537 = shalt.err (!%p5534_p2)
}
   0xa   :  { %s5538_s27 = scalar_lea.vmem %s30_s19, 9216  ;;  %p5543_p4 = scmp.lt.s32.totalorder %s30_s19, %s30_s19 }
   0xb   :  { %p5539_p3 = scmp.ne.s32.totalorder %s30_s19, %s5538_s27  ;;  %p5544_p5 = scmp.lt.s32.totalorder %s5538_s27, %s5538_s27 }
   0xd   :  { %p5545_p6 = por %p5544_p5, %p5543_p4 }
   0xf   :  { %p5546_p7 = pnand %p5545_p6, %p5539_p3 }
  0x11   :  { %5549 = shalt.err (!%p5546_p7)
}
  0x12   :  { %s5669_s28 = smov 64   ;;  %s5670_s29 = smov 4  }
  0x13   :  { %35 = dma.hbm_to_vmem [thread:$0]  %s6201_s1, 9216, %s30_s19, [#allocation8], %s5669_s28, %s5669_s28, %s5670_s29  }
  0x14   :  { %s5671_s7 = smov [#allocation10]   ;;  %s5672_s9 = smov [#allocation4]  }
  0x15   :  { %s53_s8 = sshll.u32 %s5671_s7, 4  ;;  %s20_s10 = sshll.u32 %s5672_s9, 4  ;;  %s54_s8 = int_to_ptr.vmem [resolvable:$true] %s53_s8  ;;  %s21_s10 = int_to_ptr.vmem [resolvable:$true] %s20_s10 }
  0x16   :  { %s5550_s13 = scalar_lea.hbm %s6203_s3, 9216 }
  0x17   :  { %p5551_p8 = scmp.ne.s32.totalorder %s6203_s3, %s5550_s13  ;;  %p5554_p9 = scmp.lt.u32.totalorder %s5550_s13, %s6203_s3 }
  0x19   :  { %p5556_p10 = pnand %p5554_p9, %p5551_p8 }
  0x1b   :  { %5559 = shalt.err (!%p5556_p10)
}
  0x1c   :  { %s5560_s1 = scalar_lea.vmem %s54_s8, 9216  ;;  %p5565_p12 = scmp.lt.s32.totalorder %s54_s8, %s54_s8 }
  0x1d   :  { %p5561_p11 = scmp.ne.s32.totalorder %s54_s8, %s5560_s1  ;;  %p5566_p13 = scmp.lt.s32.totalorder %s5560_s1, %s5560_s1 }
  0x1f   :  { %p5567_p0 = por %p5566_p13, %p5565_p12 }
  0x21   :  { %p5568_p1 = pnand %p5567_p0, %p5561_p11 }
  0x23   :  { %5571 = shalt.err (!%p5568_p1)
}
  0x24   :  { %59 = dma.hbm_to_vmem [thread:$0]  %s6203_s3, 9216, %s54_s8, [#allocation11], %s5669_s28, %s5669_s28, %s5670_s29  }
  0x25   :  { %s5572_s22 = scalar_lea.hbm %s6200_s0, 128 }
  0x26   :  { %p5573_p2 = scmp.ne.s32.totalorder %s6200_s0, %s5572_s22  ;;  %p5576_p3 = scmp.lt.u32.totalorder %s5572_s22, %s6200_s0 }
  0x28   :  { %p5578_p4 = pnand %p5576_p3, %p5573_p2 }
  0x2a   :  { %5581 = shalt.err (!%p5578_p4)
}
  0x2b   :  { %s5582_s27 = scalar_lea.vmem %s21_s10, 128  ;;  %p5587_p6 = scmp.lt.s32.totalorder %s21_s10, %s21_s10 }
  0x2c   :  { %p5583_p5 = scmp.ne.s32.totalorder %s21_s10, %s5582_s27  ;;  %p5588_p7 = scmp.lt.s32.totalorder %s5582_s27, %s5582_s27 }
  0x2e   :  { %p5589_p8 = por %p5588_p7, %p5587_p6 }
  0x30   :  { %p5590_p9 = pnand %p5589_p8, %p5583_p5 }
  0x32   :  { %5593 = shalt.err (!%p5590_p9)
}
  0x33   :  { %23 = dma.hbm_to_vmem [thread:$0]  %s6200_s0, 128, %s21_s10, [#allocation5]  }
  0x34   :  { %s5673_s6 = smov [#allocation9]   ;;  %s5674_s8 = smov [#allocation12]  }
  0x35   :  { %s41_s7 = sshll.u32 %s5673_s6, 4  ;;  %s65_s9 = sshll.u32 %s5674_s8, 4  ;;  %s42_s7 = int_to_ptr.vmem [resolvable:$true] %s41_s7  ;;  %s66_s9 = int_to_ptr.vmem [resolvable:$true] %s65_s9 }
  0x36   :  { %s5594_s13 = scalar_lea.hbm %s6202_s2, 9216 }
  0x37   :  { %p5595_p10 = scmp.ne.s32.totalorder %s6202_s2, %s5594_s13  ;;  %p5598_p11 = scmp.lt.u32.totalorder %s5594_s13, %s6202_s2 }
  0x39   :  { %p5600_p12 = pnand %p5598_p11, %p5595_p10 }
  0x3b   :  { %5603 = shalt.err (!%p5600_p12)
}
  0x3c   :  { %s5604_s0 = scalar_lea.vmem %s42_s7, 9216  ;;  %p5609_p0 = scmp.lt.s32.totalorder %s42_s7, %s42_s7 }
  0x3d   :  { %p5605_p13 = scmp.ne.s32.totalorder %s42_s7, %s5604_s0  ;;  %p5610_p1 = scmp.lt.s32.totalorder %s5604_s0, %s5604_s0 }
  0x3f   :  { %p5611_p2 = por %p5610_p1, %p5609_p0 }
  0x41   :  { %p5612_p3 = pnand %p5611_p2, %p5605_p13 }
  0x43   :  { %5615 = shalt.err (!%p5612_p3)
}
  0x44   :  { %47 = dma.hbm_to_vmem [thread:$0]  %s6202_s2, 9216, %s42_s7, [#allocation8], %s5669_s28, %s5669_s28, %s5670_s29  }
  0x45   :  { %s5616_s20 = scalar_lea.hbm %s6204_s4, 9216 }
  0x46   :  { %p5617_p4 = scmp.ne.s32.totalorder %s6204_s4, %s5616_s20  ;;  %p5620_p5 = scmp.lt.u32.totalorder %s5616_s20, %s6204_s4 }
  0x48   :  { %p5622_p6 = pnand %p5620_p5, %p5617_p4 }
  0x4a   :  { %5625 = shalt.err (!%p5622_p6)
}
  0x4b   :  { %s5626_s25 = scalar_lea.vmem %s66_s9, 9216  ;;  %p5631_p8 = scmp.lt.s32.totalorder %s66_s9, %s66_s9 }
  0x4c   :  { %p5627_p7 = scmp.ne.s32.totalorder %s66_s9, %s5626_s25  ;;  %p5632_p9 = scmp.lt.s32.totalorder %s5626_s25, %s5626_s25 }
  0x4e   :  { %p5633_p10 = por %p5632_p9, %p5631_p8 }
  0x50   :  { %p5634_p11 = pnand %p5633_p10, %p5627_p7 }
  0x52   :  { %5637 = shalt.err (!%p5634_p11)
}
  0x53   :  { %71 = dma.hbm_to_vmem [thread:$0]  %s6204_s4, 9216, %s66_s9, [#allocation11], %s5669_s28, %s5669_s28, %s5670_s29  }
  0x54   :  { %5660 = dma.done.wait [#allocation5], 128  }
  0x55   :  { %5661 = vsyncadd [#allocation5], 4294967168 }
  0x56   :  { %5662 = dma.done.wait [#allocation8], 18432  }
  0x57   :  { %5663 = vsyncadd [#allocation8], 4294948864 }
  0x58   :  { %5664 = dma.done.wait [#allocation11], 18432  }
  0x59   :  { %5665 = vsyncadd [#allocation11], 4294948864  ;;  %v5184_v0 = vld [vmem:[#allocation7 + $0x40] sm:$0xff]   ;;  %v5188_v4 = vld [vmem:[#allocation7 + $0x48] sm:$0xff]   ;;  %v5675_v33 = vmov 0.0   ;;  %vm5676_vm12 = vmmov 0  }
  0x5a   :  { %v5185_v1 = vld [vmem:[#allocation7 + $0xc0] sm:$0xff]   ;;  %4706 = vmatprep.subr.bf16.mxu0 %v5184_v0  ;;  %v5189_v5 = vld [vmem:[#allocation7 + $0xc8] sm:$0xff]   ;;  %v5192_v8 = vld [vmem:[#allocation7 + $0x50] sm:$0xff]   ;;  %s5677_s4 = smov [#allocation13]  }
  0x5b   :  { %v5186_v2 = vld [vmem:[#allocation7] sm:$0xff]   ;;  %4728 = vmatprep.subr.bf16.mxu1 %v5185_v1  ;;  %v5190_v6 = vld [vmem:[#allocation7 + $0x8] sm:$0xff]   ;;  %v5193_v9 = vld [vmem:[#allocation7 + $0xd0] sm:$0xff]   ;;  %s4211_s28 = sshll.u32 %s5677_s4, 4  ;;  %s4212_s28 = int_to_ptr.vmem [resolvable:$true] %s4211_s28 }
  0x5c   :  { %v5187_v3 = vld [vmem:[#allocation7 + $0x80] sm:$0xff]   ;;  %4707 = vmatpush3.bf16.msra.mxu0 %v5186_v2  ;;  %v5191_v7 = vld [vmem:[#allocation7 + $0x88] sm:$0xff]   ;;  %v5194_v10 = vld [vmem:[#allocation7 + $0x10] sm:$0xff]   ;;  %s5638_s29 = scalar_lea.vmem %s4212_s28, 128  ;;  %p5643_p13 = scmp.lt.s32.totalorder %s4212_s28, %s4212_s28 }
  0x5d   :  { %4729 = vmatpush3.bf16.msra.mxu1 %v5187_v3  ;;  %4708 = vmatprep.subr.bf16.mxu0 %v5188_v4  ;;  %v5195_v11 = vld [vmem:[#allocation7 + $0x90] sm:$0xff]   ;;  %v5196_v12 = vld [vmem:[#allocation7 + $0x58] sm:$0xff]   ;;  %v5200_v16 = vld [vmem:[#allocation7 + $0x60] sm:$0xff]   ;;  %p5639_p12 = scmp.ne.s32.totalorder %s4212_s28, %s5638_s29  ;;  %p5644_p0 = scmp.lt.s32.totalorder %s5638_s29, %s5638_s29 }
  0x5e   :  { %4730 = vmatprep.subr.bf16.mxu1 %v5189_v5  ;;  %v5197_v13 = vld [vmem:[#allocation7 + $0xd8] sm:$0xff]   ;;  %v5201_v17 = vld [vmem:[#allocation7 + $0xe0] sm:$0xff]   ;;  %v5204_v20 = vld [vmem:[#allocation7 + $0x68] sm:$0xff]  }
  0x5f   :  { %v5198_v14 = vld [vmem:[#allocation7 + $0x18] sm:$0xff]   ;;  %v5202_v18 = vld [vmem:[#allocation7 + $0x20] sm:$0xff]   ;;  %v5205_v21 = vld [vmem:[#allocation7 + $0xe8] sm:$0xff]   ;;  %p5645_p1 = por %p5644_p0, %p5643_p13 }
  0x60   :  { %4709 = vmatpush3.bf16.msra.mxu0 %v5190_v6  ;;  %v5199_v15 = vld [vmem:[#allocation7 + $0x98] sm:$0xff]   ;;  %v5203_v19 = vld [vmem:[#allocation7 + $0xa0] sm:$0xff]   ;;  %v5206_v22 = vld [vmem:[#allocation7 + $0x28] sm:$0xff]  }
  0x61   :  { %4731 = vmatpush3.bf16.msra.mxu1 %v5191_v7  ;;  %4710 = vmatprep.subr.bf16.mxu0 %v5192_v8  ;;  %v5207_v23 = vld [vmem:[#allocation7 + $0xa8] sm:$0xff]   ;;  %v5208_v24 = vld [vmem:[#allocation7 + $0x70] sm:$0xff]   ;;  %v5212_v28 = vld [vmem:[#allocation7 + $0x78] sm:$0xff]   ;;  %p5646_p2 = pnand %p5645_p1, %p5639_p12 }
  0x62   :  { %4732 = vmatprep.subr.bf16.mxu1 %v5193_v9  ;;  %v5209_v25 = vld [vmem:[#allocation7 + $0xf0] sm:$0xff]   ;;  %v5213_v29 = vld [vmem:[#allocation7 + $0xf8] sm:$0xff]   ;;  %v5220_v37 = vld [vmem:[#allocation7 + $0x140] sm:$0xff]  }
  0x63   :  { %v5210_v26 = vld [vmem:[#allocation7 + $0x30] sm:$0xff]   ;;  %v5214_v30 = vld [vmem:[#allocation7 + $0x38] sm:$0xff]   ;;  %v5222_v39 = vld [vmem:[#allocation7 + $0x1c0] sm:$0xff]  }
  0x64   :  { %4711 = vmatpush3.bf16.msra.mxu0 %v5194_v10  ;;  %v5211_v27 = vld [vmem:[#allocation7 + $0xb0] sm:$0xff]   ;;  %v5215_v31 = vld [vmem:[#allocation7 + $0xb8] sm:$0xff]  }
  0x65   :  { %4733 = vmatpush3.bf16.msra.mxu1 %v5195_v11  ;;  %4712 = vmatprep.subr.bf16.mxu0 %v5196_v12  ;;  %v5780_v32 = vld [vmem:[#allocation4] sm:$0xff] }
  0x66   :  { %4734 = vmatprep.subr.bf16.mxu1 %v5197_v13  ;;  %vm89_vm0 = vcmp.ge.f32.partialorder %v5780_v32, -2.2  ;;  %vm92_vm1 = vcmp.ge.f32.partialorder %v5780_v32, -1.8  ;;  %vm95_vm2 = vcmp.ge.f32.partialorder %v5780_v32, -1.4 }
  0x67   :  { %v4222_v34 = vsel %vm89_vm0, 1.0, %v5675_v33  ;;  %v4223_v35 = vsel %vm92_vm1, 1.0, %v5675_v33  ;;  %v4224_v36 = vsel %vm95_vm2, 1.0, %v5675_v33  ;;  %vm98_vm3 = vcmp.ge.f32.partialorder %v5780_v32, -1.0 }
  0x68   :  { %4713 = vmatpush3.bf16.msra.mxu0 %v5198_v14  ;;  %v4225_v38 = vsel %vm98_vm3, 1.0, %v5675_v33  ;;  %vm101_vm4 = vcmp.ge.f32.partialorder %v5780_v32, -0.6  ;;  %vm104_vm5 = vcmp.ge.f32.partialorder %v5780_v32, -0.2  ;;  %v125_v42 = vsub.f32 %v4222_v34, %v4223_v35 }
  0x69   :  { %4735 = vmatpush3.bf16.msra.mxu1 %v5199_v15  ;;  %4714 = vmatprep.subr.bf16.mxu0 %v5200_v16  ;;  %v4226_v40 = vsel %vm101_vm4, 1.0, %v5675_v33  ;;  %v4227_v41 = vsel %vm104_vm5, 1.0, %v5675_v33  ;;  %v126_v43 = vsub.f32 %v4223_v35, %v4224_v36  ;;  %v127_v44 = vsub.f32 %v4224_v36, %v4225_v38 }
  0x6a   :  { %4736 = vmatprep.subr.bf16.mxu1 %v5201_v17  ;;  %v128_v45 = vsub.f32 %v4225_v38, %v4226_v40  ;;  %v5795_v46 = vmul.f32 2.5, %v5780_v32  ;;  %v5798_v47 = vmul.f32 1.25, %v5780_v32  ;;  %v129_v48 = vsub.f32 %v4226_v40, %v4227_v41 }
  0x6b   :  { %v5801_v49 = vmul.f32 0.8333333, %v5780_v32  ;;  %vm107_vm6 = vcmp.ge.f32.partialorder %v5780_v32, 0.2  ;;  %vm110_vm7 = vcmp.ge.f32.partialorder %v5780_v32, 0.6 }
  0x6c   :  { %4715 = vmatpush3.bf16.msra.mxu0 %v5202_v18  ;;  %v4234_v50 = vadd.f32 5.5, %v5795_v46  ;;  %v4235_v51 = vadd.f32 4.5, %v5795_v46  ;;  %v4236_v52 = vadd.f32 3.5, %v5795_v46  ;;  %v4237_v53 = vadd.f32 2.5, %v5795_v46 }
  0x6d   :  { %4737 = vmatpush3.bf16.msra.mxu1 %v5203_v19  ;;  %4716 = vmatprep.subr.bf16.mxu0 %v5204_v20  ;;  %v147_v54 = vsub.f32 -3.5, %v5795_v46  ;;  %v148_v55 = vsub.f32 -2.5, %v5795_v46  ;;  %v149_v56 = vsub.f32 -1.5, %v5795_v46  ;;  %v150_v57 = vsub.f32 -0.5, %v5795_v46 }
  0x6e   :  { %4738 = vmatprep.subr.bf16.mxu1 %v5205_v21  ;;  %v157_v58 = vmul.f32 %v4234_v50, %v125_v42  ;;  %v160_v59 = vmul.f32 %v4235_v51, %v126_v43  ;;  %v163_v60 = vmul.f32 %v4236_v52, %v127_v44  ;;  %v166_v61 = vmul.f32 %v4237_v53, %v128_v45 }
  0x6f   :  { %v158_v62 = vmul.f32 %v147_v54, %v126_v43  ;;  %v161_v63 = vmul.f32 %v148_v55, %v127_v44  ;;  %v164_v0 = vmul.f32 %v149_v56, %v128_v45  ;;  %v167_v1 = vmul.f32 %v150_v57, %v129_v48 }
  0x70   :  { %4717 = vmatpush3.bf16.msra.mxu0 %v5206_v22  ;;  %v4244_v2 = vadd.f32 2.75, %v5798_v47  ;;  %v4245_v3 = vadd.f32 2.25, %v5798_v47  ;;  %v4246_v4 = vadd.f32 1.75, %v5798_v47  ;;  %v197_v5 = vsub.f32 -1.25, %v5798_v47 }
  0x71   :  { %4739 = vmatpush3.bf16.msra.mxu1 %v5207_v23  ;;  %4718 = vmatprep.subr.bf16.mxu0 %v5208_v24  ;;  %v159_v6 = vadd.f32 %v158_v62, %v157_v58  ;;  %v162_v7 = vadd.f32 %v161_v63, %v160_v59  ;;  %v165_v8 = vadd.f32 %v164_v0, %v163_v60  ;;  %v198_v10 = vsub.f32 -0.75, %v5798_v47 }
  0x72   :  { %4740 = vmatprep.subr.bf16.mxu1 %v5209_v25  ;;  %v168_v9 = vadd.f32 %v167_v1, %v166_v61  ;;  %v199_v11 = vsub.f32 -0.25, %v5798_v47  ;;  %v4253_v12 = vadd.f32 1.8333334, %v5801_v49  ;;  %v4254_v13 = vadd.f32 1.5, %v5801_v49 }
  0x73   :  { %v206_v14 = vmul.f32 %v4244_v2, %v159_v6  ;;  %v207_v15 = vmul.f32 %v197_v5, %v162_v7  ;;  %v209_v16 = vmul.f32 %v4245_v3, %v162_v7  ;;  %v212_v17 = vmul.f32 %v4246_v4, %v165_v8 }
  0x74   :  { %4719 = vmatpush3.bf16.msra.mxu0 %v5210_v26  ;;  %v210_v18 = vmul.f32 %v198_v10, %v165_v8  ;;  %v213_v19 = vmul.f32 %v199_v11, %v168_v9  ;;  %v242_v20 = vsub.f32 -0.5, %v5801_v49  ;;  %v243_v21 = vsub.f32 -0.16666667, %v5801_v49 }
  0x75   :  { %4741 = vmatpush3.bf16.msra.mxu1 %v5211_v27  ;;  %4720 = vmatprep.subr.bf16.mxu0 %v5212_v28  ;;  %v208_v22 = vadd.f32 %v207_v15, %v206_v14  ;;  %v4228_v23 = vsel %vm107_vm6, 1.0, %v5675_v33  ;;  %v4229_v24 = vsel %vm110_vm7, 1.0, %v5675_v33  ;;  %vm113_vm8 = vcmp.ge.f32.partialorder %v5780_v32, 1.0 }
  0x76   :  { %4742 = vmatprep.subr.bf16.mxu1 %v5213_v29  ;;  %v211_v25 = vadd.f32 %v210_v18, %v209_v16  ;;  %v214_v26 = vadd.f32 %v213_v19, %v212_v17  ;;  %v130_v27 = vsub.f32 %v4227_v41, %v4228_v23  ;;  %v4230_v29 = vsel %vm113_vm8, 1.0, %v5675_v33 }
  0x77   :  { %v250_v28 = vmul.f32 %v4253_v12, %v208_v22  ;;  %v151_v38 = vsub.f32 0.5, %v5795_v46  ;;  %v4247_v42 = vadd.f32 1.25, %v5798_v47  ;;  %v4248_v45 = vadd.f32 0.75, %v5798_v47 }
  0x78   :  { %4721 = vmatpush3.bf16.msra.mxu0 %v5214_v30  ;;  %v131_v30 = vsub.f32 %v4228_v23, %v4229_v24  ;;  %v251_v34 = vmul.f32 %v242_v20, %v211_v25  ;;  %v255_v35 = vmul.f32 %v4254_v13, %v211_v25  ;;  %v256_v36 = vmul.f32 %v243_v21, %v214_v26  ;;  %v5221_v21 = vld [vmem:[#allocation7 + $0x100] sm:$0xff]  }
  0x79   :  { %4743 = vmatpush3.bf16.msra.mxu1 %v5215_v31  ;;  %4750 = vmatprep.subr.bf16.mxu0 %v5220_v37  ;;  %v4238_v31 = vadd.f32 1.5, %v5795_v46  ;;  %v4239_v37 = vadd.f32 0.5, %v5795_v46  ;;  %v170_v50 = vmul.f32 %v151_v38, %v130_v27  ;;  %v200_v52 = vsub.f32 0.25, %v5798_v47 }
  0x7a   :  { %4772 = vmatprep.subr.bf16.mxu1 %v5222_v39  ;;  %v152_v39 = vsub.f32 1.5, %v5795_v46  ;;  %v252_v43 = vadd.f32 %v251_v34, %v250_v28  ;;  %v257_v41 = vadd.f32 %v256_v36, %v255_v35  ;;  %v201_v53 = vsub.f32 0.75, %v5798_v47  ;;  %v5225_v36 = vld [vmem:[#allocation7 + $0x108] sm:$0xff]  }
  0x7b   :  { %v169_v40 = vmul.f32 %v4238_v31, %v129_v48  ;;  %v172_v44 = vmul.f32 %v4239_v37, %v130_v27  ;;  %v215_v56 = vmul.f32 %v4247_v42, %v168_v9  ;;  %v4255_v57 = vadd.f32 1.1666666, %v5801_v49 }
  0x7c   :  { %v173_v51 = vmul.f32 %v152_v39, %v131_v30  ;;  %v253_v54 = vpack.c.bf16 %v252_v43, %v252_v43  ;;  %v258_v55 = vpack.c.bf16 %v257_v41, %v257_v41  ;;  %v4256_v59 = vadd.f32 0.8333333, %v5801_v49  ;;  %v5228_v39 = vld [vmem:[#allocation7 + $0x150] sm:$0xff]  }
  0x7d   :  { %v171_v58 = vadd.f32 %v170_v50, %v169_v40  ;;  %v244_v60 = vsub.f32 0.16666667, %v5801_v49  ;;  %v245_v61 = vsub.f32 0.5, %v5801_v49  ;;  %v132_v1 = vsub.f32 %v4229_v24, %v4230_v29  ;;  %v5229_v43 = vld [vmem:[#allocation7 + $0x110] sm:$0xff]  }
  0x7e   :  { %v174_v48 = vadd.f32 %v173_v51, %v172_v44  ;;  %254 = vst [vmem:[#allocation3] sm:$0xf] %v253_v54  ;;  %259 = vst [vmem:[#allocation3 + $0x4] sm:$0xf] %v258_v55  ;;  %v4240_v2 = vadd.f32 -0.5, %v5795_v46  ;;  %v260_v5 = vmul.f32 %v4255_v57, %v214_v26  ;;  %v4241_v6 = vadd.f32 -1.5, %v5795_v46 }
  0x7f   :  { %v216_v62 = vmul.f32 %v200_v52, %v171_v58  ;;  %v218_v63 = vmul.f32 %v4248_v45, %v171_v58  ;;  %v153_v7 = vsub.f32 2.5, %v5795_v46  ;;  %v154_v12 = vsub.f32 3.5, %v5795_v46  ;;  %v5224_v26 = vld [vmem:[#allocation7 + $0x148] sm:$0xff]   ;;  %v5232_v45 = vld [vmem:[#allocation7 + $0x158] sm:$0xff]  }
  0x80   :  { %v219_v0 = vmul.f32 %v201_v53, %v174_v48  ;;  %v175_v8 = vmul.f32 %v4240_v2, %v131_v30  ;;  %v4249_v14 = vadd.f32 0.25, %v5798_v47  ;;  %vm116_vm9 = vcmp.ge.f32.partialorder %v5780_v32, 1.4 }
  0x81   :  { %v217_v3 = vadd.f32 %v216_v62, %v215_v56  ;;  %v176_v13 = vmul.f32 %v153_v7, %v132_v1  ;;  %v178_v18 = vmul.f32 %v4241_v6, %v132_v1  ;;  %v4231_v22 = vsel %vm116_vm9, 1.0, %v5675_v33  ;;  %v5233_v6 = vld [vmem:[#allocation7 + $0x118] sm:$0xff]   ;;  %v5236_v7 = vld [vmem:[#allocation7 + $0x160] sm:$0xff]  }
  0x82   :  { %v220_v4 = vadd.f32 %v219_v0, %v218_v63  ;;  %v133_v27 = vsub.f32 %v4230_v29, %v4231_v22  ;;  %v4250_v28 = vadd.f32 -0.25, %v5798_v47  ;;  %v202_v30 = vsub.f32 1.25, %v5798_v47 }
  0x83   :  { %v261_v9 = vmul.f32 %v244_v60, %v217_v3  ;;  %v265_v10 = vmul.f32 %v4256_v59, %v217_v3  ;;  %v177_v23 = vadd.f32 %v176_v13, %v175_v8  ;;  %v221_v31 = vmul.f32 %v4249_v14, %v174_v48  ;;  %v5223_v60 = vld [vmem:[#allocation7 + $0x180] sm:$0xff]   ;;  %v5226_v3 = vld [vmem:[#allocation7 + $0x1c8] sm:$0xff]  }
  0x84   :  { %v266_v11 = vmul.f32 %v245_v61, %v220_v4  ;;  %v179_v34 = vmul.f32 %v154_v12, %v133_v27  ;;  %v203_v35 = vsub.f32 1.75, %v5798_v47  ;;  %v4257_v38 = vadd.f32 0.5, %v5801_v49  ;;  %v5227_v12 = vld [vmem:[#allocation7 + $0x188] sm:$0xff]  }
  0x85   :  { %v300_v15 = vld [vmem:[#allocation3] sm:$0xff]  ;;  %v262_v16 = vadd.f32 %v261_v9, %v260_v5  ;;  %v222_v37 = vmul.f32 %v202_v30, %v177_v23  ;;  %v224_v40 = vmul.f32 %v4250_v28, %v177_v23  ;;  %v4242_v42 = vadd.f32 -2.5, %v5795_v46 }
  0x86   :  { %v267_v17 = vadd.f32 %v266_v11, %v265_v10  ;;  %v4263_v19 = vcombine.high %v300_v15, %v300_v15  ;;  %v4262_v20 = vcombine.low %v300_v15, %v300_v15  ;;  %v180_v29 = vadd.f32 %v179_v34, %v178_v18  ;;  %v5234_v34 = vld [vmem:[#allocation7 + $0x1d8] sm:$0xff]  }
  0x87   :  { %v263_v24 = vpack.c.bf16 %v262_v16, %v262_v16  ;;  %v223_v41 = vadd.f32 %v222_v37, %v221_v31  ;;  %v4258_v44 = vadd.f32 0.16666667, %v5801_v49  ;;  %v246_v51 = vsub.f32 0.8333333, %v5801_v49 }
  0x88   :  { %v268_v25 = vpack.c.bf16 %v267_v17, %v267_v17  ;;  %945 = vmatprep.mubr.bf16.mxu0 %v4263_v19  ;;  %v225_v50 = vmul.f32 %v203_v35, %v180_v29  ;;  %v247_v52 = vsub.f32 1.1666666, %v5801_v49  ;;  %v270_v53 = vmul.f32 %v4257_v38, %v220_v4  ;;  %v5230_v17 = vld [vmem:[#allocation7 + $0x1d0] sm:$0xff]   ;;  %v5241_v35 = vld [vmem:[#allocation7 + $0x128] sm:$0xff]  }
  0x89   :  { %264 = vst [vmem:[#allocation3 + $0x8] sm:$0xf] %v263_v24  ;;  %946 = vmatmul.mubr.bf16.vlgmr.msra.gmra.mrb[0].mxu0 %v4262_v20  ;;  %v275_v54 = vmul.f32 %v4258_v44, %v223_v41  ;;  %vm119_vm10 = vcmp.ge.f32.partialorder %v5780_v32, 1.8  ;;  %vm122_vm11 = vcmp.ge.f32.partialorder %v5780_v32, 2.2  ;;  %v181_v55 = vmul.f32 %v4242_v42, %v133_v27 }
  0x8a   :  { %269 = vst [vmem:[#allocation3 + $0xc] sm:$0xf] %v268_v25  ;;  %4751 = vmatpush3.bf16.msra.mxu0 %v5221_v21  ;;  %v226_v56 = vadd.f32 %v225_v50, %v224_v40  ;;  %v271_v57 = vmul.f32 %v246_v51, %v223_v41  ;;  %v4232_v58 = vsel %vm119_vm10, 1.0, %v5675_v33  ;;  %v4233_v48 = vsel %vm122_vm11, 1.0, %v5675_v33  ;;  %v5237_v25 = vld [vmem:[#allocation7 + $0x120] sm:$0xff]   ;;  %v5235_v41 = vld [vmem:[#allocation7 + $0x198] sm:$0xff]  }
  0x8b   :  { %4752 = vmatprep.subr.bf16.mxu0 %v5224_v26  ;;  %v134_v61 = vsub.f32 %v4231_v22, %v4232_v58  ;;  %v135_v62 = vsub.f32 %v4232_v58, %v4233_v48  ;;  %v4243_v63 = vadd.f32 -3.5, %v5795_v46  ;;  %v155_v0 = vsub.f32 4.5, %v5795_v46  ;;  %v5240_v26 = vld [vmem:[#allocation7 + $0x168] sm:$0xff]   ;;  %v5245_v44 = vld [vmem:[#allocation7 + $0x130] sm:$0xff]   ;;  %v5248_v51 = vld [vmem:[#allocation7 + $0x178] sm:$0xff]  }
  0x8c   :  { %v272_v4 = vadd.f32 %v271_v57, %v270_v53  ;;  %v276_v5 = vmul.f32 %v247_v52, %v226_v56  ;;  %v156_v8 = vsub.f32 5.5, %v5795_v46  ;;  %v4251_v11 = vadd.f32 -0.75, %v5798_v47  ;;  %v5242_v57 = vld [vmem:[#allocation7 + $0x1e8] sm:$0xff]   ;;  %v5249_v58 = vld [vmem:[#allocation7 + $0x138] sm:$0xff]  }
  0x8d   :  { %v182_v9 = vmul.f32 %v155_v0, %v134_v61  ;;  %v184_v10 = vmul.f32 %v4243_v63, %v134_v61  ;;  %v4252_v15 = vadd.f32 -1.25, %v5798_v47  ;;  %v204_v16 = vsub.f32 2.25, %v5798_v47  ;;  %v5246_v61 = vld [vmem:[#allocation7 + $0x1f0] sm:$0xff]   ;;  %v5255_v63 = vld [vmem:[#allocation7 + $0x200] sm:$0xff]  }
  0x8e   :  { %4753 = vmatpush3.bf16.msra.mxu0 %v5225_v36  ;;  %v273_v13 = vpack.c.bf16 %v272_v4, %v272_v4  ;;  %v277_v14 = vadd.f32 %v276_v5, %v275_v54  ;;  %v185_v19 = vmul.f32 %v156_v8, %v135_v62  ;;  %v205_v20 = vsub.f32 2.75, %v5798_v47  ;;  %v5231_v47 = vld [vmem:[#allocation7 + $0x190] sm:$0xff]  }
  0x8f   :  { %4754 = vmatprep.subr.bf16.mxu0 %v5228_v39  ;;  %v183_v18 = vadd.f32 %v182_v9, %v181_v55  ;;  %v227_v46 = vmul.f32 %v4251_v11, %v180_v29  ;;  %v4259_v22 = vadd.f32 -0.16666667, %v5801_v49  ;;  %v4260_v23 = vadd.f32 -0.5, %v5801_v49  ;;  %v5244_v29 = vld [vmem:[#allocation7 + $0x170] sm:$0xff]   ;;  %v5239_v55 = vld [vmem:[#allocation7 + $0x1a0] sm:$0xff]   ;;  %v5259_v9 = vld [vmem:[#allocation7 + $0x218] sm:$0xff]  }
  0x90   :  { %274 = vst [vmem:[#allocation3 + $0x10] sm:$0xf] %v273_v13  ;;  %v278_v21 = vpack.c.bf16 %v277_v14, %v277_v14  ;;  %v248_v24 = vsub.f32 1.5, %v5801_v49  ;;  %v186_v27 = vadd.f32 %v185_v19, %v184_v10  ;;  %v249_v31 = vsub.f32 1.8333334, %v5801_v49  ;;  %v5238_v49 = vld [vmem:[#allocation7 + $0x1e0] sm:$0xff]  }
  0x91   :  { %v301_v59 = vld [vmem:[#allocation3 + $0x8] sm:$0xff]  ;;  %v228_v28 = vmul.f32 %v204_v16, %v183_v18  ;;  %v230_v30 = vmul.f32 %v4252_v15, %v183_v18  ;;  %v280_v38 = vmul.f32 %v4259_v22, %v226_v56  ;;  %v4261_v39 = vmul.f32 -1.442695, %v5780_v32  ;;  %v5261_v14 = vld [vmem:[#allocation7 + $0x228] sm:$0xff]   ;;  %v5262_v15 = vld [vmem:[#allocation7 + $0x230] sm:$0xff]  }
  0x92   :  { %v4265_v1 = vcombine.high %v301_v59, %v301_v59  ;;  %v4264_v2 = vcombine.low %v301_v59, %v301_v59  ;;  %4755 = vmatpush3.bf16.msra.mxu0 %v5229_v43  ;;  %279 = vst [vmem:[#allocation3 + $0x14] sm:$0xf] %v278_v21  ;;  %v231_v37 = vmul.f32 %v205_v20, %v186_v27  ;;  %v5243_v59 = vld [vmem:[#allocation7 + $0x1a8] sm:$0xff]   ;;  %v5263_v16 = vld [vmem:[#allocation7 + $0x238] sm:$0xff]   ;;  %v5266_v18 = vld [vmem:[#allocation9 + $0xc0] sm:$0xff]  }
  0x93   :  { %4756 = vmatprep.subr.bf16.mxu0 %v5232_v45  ;;  %v229_v36 = vadd.f32 %v228_v28, %v227_v46  ;;  %5508 = vpow2.f32 %v4261_v39  ;;  %v5267_v19 = vld [vmem:[#allocation9] sm:$0xff]   ;;  %v5269_v46 = vld [vmem:[#allocation9 + $0x48] sm:$0xff]   ;;  %v5276_v27 = vld [vmem:[#allocation9 + $0x90] sm:$0xff]  }
  0x94   :  { %985 = vmatprep.mubr.bf16.mxu1 %v4265_v1  ;;  %v232_v40 = vadd.f32 %v231_v37, %v230_v30  ;;  %v5247_v1 = vld [vmem:[#allocation7 + $0x1b0] sm:$0xff]   ;;  %v5268_v20 = vld [vmem:[#allocation9 + $0x80] sm:$0xff]   ;;  %v5270_v21 = vld [vmem:[#allocation9 + $0xc8] sm:$0xff]  }
  0x95   :  { %986 = vmatmul.mubr.bf16.vlgmr.msra.gmra.mrb[0].mxu1 %v4264_v2  ;;  %v281_v42 = vmul.f32 %v248_v24, %v229_v36  ;;  %v285_v43 = vmul.f32 %v4260_v23, %v229_v36  ;;  %v5250_v2 = vld [vmem:[#allocation7 + $0x1f8] sm:$0xff]   ;;  %v5271_v22 = vld [vmem:[#allocation9 + $0x8] sm:$0xff]   ;;  %v5273_v24 = vld [vmem:[#allocation9 + $0x50] sm:$0xff]  }
  0x96   :  { %4773 = vmatpush3.bf16.msra.mxu1 %v5223_v60  ;;  %4757 = vmatpush3.bf16.msra.mxu0 %v5233_v6  ;;  %v286_v50 = vmul.f32 %v249_v31, %v232_v40  ;;  %v5252_v6 = vld [vmem:[#allocation7 + $0x1b8] sm:$0xff]   ;;  %v5272_v23 = vld [vmem:[#allocation9 + $0x88] sm:$0xff]   ;;  %v5283_v36 = vld [vmem:[#allocation9 + $0x20] sm:$0xff]  }
  0x97   :  { %4774 = vmatprep.subr.bf16.mxu1 %v5226_v3  ;;  %4758 = vmatprep.subr.bf16.mxu0 %v5236_v7  ;;  %v282_v45 = vadd.f32 %v281_v42, %v280_v38  ;;  %v5257_v3 = vld [vmem:[#allocation7 + $0x208] sm:$0xff]   ;;  %v5258_v7 = vld [vmem:[#allocation7 + $0x210] sm:$0xff]   ;;  %v5277_v28 = vld [vmem:[#allocation9 + $0x58] sm:$0xff]  }
  0x98   :  { %v287_v54 = vadd.f32 %v286_v50, %v285_v43  ;;  %v5278_v30 = vld [vmem:[#allocation9 + $0xd8] sm:$0xff]   ;;  %v5284_v37 = vld [vmem:[#allocation9 + $0xa0] sm:$0xff]   ;;  %v5285_v38 = vld [vmem:[#allocation9 + $0x68] sm:$0xff]  }
  0x99   :  { %v302_v52 = vld [vmem:[#allocation3 + $0x10] sm:$0xff]  ;;  %v283_v53 = vpack.c.bf16 %v282_v45, %v282_v45  ;;  %v5279_v31 = vld [vmem:[#allocation9 + $0x18] sm:$0xff]   ;;  %v5289_v42 = vld [vmem:[#allocation9 + $0x70] sm:$0xff]  }
  0x9a   :  { %4775 = vmatpush3.bf16.msra.mxu1 %v5227_v12  ;;  %4759 = vmatpush3.bf16.msra.mxu0 %v5237_v25  ;;  %v4267_v56 = vcombine.high %v302_v52, %v302_v52  ;;  %v288_v48 = vpack.c.bf16 %v287_v54, %v287_v54  ;;  %v4266_v62 = vcombine.low %v302_v52, %v302_v52  ;;  %v5260_v12 = vld [vmem:[#allocation7 + $0x220] sm:$0xff]   ;;  %v5274_v25 = vld [vmem:[#allocation9 + $0xd0] sm:$0xff]   ;;  %v5286_v39 = vld [vmem:[#allocation9 + $0xe8] sm:$0xff]  }
  0x9b   :  { %4776 = vmatprep.subr.bf16.mxu1 %v5230_v17  ;;  %4760 = vmatprep.subr.bf16.mxu0 %v5240_v26  ;;  %284 = vst [vmem:[#allocation3 + $0x18] sm:$0xf] %v283_v53  ;;  %v5265_v17 = vld [vmem:[#allocation9 + $0x40] sm:$0xff]   ;;  %v5275_v26 = vld [vmem:[#allocation9 + $0x10] sm:$0xff]   ;;  %v5288_v40 = vld [vmem:[#allocation9 + $0xa8] sm:$0xff]  }
  0x9c   :  { %1025 = vmatprep.mubr.bf16.mxu0 %v4267_v56  ;;  %289 = vst [vmem:[#allocation3 + $0x1c] sm:$0xf] %v288_v48  ;;  %v5290_v43 = vld [vmem:[#allocation9 + $0xf0] sm:$0xff]   ;;  %v5294_v45 = vld [vmem:[#allocation9 + $0xf8] sm:$0xff]   ;;  %v5299_v52 = vld [vmem:[#allocation9 + $0x140] sm:$0xff]  }
  0x9d   :  { %v5509_v60 = vpop.eup %5508  ;;  %v5295_v50 = vld [vmem:[#allocation9 + $0x38] sm:$0xff]   ;;  %v5300_v53 = vld [vmem:[#allocation9 + $0x1c0] sm:$0xff]  }
  0x9e   :  { %4777 = vmatpush3.bf16.msra.mxu1 %v5231_v47  ;;  %4761 = vmatpush3.bf16.msra.mxu0 %v5241_v35  ;;  %v294_v0 = vadd.f32 1.0, %v5509_v60  ;;  %v5280_v47 = vld [vmem:[#allocation9 + $0x98] sm:$0xff]   ;;  %v5282_v35 = vld [vmem:[#allocation9 + $0xe0] sm:$0xff]  }
  0x9f   :  { %4778 = vmatprep.subr.bf16.mxu1 %v5234_v34  ;;  %4762 = vmatprep.subr.bf16.mxu0 %v5244_v29  ;;  %v5281_v34 = vld [vmem:[#allocation9 + $0x60] sm:$0xff]   ;;  %v5287_v29 = vld [vmem:[#allocation9 + $0x28] sm:$0xff]  }
  0xa0   :  { %5510 = vrcp.f32 %v294_v0 }
  0xa2   :  { %4779 = vmatpush3.bf16.msra.mxu1 %v5235_v41  ;;  %4763 = vmatpush3.bf16.msra.mxu0 %v5245_v44  ;;  %v5291_v41 = vld [vmem:[#allocation9 + $0x30] sm:$0xff]   ;;  %v5293_v44 = vld [vmem:[#allocation9 + $0x78] sm:$0xff]  }
  0xa3   :  { %4780 = vmatprep.subr.bf16.mxu1 %v5238_v49  ;;  %4764 = vmatprep.subr.bf16.mxu0 %v5248_v51  ;;  %v303_v4 = vld [vmem:[#allocation3 + $0x18] sm:$0xff]  ;;  %v5296_v51 = vld [vmem:[#allocation9 + $0xb8] sm:$0xff]  }
  0xa4   :  { %v4269_v5 = vcombine.high %v303_v4, %v303_v4  ;;  %v4268_v8 = vcombine.low %v303_v4, %v303_v4  ;;  %v5292_v49 = vld [vmem:[#allocation9 + $0xb0] sm:$0xff]  }
  0xa6   :  { %4781 = vmatpush3.bf16.msra.mxu1 %v5239_v55  ;;  %4765 = vmatpush3.bf16.msra.mxu0 %v5249_v58 }
  0xa7   :  { %4782 = vmatprep.subr.bf16.mxu1 %v5242_v57  ;;  %5094 = vmatprep.subr.bf16.mxu0 %v5675_v33 }
  0xa8   :  { %1065 = vmatprep.mubr.bf16.mxu1 %v4269_v5 }
  0xa9   :  { %1026 = vmatmul.mubr.bf16.vlgmr.msra.gmra.mrb[4].mxu0 %v4266_v62 }
  0xaa   :  { %4783 = vmatpush3.bf16.msra.mxu1 %v5243_v59  ;;  %5095 = vmatpush3.bf16.msra.mxu0 %v5255_v63  ;;  %v5511_v10 = vpop.eup %5510 }
  0xab   :  { %4784 = vmatprep.subr.bf16.mxu1 %v5246_v61  ;;  %5096 = vmatprep.subr.bf16.mxu0 %v5675_v33  ;;  %v297_v11 = vmul.f32 %v5511_v10, %v5780_v32 }
  0xac   :  { %5110 = vmatprep.mubr.msk.bf16.mxu0 %vm5676_vm12, %v5675_v33 }
  0xad   :  { %v298_v13 = vpack.c.bf16 %v297_v11, %v297_v11 }
  0xae   :  { %4785 = vmatpush3.bf16.msra.mxu1 %v5247_v1  ;;  %5097 = vmatpush3.bf16.msra.mxu0 %v5257_v3 }
  0xaf   :  { %4786 = vmatprep.subr.bf16.mxu1 %v5250_v2  ;;  %5098 = vmatprep.subr.bf16.mxu0 %v5675_v33  ;;  %299 = vst [vmem:[#allocation3 + $0x20] sm:$0xf] %v298_v13 }
  0xb2   :  { %4787 = vmatpush3.bf16.msra.mxu1 %v5252_v6  ;;  %5099 = vmatpush3.bf16.msra.mxu0 %v5258_v7 }
  0xb3   :  { %5100 = vmatprep.subr.bf16.mxu0 %v5675_v33  ;;  %4803 = vmatprep.subr.bf16.mxu1 %v5265_v17 }
  0xb5   :  { %1066 = vmatmul.mubr.bf16.vlgmr.msra.gmra.mrb[4].mxu1 %v4268_v8 }
  0xb6   :  { %5101 = vmatpush3.bf16.msra.mxu0 %v5259_v9  ;;  %v5264_v32 = vld [vmem:[#allocation3 + $0x20] ss:$0 sps:$4 sm:$0xff]   ;;  %4804 = vmatpush3.bf16.msra.mxu1 %v5267_v19 }
  0xb7   :  { %5102 = vmatprep.subr.bf16.mxu0 %v5675_v33  ;;  %4805 = vmatprep.subr.bf16.mxu1 %v5269_v46 }
  0xba   :  { %5103 = vmatpush3.bf16.msra.mxu0 %v5260_v12  ;;  %4806 = vmatpush3.bf16.msra.mxu1 %v5271_v22 }
  0xbb   :  { %5104 = vmatprep.subr.bf16.mxu0 %v5675_v33  ;;  %4807 = vmatprep.subr.bf16.mxu1 %v5273_v24 }
  0xbe   :  { %5105 = vmatpush3.bf16.msra.mxu0 %v5261_v14  ;;  %4808 = vmatpush3.bf16.msra.mxu1 %v5275_v26 }
  0xbf   :  { %5106 = vmatprep.subr.bf16.mxu0 %v5675_v33  ;;  %4809 = vmatprep.subr.bf16.mxu1 %v5277_v28 }
  0xc2   :  { %5107 = vmatpush3.bf16.msra.mxu0 %v5262_v15  ;;  %4810 = vmatpush3.bf16.msra.mxu1 %v5279_v31 }
  0xc3   :  { %5108 = vmatprep.subr.bf16.mxu0 %v5675_v33  ;;  %4811 = vmatprep.subr.bf16.mxu1 %v5281_v34 }
  0xc6   :  { %5109 = vmatpush3.bf16.msra.mxu0 %v5263_v16  ;;  %4812 = vmatpush3.bf16.msra.mxu1 %v5283_v36 }
  0xc7   :  { %4825 = vmatprep.subr.bf16.mxu0 %v5266_v18  ;;  %4813 = vmatprep.subr.bf16.mxu1 %v5285_v38 }
  0xc9   :  { %5111 = vmatmul.mubr.bf16.vlgmr.msra.gmra.mrb[8].mxu0 %v5264_v32 }
  0xca   :  { %4826 = vmatpush3.bf16.msra.mxu0 %v5268_v20  ;;  %4814 = vmatpush3.bf16.msra.mxu1 %v5287_v29 }
  0xcb   :  { %4827 = vmatprep.subr.bf16.mxu0 %v5270_v21  ;;  %4815 = vmatprep.subr.bf16.mxu1 %v5289_v42 }
  0xce   :  { %4828 = vmatpush3.bf16.msra.mxu0 %v5272_v23  ;;  %4816 = vmatpush3.bf16.msra.mxu1 %v5291_v41 }
  0xcf   :  { %4829 = vmatprep.subr.bf16.mxu0 %v5274_v25  ;;  %4817 = vmatprep.subr.bf16.mxu1 %v5293_v44 }
  0xd2   :  { %4830 = vmatpush3.bf16.msra.mxu0 %v5276_v27  ;;  %4818 = vmatpush3.bf16.msra.mxu1 %v5295_v50 }
  0xd3   :  { %4831 = vmatprep.subr.bf16.mxu0 %v5278_v30  ;;  %4847 = vmatprep.subr.bf16.mxu1 %v5299_v52 }
  0xd6   :  { %4832 = vmatpush3.bf16.msra.mxu0 %v5280_v47 }
  0xd7   :  { %4833 = vmatprep.subr.bf16.mxu0 %v5282_v35 }
  0xda   :  { %4834 = vmatpush3.bf16.msra.mxu0 %v5284_v37 }
  0xdb   :  { %4835 = vmatprep.subr.bf16.mxu0 %v5286_v39 }
  0xde   :  { %4836 = vmatpush3.bf16.msra.mxu0 %v5288_v40 }
  0xdf   :  { %4837 = vmatprep.subr.bf16.mxu0 %v5290_v43 }
  0xe2   :  { %4838 = vmatpush3.bf16.msra.mxu0 %v5292_v49 }
  0xe3   :  { %4839 = vmatprep.subr.bf16.mxu0 %v5294_v45 }
  0xe6   :  { %4840 = vmatpush3.bf16.msra.mxu0 %v5296_v51 }
  0xe7   :  { %4869 = vmatprep.subr.bf16.mxu0 %v5300_v53 }
 0x15c   :  { %v4722_v54 = vpop.f32.mrb[0].mxu0 }
 0x15d   :  { %v4723_v55 = vpop.f32.mrb[1].mxu0 }
 0x15e   :  { %v4724_v56 = vadd.f32 %v4723_v55, %v4722_v54  ;;  %v4725_v57 = vpop.f32.mrb[2].mxu0 }
 0x15f   :  { %v4726_v58 = vpop.f32.mrb[3].mxu0 }
 0x168   :  { %v4744_v48 = vpop.f32.mrb[0].mxu1 }
 0x169   :  { %v4745_v59 = vpop.f32.mrb[1].mxu1 }
 0x16a   :  { %v4746_v60 = vadd.f32 %v4745_v59, %v4744_v48  ;;  %v4747_v61 = vpop.f32.mrb[2].mxu1 }
 0x16b   :  { %v4748_v62 = vpop.f32.mrb[3].mxu1 }
 0x16c   :  { %v988_v63 = vadd.f32 %v4746_v60, %v4724_v56 }
 0x17c   :  { %v4766_v0 = vpop.f32.mrb[4].mxu0 }
 0x17d   :  { %v4767_v1 = vpop.f32.mrb[5].mxu0 }
 0x17e   :  { %v4768_v2 = vadd.f32 %v4767_v1, %v4766_v0  ;;  %v4769_v3 = vpop.f32.mrb[6].mxu0 }
 0x17f   :  { %v4770_v4 = vpop.f32.mrb[7].mxu0 }
 0x180   :  { %v1028_v5 = vadd.f32 %v4768_v2, %v988_v63 }
 0x188   :  { %v4788_v6 = vpop.f32.mrb[4].mxu1 }
 0x189   :  { %v4789_v7 = vpop.f32.mrb[5].mxu1 }
 0x18a   :  { %v4790_v8 = vadd.f32 %v4789_v7, %v4788_v6  ;;  %v4791_v9 = vpop.f32.mrb[6].mxu1 }
 0x18b   :  { %v4792_v10 = vpop.f32.mrb[7].mxu1 }
 0x18c   :  { %v1068_v11 = vadd.f32 %v4790_v8, %v1028_v5 }
 0x19c   :  { %v1107_v12 = vpop.f32.mrb[8].mxu0 }
 0x19d   :  { %v5885_v13 = vadd.f32 %v1107_v12, %v1068_v11  ;;  %v5112_v14 = vpop.f32.mrb[9].mxu0 }
 0x19e   :  { %v1110_v15 = vpop.f32.mrb[10].mxu0 }
 0x19f   :  { %v5888_v16 = vmul.f32 2.5, %v5885_v13  ;;  %v5891_v32 = vmul.f32 1.25, %v5885_v13  ;;  %v5894_v17 = vmul.f32 0.8333333, %v5885_v13  ;;  %v5113_v18 = vpop.f32.mrb[11].mxu0  ;;  %vm1124_vm13 = vcmp.ge.f32.partialorder %v5885_v13, -1.0 }
 0x1a0   :  { %vm1115_vm14 = vcmp.ge.f32.partialorder %v5885_v13, -2.2  ;;  %vm1118_vm15 = vcmp.ge.f32.partialorder %v5885_v13, -1.8  ;;  %vm1121_vm0 = vcmp.ge.f32.partialorder %v5885_v13, -1.4 }
 0x1a1   :  { %v4343_v19 = vsel %vm1115_vm14, 1.0, %v5675_v33  ;;  %v4344_v20 = vsel %vm1118_vm15, 1.0, %v5675_v33  ;;  %v4345_v46 = vsel %vm1121_vm0, 1.0, %v5675_v33  ;;  %v4346_v21 = vsel %vm1124_vm13, 1.0, %v5675_v33 }
 0x1a2   :  { %vm1127_vm1 = vcmp.ge.f32.partialorder %v5885_v13, -0.6  ;;  %vm1130_vm2 = vcmp.ge.f32.partialorder %v5885_v13, -0.2  ;;  %v1151_v22 = vsub.f32 %v4343_v19, %v4344_v20  ;;  %v1152_v23 = vsub.f32 %v4344_v20, %v4345_v46 }
 0x1a3   :  { %v4347_v24 = vsel %vm1127_vm1, 1.0, %v5675_v33  ;;  %v4348_v25 = vsel %vm1130_vm2, 1.0, %v5675_v33  ;;  %v1153_v26 = vsub.f32 %v4345_v46, %v4346_v21  ;;  %v4355_v27 = vadd.f32 5.5, %v5888_v16 }
 0x1a4   :  { %v1154_v28 = vsub.f32 %v4346_v21, %v4347_v24  ;;  %v1155_v30 = vsub.f32 %v4347_v24, %v4348_v25  ;;  %v4356_v31 = vadd.f32 4.5, %v5888_v16  ;;  %v4357_v47 = vadd.f32 3.5, %v5888_v16 }
 0x1a5   :  { %v4358_v34 = vadd.f32 2.5, %v5888_v16  ;;  %v1173_v35 = vsub.f32 -3.5, %v5888_v16  ;;  %v1174_v36 = vsub.f32 -2.5, %v5888_v16  ;;  %v1175_v37 = vsub.f32 -1.5, %v5888_v16 }
 0x1a6   :  { %v1176_v38 = vsub.f32 -0.5, %v5888_v16  ;;  %v1183_v39 = vmul.f32 %v4355_v27, %v1151_v22  ;;  %v1186_v29 = vmul.f32 %v4356_v31, %v1152_v23  ;;  %v1189_v40 = vmul.f32 %v4357_v47, %v1153_v26 }
 0x1a7   :  { %v1184_v42 = vmul.f32 %v1173_v35, %v1152_v23  ;;  %v1187_v43 = vmul.f32 %v1174_v36, %v1153_v26  ;;  %v1190_v41 = vmul.f32 %v1175_v37, %v1154_v28  ;;  %v1192_v49 = vmul.f32 %v4358_v34, %v1154_v28 }
 0x1a8   :  { %v1193_v44 = vmul.f32 %v1176_v38, %v1155_v30  ;;  %v4365_v45 = vadd.f32 2.75, %v5891_v32  ;;  %v4366_v50 = vadd.f32 2.25, %v5891_v32  ;;  %v4367_v51 = vadd.f32 1.75, %v5891_v32 }
 0x1a9   :  { %v1185_v52 = vadd.f32 %v1184_v42, %v1183_v39  ;;  %v1188_v53 = vadd.f32 %v1187_v43, %v1186_v29  ;;  %v1191_v54 = vadd.f32 %v1190_v41, %v1189_v40  ;;  %v1223_v55 = vsub.f32 -1.25, %v5891_v32 }
 0x1aa   :  { %v1194_v56 = vadd.f32 %v1193_v44, %v1192_v49  ;;  %v1224_v57 = vsub.f32 -0.75, %v5891_v32  ;;  %v1225_v58 = vsub.f32 -0.25, %v5891_v32  ;;  %v4374_v48 = vadd.f32 1.8333334, %v5894_v17 }
 0x1ab   :  { %v1232_v59 = vmul.f32 %v4365_v45, %v1185_v52  ;;  %v1233_v60 = vmul.f32 %v1223_v55, %v1188_v53  ;;  %v1235_v61 = vmul.f32 %v4366_v50, %v1188_v53  ;;  %v1238_v62 = vmul.f32 %v4367_v51, %v1191_v54 }
 0x1ac   :  { %v1236_v63 = vmul.f32 %v1224_v57, %v1191_v54  ;;  %v1239_v0 = vmul.f32 %v1225_v58, %v1194_v56  ;;  %v4375_v1 = vadd.f32 1.5, %v5894_v17  ;;  %v1268_v2 = vsub.f32 -0.5, %v5894_v17 }
 0x1ad   :  { %v1234_v3 = vadd.f32 %v1233_v60, %v1232_v59  ;;  %v1269_v4 = vsub.f32 -0.16666667, %v5894_v17  ;;  %vm1133_vm3 = vcmp.ge.f32.partialorder %v5885_v13, 0.2  ;;  %vm1136_vm4 = vcmp.ge.f32.partialorder %v5885_v13, 0.6 }
 0x1ae   :  { %v1237_v5 = vadd.f32 %v1236_v63, %v1235_v61  ;;  %v1240_v6 = vadd.f32 %v1239_v0, %v1238_v62  ;;  %v4349_v7 = vsel %vm1133_vm3, 1.0, %v5675_v33  ;;  %v4350_v8 = vsel %vm1136_vm4, 1.0, %v5675_v33 }
 0x1af   :  { %v1276_v9 = vmul.f32 %v4374_v48, %v1234_v3  ;;  %v1156_v10 = vsub.f32 %v4348_v25, %v4349_v7  ;;  %v1157_v11 = vsub.f32 %v4349_v7, %v4350_v8  ;;  %v4359_v12 = vadd.f32 1.5, %v5888_v16 }
 0x1b0   :  { %v1277_v14 = vmul.f32 %v1268_v2, %v1237_v5  ;;  %v1281_v15 = vmul.f32 %v4375_v1, %v1237_v5  ;;  %v1282_v18 = vmul.f32 %v1269_v4, %v1240_v6  ;;  %v4360_v19 = vadd.f32 0.5, %v5888_v16 }
 0x1b1   :  { %v1177_v20 = vsub.f32 0.5, %v5888_v16  ;;  %v1178_v46 = vsub.f32 1.5, %v5888_v16  ;;  %v1195_v21 = vmul.f32 %v4359_v12, %v1155_v30  ;;  %v4368_v22 = vadd.f32 1.25, %v5891_v32 }
 0x1b2   :  { %v1278_v23 = vadd.f32 %v1277_v14, %v1276_v9  ;;  %v1283_v24 = vadd.f32 %v1282_v18, %v1281_v15  ;;  %v1198_v26 = vmul.f32 %v4360_v19, %v1156_v10  ;;  %v4369_v25 = vadd.f32 0.75, %v5891_v32 }
 0x1b3   :  { %v1196_v27 = vmul.f32 %v1177_v20, %v1156_v10  ;;  %v1199_v28 = vmul.f32 %v1178_v46, %v1157_v11  ;;  %v1226_v31 = vsub.f32 0.25, %v5891_v32  ;;  %v1227_v47 = vsub.f32 0.75, %v5891_v32  ;;  %v5307_v46 = vld [vmem:[#allocation9 + $0x148] sm:$0xff]  }
 0x1b4   :  { %v1279_v34 = vpack.c.bf16 %v1278_v23, %v1278_v23  ;;  %v1284_v35 = vpack.c.bf16 %v1283_v24, %v1283_v24  ;;  %v1241_v36 = vmul.f32 %v4368_v22, %v1194_v56  ;;  %v4376_v37 = vadd.f32 1.1666666, %v5894_v17 }
 0x1b5   :  { %v1197_v38 = vadd.f32 %v1196_v27, %v1195_v21  ;;  %v1200_v30 = vadd.f32 %v1199_v28, %v1198_v26  ;;  %v4377_v39 = vadd.f32 0.8333333, %v5894_v17  ;;  %v1270_v29 = vsub.f32 0.16666667, %v5894_v17 }
 0x1b6   :  { %1280 = vst [vmem:[#allocation3] sm:$0xf] %v1279_v34  ;;  %1285 = vst [vmem:[#allocation3 + $0x4] sm:$0xf] %v1284_v35  ;;  %v1271_v40 = vsub.f32 0.5, %v5894_v17  ;;  %v1286_v42 = vmul.f32 %v4376_v37, %v1240_v6  ;;  %vm1139_vm5 = vcmp.ge.f32.partialorder %v5885_v13, 1.0 }
 0x1b7   :  { %vm1142_vm6 = vcmp.ge.f32.partialorder %v5885_v13, 1.4  ;;  %v1242_v43 = vmul.f32 %v1226_v31, %v1197_v38  ;;  %v1244_v41 = vmul.f32 %v4369_v25, %v1197_v38  ;;  %v1245_v49 = vmul.f32 %v1227_v47, %v1200_v30  ;;  %v5309_v34 = vld [vmem:[#allocation9 + $0x108] sm:$0xff]  }
 0x1b8   :  { %v4351_v44 = vsel %vm1139_vm5, 1.0, %v5675_v33  ;;  %v4352_v45 = vsel %vm1142_vm6, 1.0, %v5675_v33  ;;  %v4361_v51 = vadd.f32 -0.5, %v5888_v16  ;;  %v4362_v52 = vadd.f32 -1.5, %v5888_v16 }
 0x1b9   :  { %v1158_v50 = vsub.f32 %v4350_v8, %v4351_v44  ;;  %v1243_v53 = vadd.f32 %v1242_v43, %v1241_v36  ;;  %v1246_v54 = vadd.f32 %v1245_v49, %v1244_v41  ;;  %v1159_v55 = vsub.f32 %v4351_v44, %v4352_v45 }
 0x1ba   :  { %v1179_v56 = vsub.f32 2.5, %v5888_v16  ;;  %v1180_v57 = vsub.f32 3.5, %v5888_v16  ;;  %v1201_v58 = vmul.f32 %v4361_v51, %v1157_v11  ;;  %v4370_v59 = vadd.f32 0.25, %v5891_v32  ;;  %v5303_v11 = vld [vmem:[#allocation9 + $0x100] sm:$0xff]  }
 0x1bb   :  { %v1204_v48 = vmul.f32 %v4362_v52, %v1158_v50  ;;  %v1287_v60 = vmul.f32 %v1270_v29, %v1243_v53  ;;  %v1291_v61 = vmul.f32 %v4377_v39, %v1243_v53  ;;  %v1292_v62 = vmul.f32 %v1271_v40, %v1246_v54 }
 0x1bc   :  { %v1202_v63 = vmul.f32 %v1179_v56, %v1158_v50  ;;  %v1205_v0 = vmul.f32 %v1180_v57, %v1159_v55  ;;  %v4371_v1 = vadd.f32 -0.25, %v5891_v32  ;;  %v1228_v2 = vsub.f32 1.25, %v5891_v32 }
 0x1bd   :  { %v1229_v3 = vsub.f32 1.75, %v5891_v32  ;;  %v1326_v4 = vld [vmem:[#allocation3] sm:$0xff]  ;;  %v1288_v5 = vadd.f32 %v1287_v60, %v1286_v42  ;;  %v1293_v6 = vadd.f32 %v1292_v62, %v1291_v61  ;;  %v1247_v8 = vmul.f32 %v4370_v59, %v1200_v30 }
 0x1be   :  { %v1203_v7 = vadd.f32 %v1202_v63, %v1201_v58  ;;  %v4384_v9 = vcombine.high %v1326_v4, %v1326_v4  ;;  %v4383_v10 = vcombine.low %v1326_v4, %v1326_v4  ;;  %v1206_v12 = vadd.f32 %v1205_v0, %v1204_v48  ;;  %v5311_v30 = vld [vmem:[#allocation9 + $0x150] sm:$0xff]   ;;  %v5315_v58 = vld [vmem:[#allocation9 + $0x158] sm:$0xff]   ;;  %v5304_v63 = vld [vmem:[#allocation9 + $0x180] sm:$0xff]  }
 0x1bf   :  { %v4378_v14 = vadd.f32 0.5, %v5894_v17  ;;  %v1289_v15 = vpack.c.bf16 %v1288_v5, %v1288_v5  ;;  %v1294_v18 = vpack.c.bf16 %v1293_v6, %v1293_v6  ;;  %v4379_v22 = vadd.f32 0.16666667, %v5894_v17  ;;  %v5308_v4 = vld [vmem:[#allocation9 + $0x1c8] sm:$0xff]  }
 0x1c0   :  { %v1248_v19 = vmul.f32 %v1228_v2, %v1203_v7  ;;  %v1250_v20 = vmul.f32 %v4371_v1, %v1203_v7  ;;  %1971 = vmatprep.mubr.bf16.mxu1 %v4384_v9  ;;  %v1251_v21 = vmul.f32 %v1229_v3, %v1206_v12  ;;  %v1272_v23 = vsub.f32 0.8333333, %v5894_v17  ;;  %v5319_v7 = vld [vmem:[#allocation9 + $0x160] sm:$0xff]  }
 0x1c1   :  { %v1273_v24 = vsub.f32 1.1666666, %v5894_v17  ;;  %1290 = vst [vmem:[#allocation3 + $0x8] sm:$0xf] %v1289_v15  ;;  %1295 = vst [vmem:[#allocation3 + $0xc] sm:$0xf] %v1294_v18  ;;  %1972 = vmatmul.mubr.bf16.vlgmr.msra.gmra.mrb[8].mxu1 %v4383_v10  ;;  %v1296_v25 = vmul.f32 %v4378_v14, %v1246_v54 }
 0x1c2   :  { %v1249_v26 = vadd.f32 %v1248_v19, %v1247_v8  ;;  %vm1145_vm7 = vcmp.ge.f32.partialorder %v5885_v13, 1.8  ;;  %vm1148_vm8 = vcmp.ge.f32.partialorder %v5885_v13, 2.2  ;;  %4848 = vmatpush3.bf16.msra.mxu1 %v5303_v11  ;;  %v1252_v27 = vadd.f32 %v1251_v21, %v1250_v20  ;;  %v5310_v14 = vld [vmem:[#allocation9 + $0x188] sm:$0xff]   ;;  %v5312_v20 = vld [vmem:[#allocation9 + $0x1d0] sm:$0xff]  }
 0x1c3   :  { %v4353_v28 = vsel %vm1145_vm7, 1.0, %v5675_v33  ;;  %v4354_v31 = vsel %vm1148_vm8, 1.0, %v5675_v33  ;;  %v4363_v47 = vadd.f32 -2.5, %v5888_v16  ;;  %4849 = vmatprep.subr.bf16.mxu1 %v5307_v46  ;;  %v4364_v29 = vadd.f32 -3.5, %v5888_v16  ;;  %v5321_v46 = vld [vmem:[#allocation9 + $0x120] sm:$0xff]   ;;  %v5323_v21 = vld [vmem:[#allocation9 + $0x168] sm:$0xff]  }
 0x1c4   :  { %v1297_v35 = vmul.f32 %v1272_v23, %v1249_v26  ;;  %v1301_v36 = vmul.f32 %v4379_v22, %v1249_v26  ;;  %v1160_v37 = vsub.f32 %v4352_v45, %v4353_v28  ;;  %v1161_v38 = vsub.f32 %v4353_v28, %v4354_v31  ;;  %v5313_v45 = vld [vmem:[#allocation9 + $0x110] sm:$0xff]   ;;  %v5316_v28 = vld [vmem:[#allocation9 + $0x1d8] sm:$0xff]   ;;  %v5325_v31 = vld [vmem:[#allocation9 + $0x128] sm:$0xff]  }
 0x1c5   :  { %v1302_v39 = vmul.f32 %v1273_v24, %v1252_v27  ;;  %v1181_v40 = vsub.f32 4.5, %v5888_v16  ;;  %v1182_v42 = vsub.f32 5.5, %v5888_v16  ;;  %v1207_v41 = vmul.f32 %v4363_v47, %v1159_v55  ;;  %v5314_v26 = vld [vmem:[#allocation9 + $0x190] sm:$0xff]  }
 0x1c6   :  { %v1298_v43 = vadd.f32 %v1297_v35, %v1296_v25  ;;  %v4372_v49 = vadd.f32 -0.75, %v5891_v32  ;;  %v1210_v51 = vmul.f32 %v4364_v29, %v1160_v37  ;;  %4850 = vmatpush3.bf16.msra.mxu1 %v5309_v34  ;;  %v4373_v54 = vadd.f32 -1.25, %v5891_v32  ;;  %v5327_v47 = vld [vmem:[#allocation9 + $0x170] sm:$0xff]   ;;  %v5318_v34 = vld [vmem:[#allocation9 + $0x198] sm:$0xff]   ;;  %v5320_v35 = vld [vmem:[#allocation9 + $0x1e0] sm:$0xff]  }
 0x1c7   :  { %v1303_v44 = vadd.f32 %v1302_v39, %v1301_v36  ;;  %v1208_v50 = vmul.f32 %v1181_v40, %v1160_v37  ;;  %v1211_v52 = vmul.f32 %v1182_v42, %v1161_v38  ;;  %v1230_v56 = vsub.f32 2.25, %v5891_v32  ;;  %4851 = vmatprep.subr.bf16.mxu1 %v5311_v30  ;;  %v5329_v36 = vld [vmem:[#allocation9 + $0x130] sm:$0xff]   ;;  %v5331_v38 = vld [vmem:[#allocation9 + $0x178] sm:$0xff]   ;;  %v5322_v39 = vld [vmem:[#allocation9 + $0x1a0] sm:$0xff]  }
 0x1c8   :  { %v1299_v53 = vpack.c.bf16 %v1298_v43, %v1298_v43  ;;  %v1231_v57 = vsub.f32 2.75, %v5891_v32  ;;  %v1327_v16 = vld [vmem:[#allocation3 + $0x8] sm:$0xff]  ;;  %v1253_v60 = vmul.f32 %v4372_v49, %v1206_v12  ;;  %v4380_v3 = vadd.f32 -0.16666667, %v5894_v17  ;;  %v5324_v29 = vld [vmem:[#allocation9 + $0x1e8] sm:$0xff]   ;;  %v5328_v49 = vld [vmem:[#allocation9 + $0x1f0] sm:$0xff]  }
 0x1c9   :  { %v1304_v48 = vpack.c.bf16 %v1303_v44, %v1303_v44  ;;  %v1209_v55 = vadd.f32 %v1208_v50, %v1207_v41  ;;  %v1212_v59 = vadd.f32 %v1211_v52, %v1210_v51  ;;  %v4386_v61 = vcombine.high %v1327_v16, %v1327_v16  ;;  %v5317_v32 = vld [vmem:[#allocation9 + $0x118] sm:$0xff]   ;;  %v5326_v41 = vld [vmem:[#allocation9 + $0x1a8] sm:$0xff]   ;;  %v5337_v44 = vld [vmem:[#allocation9 + $0x200] sm:$0xff]  }
 0x1ca   :  { %v4385_v62 = vcombine.low %v1327_v16, %v1327_v16  ;;  %1300 = vst [vmem:[#allocation3 + $0x10] sm:$0xf] %v1299_v53  ;;  %4852 = vmatpush3.bf16.msra.mxu1 %v5313_v45  ;;  %v4381_v5 = vadd.f32 -0.5, %v5894_v17  ;;  %v1274_v6 = vsub.f32 1.5, %v5894_v17  ;;  %v4382_v8 = vmul.f32 -1.442695, %v5885_v13 }
 0x1cb   :  { %1305 = vst [vmem:[#allocation3 + $0x14] sm:$0xf] %v1304_v48  ;;  %v1254_v0 = vmul.f32 %v1230_v56, %v1209_v55  ;;  %v1256_v1 = vmul.f32 %v4373_v54, %v1209_v55  ;;  %v1257_v2 = vmul.f32 %v1231_v57, %v1212_v59  ;;  %2011 = vmatprep.mubr.bf16.mxu0 %v4386_v61  ;;  %v1275_v11 = vsub.f32 1.8333334, %v5894_v17  ;;  %v5333_v42 = vld [vmem:[#allocation9 + $0x138] sm:$0xff]   ;;  %v5330_v51 = vld [vmem:[#allocation9 + $0x1b0] sm:$0xff]  }
 0x1cc   :  { %4853 = vmatprep.subr.bf16.mxu1 %v5315_v58  ;;  %2012 = vmatmul.mubr.bf16.vlgmr.msra.gmra.mrb[12].mxu0 %v4385_v62  ;;  %v1306_v12 = vmul.f32 %v4380_v3, %v1252_v27  ;;  %5512 = vpow2.f32 %v4382_v8  ;;  %v5332_v52 = vld [vmem:[#allocation9 + $0x1f8] sm:$0xff]   ;;  %v5338_v45 = vld [vmem:[#allocation9 + $0x208] sm:$0xff]   ;;  %v5339_v57 = vld [vmem:[#allocation9 + $0x210] sm:$0xff]  }
 0x1cd   :  { %v1255_v9 = vadd.f32 %v1254_v0, %v1253_v60  ;;  %v1258_v10 = vadd.f32 %v1257_v2, %v1256_v1  ;;  %4870 = vmatpush3.bf16.msra.mxu0 %v5304_v63  ;;  %v5334_v54 = vld [vmem:[#allocation9 + $0x1b8] sm:$0xff]   ;;  %v5341_v55 = vld [vmem:[#allocation9 + $0x220] sm:$0xff]   ;;  %v5343_v59 = vld [vmem:[#allocation9 + $0x230] sm:$0xff]  }
 0x1ce   :  { %4871 = vmatprep.subr.bf16.mxu0 %v5308_v4  ;;  %4854 = vmatpush3.bf16.msra.mxu1 %v5317_v32  ;;  %v5340_v48 = vld [vmem:[#allocation9 + $0x218] sm:$0xff]   ;;  %v5346_v62 = vld [vmem:[#allocation10 + $0x40] sm:$0xff]   ;;  %v5350_v2 = vld [vmem:[#allocation10 + $0x48] sm:$0xff]  }
 0x1cf   :  { %v1307_v15 = vmul.f32 %v1274_v6, %v1255_v9  ;;  %v1311_v18 = vmul.f32 %v4381_v5, %v1255_v9  ;;  %v1312_v19 = vmul.f32 %v1275_v11, %v1258_v10  ;;  %4855 = vmatprep.subr.bf16.mxu1 %v5319_v7  ;;  %v5344_v60 = vld [vmem:[#allocation9 + $0x238] sm:$0xff]   ;;  %v5347_v63 = vld [vmem:[#allocation10 + $0xc0] sm:$0xff]   ;;  %v5351_v3 = vld [vmem:[#allocation10 + $0xc8] sm:$0xff]  }
 0x1d0   :  { %v5348_v0 = vld [vmem:[#allocation10] sm:$0xff]   ;;  %v5352_v4 = vld [vmem:[#allocation10 + $0x8] sm:$0xff]   ;;  %v5354_v5 = vld [vmem:[#allocation10 + $0x50] sm:$0xff]  }
 0x1d1   :  { %v1308_v22 = vadd.f32 %v1307_v15, %v1306_v12  ;;  %v1313_v23 = vadd.f32 %v1312_v19, %v1311_v18  ;;  %4872 = vmatpush3.bf16.msra.mxu0 %v5310_v14  ;;  %v5349_v1 = vld [vmem:[#allocation10 + $0x80] sm:$0xff]   ;;  %v5353_v32 = vld [vmem:[#allocation10 + $0x88] sm:$0xff]   ;;  %v5355_v6 = vld [vmem:[#allocation10 + $0xd0] sm:$0xff]  }
 0x1d2   :  { %v1328_v24 = vld [vmem:[#allocation3 + $0x10] sm:$0xff]  ;;  %4873 = vmatprep.subr.bf16.mxu0 %v5312_v20  ;;  %4856 = vmatpush3.bf16.msra.mxu1 %v5321_v46  ;;  %v5356_v7 = vld [vmem:[#allocation10 + $0x10] sm:$0xff]   ;;  %v5358_v9 = vld [vmem:[#allocation10 + $0x58] sm:$0xff]  }
 0x1d3   :  { %v4388_v25 = vcombine.high %v1328_v24, %v1328_v24  ;;  %v1309_v17 = vpack.c.bf16 %v1308_v22, %v1308_v22  ;;  %v1314_v27 = vpack.c.bf16 %v1313_v23, %v1313_v23  ;;  %4857 = vmatprep.subr.bf16.mxu1 %v5323_v21  ;;  %v4387_v50 = vcombine.low %v1328_v24, %v1328_v24  ;;  %v5357_v8 = vld [vmem:[#allocation10 + $0x90] sm:$0xff]   ;;  %v5359_v10 = vld [vmem:[#allocation10 + $0xd8] sm:$0xff]   ;;  %v5362_v14 = vld [vmem:[#allocation10 + $0x60] sm:$0xff]  }
 0x1d4   :  { %v5360_v11 = vld [vmem:[#allocation10 + $0x18] sm:$0xff]   ;;  %v5363_v15 = vld [vmem:[#allocation10 + $0xe0] sm:$0xff]   ;;  %v5366_v20 = vld [vmem:[#allocation10 + $0x68] sm:$0xff]  }
 0x1d5   :  { %2051 = vmatprep.mubr.bf16.mxu1 %v4388_v25  ;;  %1310 = vst [vmem:[#allocation3 + $0x18] sm:$0xf] %v1309_v17  ;;  %1315 = vst [vmem:[#allocation3 + $0x1c] sm:$0xf] %v1314_v27  ;;  %4874 = vmatpush3.bf16.msra.mxu0 %v5314_v26  ;;  %v5361_v12 = vld [vmem:[#allocation10 + $0x98] sm:$0xff]   ;;  %v5364_v18 = vld [vmem:[#allocation10 + $0x20] sm:$0xff]  }
 0x1d6   :  { %4875 = vmatprep.subr.bf16.mxu0 %v5316_v28  ;;  %4858 = vmatpush3.bf16.msra.mxu1 %v5325_v31  ;;  %v5513_v37 = vpop.eup %5512  ;;  %v5365_v19 = vld [vmem:[#allocation10 + $0xa0] sm:$0xff]   ;;  %v5367_v46 = vld [vmem:[#allocation10 + $0xe8] sm:$0xff]   ;;  %v5370_v23 = vld [vmem:[#allocation10 + $0x70] sm:$0xff]  }
 0x1d7   :  { %4859 = vmatprep.subr.bf16.mxu1 %v5327_v47  ;;  %v1320_v30 = vadd.f32 1.0, %v5513_v37  ;;  %v5368_v21 = vld [vmem:[#allocation10 + $0x28] sm:$0xff]   ;;  %v5371_v24 = vld [vmem:[#allocation10 + $0xf0] sm:$0xff]   ;;  %v5374_v17 = vld [vmem:[#allocation10 + $0x78] sm:$0xff]  }
 0x1d8   :  { %v5369_v22 = vld [vmem:[#allocation10 + $0xa8] sm:$0xff]   ;;  %v5372_v26 = vld [vmem:[#allocation10 + $0x30] sm:$0xff]   ;;  %v5375_v27 = vld [vmem:[#allocation10 + $0xf8] sm:$0xff]  }
 0x1d9   :  { %4876 = vmatpush3.bf16.msra.mxu0 %v5318_v34  ;;  %5514 = vrcp.f32 %v1320_v30  ;;  %v5373_v25 = vld [vmem:[#allocation10 + $0xb0] sm:$0xff]   ;;  %v5376_v28 = vld [vmem:[#allocation10 + $0x38] sm:$0xff]   ;;  %v5380_v47 = vld [vmem:[#allocation10 + $0x140] sm:$0xff]  }
 0x1da   :  { %4877 = vmatprep.subr.bf16.mxu0 %v5320_v35  ;;  %4860 = vmatpush3.bf16.msra.mxu1 %v5329_v36  ;;  %v5377_v31 = vld [vmem:[#allocation10 + $0xb8] sm:$0xff]   ;;  %v5381_v34 = vld [vmem:[#allocation10 + $0x1c0] sm:$0xff]  }
 0x1db   :  { %4861 = vmatprep.subr.bf16.mxu1 %v5331_v38 }
 0x1dc   :  { %v1329_v40 = vld [vmem:[#allocation3 + $0x18] sm:$0xff] }
 0x1dd   :  { %v4390_v43 = vcombine.high %v1329_v40, %v1329_v40  ;;  %4878 = vmatpush3.bf16.msra.mxu0 %v5322_v39  ;;  %v4389_v16 = vcombine.low %v1329_v40, %v1329_v40 }
 0x1de   :  { %4879 = vmatprep.subr.bf16.mxu0 %v5324_v29  ;;  %4862 = vmatpush3.bf16.msra.mxu1 %v5333_v42 }
 0x1df   :  { %2091 = vmatprep.mubr.bf16.mxu0 %v4390_v43  ;;  %5114 = vmatprep.subr.bf16.mxu1 %v5675_v33 }
 0x1e1   :  { %4880 = vmatpush3.bf16.msra.mxu0 %v5326_v41  ;;  %2052 = vmatmul.mubr.bf16.vlgmr.msra.gmra.mrb[12].mxu1 %v4387_v50 }
 0x1e2   :  { %4881 = vmatprep.subr.bf16.mxu0 %v5328_v49  ;;  %5115 = vmatpush3.bf16.msra.mxu1 %v5337_v44 }
 0x1e3   :  { %5130 = vmatprep.mubr.msk.bf16.mxu1 %vm5676_vm12, %v5675_v33  ;;  %v5515_v53 = vpop.eup %5514  ;;  %5116 = vmatprep.subr.bf16.mxu1 %v5675_v33 }
 0x1e4   :  { %v1323_v56 = vmul.f32 %v5515_v53, %v5885_v13  ;;  %v5342_v13 = vld [vmem:[#allocation9 + $0x228] sm:$0xff]  }
 0x1e5   :  { %4882 = vmatpush3.bf16.msra.mxu0 %v5330_v51 }
 0x1e6   :  { %4883 = vmatprep.subr.bf16.mxu0 %v5332_v52  ;;  %5117 = vmatpush3.bf16.msra.mxu1 %v5338_v45  ;;  %v1324_v58 = vpack.c.bf16 %v1323_v56, %v1323_v56 }
 0x1e7   :  { %5118 = vmatprep.subr.bf16.mxu1 %v5675_v33 }
 0x1e8   :  { %1325 = vst [vmem:[#allocation3 + $0x20] sm:$0xf] %v1324_v58 }
 0x1e9   :  { %4884 = vmatpush3.bf16.msra.mxu0 %v5334_v54 }
 0x1ea   :  { %5119 = vmatpush3.bf16.msra.mxu1 %v5339_v57  ;;  %4900 = vmatprep.subr.bf16.mxu0 %v5346_v62 }
 0x1eb   :  { %5120 = vmatprep.subr.bf16.mxu1 %v5675_v33 }
 0x1ec   :  { %2092 = vmatmul.mubr.bf16.vlgmr.msra.gmra.mrb[16].mxu0 %v4389_v16 }
 0x1ed   :  { %4901 = vmatpush3.bf16.msra.mxu0 %v5348_v0 }
 0x1ee   :  { %5121 = vmatpush3.bf16.msra.mxu1 %v5340_v48  ;;  %4902 = vmatprep.subr.bf16.mxu0 %v5350_v2 }
 0x1ef   :  { %5122 = vmatprep.subr.bf16.mxu1 %v5675_v33  ;;  %v5345_v61 = vld [vmem:[#allocation3 + $0x20] ss:$0 sps:$4 sm:$0xff]  }
 0x1f1   :  { %4903 = vmatpush3.bf16.msra.mxu0 %v5352_v4 }
 0x1f2   :  { %5123 = vmatpush3.bf16.msra.mxu1 %v5341_v55  ;;  %4904 = vmatprep.subr.bf16.mxu0 %v5354_v5 }
 0x1f3   :  { %5124 = vmatprep.subr.bf16.mxu1 %v5675_v33 }
 0x1f5   :  { %4905 = vmatpush3.bf16.msra.mxu0 %v5356_v7 }
 0x1f6   :  { %5125 = vmatpush3.bf16.msra.mxu1 %v5342_v13  ;;  %4906 = vmatprep.subr.bf16.mxu0 %v5358_v9 }
 0x1f7   :  { %5126 = vmatprep.subr.bf16.mxu1 %v5675_v33 }
 0x1f9   :  { %4907 = vmatpush3.bf16.msra.mxu0 %v5360_v11 }
 0x1fa   :  { %5127 = vmatpush3.bf16.msra.mxu1 %v5343_v59  ;;  %4908 = vmatprep.subr.bf16.mxu0 %v5362_v14 }
 0x1fb   :  { %5128 = vmatprep.subr.bf16.mxu1 %v5675_v33 }
 0x1fd   :  { %4909 = vmatpush3.bf16.msra.mxu0 %v5364_v18 }
 0x1fe   :  { %5129 = vmatpush3.bf16.msra.mxu1 %v5344_v60  ;;  %4910 = vmatprep.subr.bf16.mxu0 %v5366_v20 }
 0x1ff   :  { %4922 = vmatprep.subr.bf16.mxu1 %v5347_v63 }
 0x201   :  { %5131 = vmatmul.mubr.bf16.vlgmr.msra.gmra.mrb[16].mxu1 %v5345_v61  ;;  %4911 = vmatpush3.bf16.msra.mxu0 %v5368_v21 }
 0x202   :  { %4923 = vmatpush3.bf16.msra.mxu1 %v5349_v1  ;;  %4912 = vmatprep.subr.bf16.mxu0 %v5370_v23 }
 0x203   :  { %4924 = vmatprep.subr.bf16.mxu1 %v5351_v3 }
 0x205   :  { %4913 = vmatpush3.bf16.msra.mxu0 %v5372_v26 }
 0x206   :  { %4925 = vmatpush3.bf16.msra.mxu1 %v5353_v32  ;;  %4914 = vmatprep.subr.bf16.mxu0 %v5374_v17 }
 0x207   :  { %4926 = vmatprep.subr.bf16.mxu1 %v5355_v6 }
 0x209   :  { %4915 = vmatpush3.bf16.msra.mxu0 %v5376_v28 }
 0x20a   :  { %4927 = vmatpush3.bf16.msra.mxu1 %v5357_v8  ;;  %4944 = vmatprep.subr.bf16.mxu0 %v5380_v47 }
 0x20b   :  { %4928 = vmatprep.subr.bf16.mxu1 %v5359_v10 }
 0x20e   :  { %4929 = vmatpush3.bf16.msra.mxu1 %v5361_v12 }
 0x20f   :  { %4930 = vmatprep.subr.bf16.mxu1 %v5363_v15 }
 0x212   :  { %4931 = vmatpush3.bf16.msra.mxu1 %v5365_v19 }
 0x213   :  { %4932 = vmatprep.subr.bf16.mxu1 %v5367_v46 }
 0x216   :  { %4933 = vmatpush3.bf16.msra.mxu1 %v5369_v22 }
 0x217   :  { %4934 = vmatprep.subr.bf16.mxu1 %v5371_v24 }
 0x21a   :  { %4935 = vmatpush3.bf16.msra.mxu1 %v5373_v25 }
 0x21b   :  { %4936 = vmatprep.subr.bf16.mxu1 %v5375_v27 }
 0x21e   :  { %4937 = vmatpush3.bf16.msra.mxu1 %v5377_v31 }
 0x21f   :  { %4966 = vmatprep.subr.bf16.mxu1 %v5381_v34 }
 0x294   :  { %v4819_v35 = vpop.f32.mrb[8].mxu1 }
 0x295   :  { %v4820_v36 = vpop.f32.mrb[9].mxu1 }
 0x296   :  { %v4821_v37 = vadd.f32 %v4820_v36, %v4819_v35  ;;  %v4822_v38 = vpop.f32.mrb[10].mxu1 }
 0x297   :  { %v4823_v30 = vpop.f32.mrb[11].mxu1 }
 0x29f   :  { %v4841_v39 = vpop.f32.mrb[12].mxu0 }
 0x2a0   :  { %v4842_v29 = vpop.f32.mrb[13].mxu0 }
 0x2a1   :  { %v4843_v40 = vadd.f32 %v4842_v29, %v4841_v39  ;;  %v4844_v42 = vpop.f32.mrb[14].mxu0 }
 0x2a2   :  { %v4845_v43 = vpop.f32.mrb[15].mxu0 }
 0x2a3   :  { %v2014_v41 = vadd.f32 %v4843_v40, %v4821_v37 }
 0x2b4   :  { %v4863_v49 = vpop.f32.mrb[12].mxu1 }
 0x2b5   :  { %v4864_v44 = vpop.f32.mrb[13].mxu1 }
 0x2b6   :  { %v4865_v50 = vadd.f32 %v4864_v44, %v4863_v49  ;;  %v4866_v51 = vpop.f32.mrb[14].mxu1 }
 0x2b7   :  { %v4867_v52 = vpop.f32.mrb[15].mxu1 }
 0x2b8   :  { %v2054_v45 = vadd.f32 %v4865_v50, %v2014_v41 }
 0x2bf   :  { %v4885_v53 = vpop.f32.mrb[16].mxu0 }
 0x2c0   :  { %v4886_v54 = vpop.f32.mrb[17].mxu0 }
 0x2c1   :  { %v4887_v56 = vadd.f32 %v4886_v54, %v4885_v53  ;;  %v4888_v57 = vpop.f32.mrb[18].mxu0 }
 0x2c2   :  { %v4889_v58 = vpop.f32.mrb[19].mxu0 }
 0x2c3   :  { %v2094_v16 = vadd.f32 %v4887_v56, %v2054_v45 }
 0x2d4   :  { %v2133_v48 = vpop.f32.mrb[16].mxu1 }
 0x2d5   :  { %v5986_v55 = vadd.f32 %v2133_v48, %v2094_v16  ;;  %v5132_v13 = vpop.f32.mrb[17].mxu1 }
 0x2d6   :  { %v2136_v59 = vpop.f32.mrb[18].mxu1 }
 0x2d7   :  { %v5989_v60 = vmul.f32 2.5, %v5986_v55  ;;  %v5992_v61 = vmul.f32 1.25, %v5986_v55  ;;  %v5995_v62 = vmul.f32 0.8333333, %v5986_v55  ;;  %v5133_v63 = vpop.f32.mrb[19].mxu1  ;;  %vm2150_vm9 = vcmp.ge.f32.partialorder %v5986_v55, -1.0 }
 0x2d8   :  { %vm2141_vm10 = vcmp.ge.f32.partialorder %v5986_v55, -2.2  ;;  %vm2144_vm11 = vcmp.ge.f32.partialorder %v5986_v55, -1.8  ;;  %vm2147_vm13 = vcmp.ge.f32.partialorder %v5986_v55, -1.4 }
 0x2d9   :  { %v4464_v0 = vsel %vm2141_vm10, 1.0, %v5675_v33  ;;  %v4465_v1 = vsel %vm2144_vm11, 1.0, %v5675_v33  ;;  %v4466_v2 = vsel %vm2147_vm13, 1.0, %v5675_v33  ;;  %v4467_v3 = vsel %vm2150_vm9, 1.0, %v5675_v33 }
 0x2da   :  { %vm2153_vm14 = vcmp.ge.f32.partialorder %v5986_v55, -0.6  ;;  %vm2156_vm15 = vcmp.ge.f32.partialorder %v5986_v55, -0.2  ;;  %v2177_v4 = vsub.f32 %v4464_v0, %v4465_v1  ;;  %v2178_v32 = vsub.f32 %v4465_v1, %v4466_v2 }
 0x2db   :  { %v4468_v5 = vsel %vm2153_vm14, 1.0, %v5675_v33  ;;  %v4469_v6 = vsel %vm2156_vm15, 1.0, %v5675_v33  ;;  %v2179_v7 = vsub.f32 %v4466_v2, %v4467_v3  ;;  %v4476_v8 = vadd.f32 5.5, %v5989_v60 }
 0x2dc   :  { %v2180_v9 = vsub.f32 %v4467_v3, %v4468_v5  ;;  %v2181_v10 = vsub.f32 %v4468_v5, %v4469_v6  ;;  %v4477_v11 = vadd.f32 4.5, %v5989_v60  ;;  %v4478_v12 = vadd.f32 3.5, %v5989_v60 }
 0x2dd   :  { %v4479_v14 = vadd.f32 2.5, %v5989_v60  ;;  %v2199_v15 = vsub.f32 -3.5, %v5989_v60  ;;  %v2200_v18 = vsub.f32 -2.5, %v5989_v60  ;;  %v2201_v19 = vsub.f32 -1.5, %v5989_v60 }
 0x2de   :  { %v2202_v20 = vsub.f32 -0.5, %v5989_v60  ;;  %v2209_v46 = vmul.f32 %v4476_v8, %v2177_v4  ;;  %v2212_v21 = vmul.f32 %v4477_v11, %v2178_v32  ;;  %v2215_v22 = vmul.f32 %v4478_v12, %v2179_v7 }
 0x2df   :  { %v2210_v23 = vmul.f32 %v2199_v15, %v2178_v32  ;;  %v2213_v24 = vmul.f32 %v2200_v18, %v2179_v7  ;;  %v2216_v26 = vmul.f32 %v2201_v19, %v2180_v9  ;;  %v2218_v25 = vmul.f32 %v4479_v14, %v2180_v9 }
 0x2e0   :  { %v2219_v17 = vmul.f32 %v2202_v20, %v2181_v10  ;;  %v4486_v27 = vadd.f32 2.75, %v5992_v61  ;;  %v4487_v28 = vadd.f32 2.25, %v5992_v61  ;;  %v4488_v31 = vadd.f32 1.75, %v5992_v61 }
 0x2e1   :  { %v2211_v47 = vadd.f32 %v2210_v23, %v2209_v46  ;;  %v2214_v34 = vadd.f32 %v2213_v24, %v2212_v21  ;;  %v2217_v35 = vadd.f32 %v2216_v26, %v2215_v22  ;;  %v2249_v36 = vsub.f32 -1.25, %v5992_v61 }
 0x2e2   :  { %v2220_v37 = vadd.f32 %v2219_v17, %v2218_v25  ;;  %v2250_v38 = vsub.f32 -0.75, %v5992_v61  ;;  %v2251_v30 = vsub.f32 -0.25, %v5992_v61  ;;  %v4495_v39 = vadd.f32 1.8333334, %v5995_v62 }
 0x2e3   :  { %v2258_v29 = vmul.f32 %v4486_v27, %v2211_v47  ;;  %v2259_v40 = vmul.f32 %v2249_v36, %v2214_v34  ;;  %v2261_v42 = vmul.f32 %v4487_v28, %v2214_v34  ;;  %v2264_v43 = vmul.f32 %v4488_v31, %v2217_v35 }
 0x2e4   :  { %v2262_v41 = vmul.f32 %v2250_v38, %v2217_v35  ;;  %v2265_v49 = vmul.f32 %v2251_v30, %v2220_v37  ;;  %v4496_v44 = vadd.f32 1.5, %v5995_v62  ;;  %v2294_v50 = vsub.f32 -0.5, %v5995_v62 }
 0x2e5   :  { %v2260_v51 = vadd.f32 %v2259_v40, %v2258_v29  ;;  %v2295_v52 = vsub.f32 -0.16666667, %v5995_v62  ;;  %vm2159_vm0 = vcmp.ge.f32.partialorder %v5986_v55, 0.2  ;;  %vm2162_vm1 = vcmp.ge.f32.partialorder %v5986_v55, 0.6 }
 0x2e6   :  { %v2263_v45 = vadd.f32 %v2262_v41, %v2261_v42  ;;  %v2266_v53 = vadd.f32 %v2265_v49, %v2264_v43  ;;  %v4470_v54 = vsel %vm2159_vm0, 1.0, %v5675_v33  ;;  %v4471_v56 = vsel %vm2162_vm1, 1.0, %v5675_v33 }
 0x2e7   :  { %v2302_v57 = vmul.f32 %v4495_v39, %v2260_v51  ;;  %v2182_v58 = vsub.f32 %v4469_v6, %v4470_v54  ;;  %v2183_v16 = vsub.f32 %v4470_v54, %v4471_v56  ;;  %v4480_v48 = vadd.f32 1.5, %v5989_v60 }
 0x2e8   :  { %v2303_v13 = vmul.f32 %v2294_v50, %v2263_v45  ;;  %v2307_v59 = vmul.f32 %v4496_v44, %v2263_v45  ;;  %v2308_v63 = vmul.f32 %v2295_v52, %v2266_v53  ;;  %v4481_v0 = vadd.f32 0.5, %v5989_v60 }
 0x2e9   :  { %v2203_v1 = vsub.f32 0.5, %v5989_v60  ;;  %v2204_v2 = vsub.f32 1.5, %v5989_v60  ;;  %v2221_v3 = vmul.f32 %v4480_v48, %v2181_v10  ;;  %v4489_v4 = vadd.f32 1.25, %v5992_v61 }
 0x2ea   :  { %v2304_v32 = vadd.f32 %v2303_v13, %v2302_v57  ;;  %v2309_v5 = vadd.f32 %v2308_v63, %v2307_v59  ;;  %v2224_v7 = vmul.f32 %v4481_v0, %v2182_v58  ;;  %v4490_v6 = vadd.f32 0.75, %v5992_v61 }
 0x2eb   :  { %v2222_v8 = vmul.f32 %v2203_v1, %v2182_v58  ;;  %v2225_v9 = vmul.f32 %v2204_v2, %v2183_v16  ;;  %v2252_v11 = vsub.f32 0.25, %v5992_v61  ;;  %v2253_v12 = vsub.f32 0.75, %v5992_v61  ;;  %v5388_v2 = vld [vmem:[#allocation10 + $0x148] sm:$0xff]  }
 0x2ec   :  { %v2305_v14 = vpack.c.bf16 %v2304_v32, %v2304_v32  ;;  %v2310_v15 = vpack.c.bf16 %v2309_v5, %v2309_v5  ;;  %v2267_v18 = vmul.f32 %v4489_v4, %v2220_v37  ;;  %v4497_v19 = vadd.f32 1.1666666, %v5995_v62 }
 0x2ed   :  { %v2223_v20 = vadd.f32 %v2222_v8, %v2221_v3  ;;  %v2226_v10 = vadd.f32 %v2225_v9, %v2224_v7  ;;  %v4498_v46 = vadd.f32 0.8333333, %v5995_v62  ;;  %v2296_v21 = vsub.f32 0.16666667, %v5995_v62 }
 0x2ee   :  { %2306 = vst [vmem:[#allocation3] sm:$0xf] %v2305_v14  ;;  %2311 = vst [vmem:[#allocation3 + $0x4] sm:$0xf] %v2310_v15  ;;  %v2297_v22 = vsub.f32 0.5, %v5995_v62  ;;  %v2312_v23 = vmul.f32 %v4497_v19, %v2266_v53  ;;  %vm2165_vm2 = vcmp.ge.f32.partialorder %v5986_v55, 1.0 }
 0x2ef   :  { %vm2168_vm3 = vcmp.ge.f32.partialorder %v5986_v55, 1.4  ;;  %v2268_v24 = vmul.f32 %v2252_v11, %v2223_v20  ;;  %v2270_v26 = vmul.f32 %v4490_v6, %v2223_v20  ;;  %v2271_v25 = vmul.f32 %v2253_v12, %v2226_v10  ;;  %v5390_v14 = vld [vmem:[#allocation10 + $0x108] sm:$0xff]  }
 0x2f0   :  { %v4472_v17 = vsel %vm2165_vm2, 1.0, %v5675_v33  ;;  %v4473_v27 = vsel %vm2168_vm3, 1.0, %v5675_v33  ;;  %v4482_v31 = vadd.f32 -0.5, %v5989_v60  ;;  %v4483_v47 = vadd.f32 -1.5, %v5989_v60 }
 0x2f1   :  { %v2184_v28 = vsub.f32 %v4471_v56, %v4472_v17  ;;  %v2269_v34 = vadd.f32 %v2268_v24, %v2267_v18  ;;  %v2272_v35 = vadd.f32 %v2271_v25, %v2270_v26  ;;  %v2185_v36 = vsub.f32 %v4472_v17, %v4473_v27 }
 0x2f2   :  { %v2205_v37 = vsub.f32 2.5, %v5989_v60  ;;  %v2206_v38 = vsub.f32 3.5, %v5989_v60  ;;  %v2227_v30 = vmul.f32 %v4482_v31, %v2183_v16  ;;  %v4491_v29 = vadd.f32 0.25, %v5992_v61  ;;  %v5384_v16 = vld [vmem:[#allocation10 + $0x100] sm:$0xff]  }
 0x2f3   :  { %v2230_v39 = vmul.f32 %v4483_v47, %v2184_v28  ;;  %v2313_v40 = vmul.f32 %v2296_v21, %v2269_v34  ;;  %v2317_v42 = vmul.f32 %v4498_v46, %v2269_v34  ;;  %v2318_v43 = vmul.f32 %v2297_v22, %v2272_v35 }
 0x2f4   :  { %v2228_v41 = vmul.f32 %v2205_v37, %v2184_v28  ;;  %v2231_v49 = vmul.f32 %v2206_v38, %v2185_v36  ;;  %v4492_v44 = vadd.f32 -0.25, %v5992_v61  ;;  %v2254_v50 = vsub.f32 1.25, %v5992_v61 }
 0x2f5   :  { %v2255_v51 = vsub.f32 1.75, %v5992_v61  ;;  %v2352_v52 = vld [vmem:[#allocation3] sm:$0xff]  ;;  %v2314_v45 = vadd.f32 %v2313_v40, %v2312_v23  ;;  %v2319_v53 = vadd.f32 %v2318_v43, %v2317_v42  ;;  %v2273_v56 = vmul.f32 %v4491_v29, %v2226_v10 }
 0x2f6   :  { %v2229_v54 = vadd.f32 %v2228_v41, %v2227_v30  ;;  %v4505_v57 = vcombine.high %v2352_v52, %v2352_v52  ;;  %v4504_v58 = vcombine.low %v2352_v52, %v2352_v52  ;;  %v2232_v48 = vadd.f32 %v2231_v49, %v2230_v39  ;;  %v5392_v10 = vld [vmem:[#allocation10 + $0x150] sm:$0xff]   ;;  %v5396_v30 = vld [vmem:[#allocation10 + $0x158] sm:$0xff]   ;;  %v5385_v41 = vld [vmem:[#allocation10 + $0x180] sm:$0xff]  }
 0x2f7   :  { %v4499_v13 = vadd.f32 0.5, %v5995_v62  ;;  %v2315_v59 = vpack.c.bf16 %v2314_v45, %v2314_v45  ;;  %v2320_v63 = vpack.c.bf16 %v2319_v53, %v2319_v53  ;;  %v4500_v4 = vadd.f32 0.16666667, %v5995_v62  ;;  %v5389_v52 = vld [vmem:[#allocation10 + $0x1c8] sm:$0xff]  }
 0x2f8   :  { %v2274_v0 = vmul.f32 %v2254_v50, %v2229_v54  ;;  %v2276_v1 = vmul.f32 %v4492_v44, %v2229_v54  ;;  %2997 = vmatprep.mubr.bf16.mxu0 %v4505_v57  ;;  %v2277_v3 = vmul.f32 %v2255_v51, %v2232_v48  ;;  %v2298_v32 = vsub.f32 0.8333333, %v5995_v62  ;;  %v5400_v54 = vld [vmem:[#allocation10 + $0x160] sm:$0xff]  }
 0x2f9   :  { %v2299_v5 = vsub.f32 1.1666666, %v5995_v62  ;;  %2316 = vst [vmem:[#allocation3 + $0x8] sm:$0xf] %v2315_v59  ;;  %2321 = vst [vmem:[#allocation3 + $0xc] sm:$0xf] %v2320_v63  ;;  %2998 = vmatmul.mubr.bf16.vlgmr.msra.gmra.mrb[20].mxu0 %v4504_v58  ;;  %v2322_v6 = vmul.f32 %v4499_v13, %v2272_v35 }
 0x2fa   :  { %v2275_v7 = vadd.f32 %v2274_v0, %v2273_v56  ;;  %vm2171_vm4 = vcmp.ge.f32.partialorder %v5986_v55, 1.8  ;;  %vm2174_vm5 = vcmp.ge.f32.partialorder %v5986_v55, 2.2  ;;  %4945 = vmatpush3.bf16.msra.mxu0 %v5384_v16  ;;  %v2278_v8 = vadd.f32 %v2277_v3, %v2276_v1  ;;  %v5391_v13 = vld [vmem:[#allocation10 + $0x188] sm:$0xff]   ;;  %v5393_v1 = vld [vmem:[#allocation10 + $0x1d0] sm:$0xff]  }
 0x2fb   :  { %v4474_v9 = vsel %vm2171_vm4, 1.0, %v5675_v33  ;;  %v4475_v11 = vsel %vm2174_vm5, 1.0, %v5675_v33  ;;  %v4484_v12 = vadd.f32 -2.5, %v5989_v60  ;;  %4946 = vmatprep.subr.bf16.mxu0 %v5388_v2  ;;  %v4485_v21 = vadd.f32 -3.5, %v5989_v60  ;;  %v5402_v2 = vld [vmem:[#allocation10 + $0x120] sm:$0xff]   ;;  %v5404_v3 = vld [vmem:[#allocation10 + $0x168] sm:$0xff]  }
 0x2fc   :  { %v2323_v15 = vmul.f32 %v2298_v32, %v2275_v7  ;;  %v2327_v18 = vmul.f32 %v4500_v4, %v2275_v7  ;;  %v2186_v19 = vsub.f32 %v4473_v27, %v4474_v9  ;;  %v2187_v20 = vsub.f32 %v4474_v9, %v4475_v11  ;;  %v5394_v27 = vld [vmem:[#allocation10 + $0x110] sm:$0xff]   ;;  %v5397_v9 = vld [vmem:[#allocation10 + $0x1d8] sm:$0xff]   ;;  %v5406_v11 = vld [vmem:[#allocation10 + $0x128] sm:$0xff]  }
 0x2fd   :  { %v2328_v46 = vmul.f32 %v2299_v5, %v2278_v8  ;;  %v2207_v22 = vsub.f32 4.5, %v5989_v60  ;;  %v2208_v23 = vsub.f32 5.5, %v5989_v60  ;;  %v2233_v26 = vmul.f32 %v4484_v12, %v2185_v36  ;;  %v5395_v7 = vld [vmem:[#allocation10 + $0x190] sm:$0xff]  }
 0x2fe   :  { %v2324_v24 = vadd.f32 %v2323_v15, %v2322_v6  ;;  %v4493_v25 = vadd.f32 -0.75, %v5992_v61  ;;  %v2236_v31 = vmul.f32 %v4485_v21, %v2186_v19  ;;  %4947 = vmatpush3.bf16.msra.mxu0 %v5390_v14  ;;  %v4494_v35 = vadd.f32 -1.25, %v5992_v61  ;;  %v5408_v12 = vld [vmem:[#allocation10 + $0x170] sm:$0xff]   ;;  %v5399_v14 = vld [vmem:[#allocation10 + $0x198] sm:$0xff]   ;;  %v5401_v15 = vld [vmem:[#allocation10 + $0x1e0] sm:$0xff]  }
 0x2ff   :  { %v2329_v17 = vadd.f32 %v2328_v46, %v2327_v18  ;;  %v2234_v28 = vmul.f32 %v2207_v22, %v2186_v19  ;;  %v2237_v47 = vmul.f32 %v2208_v23, %v2187_v20  ;;  %v2256_v37 = vsub.f32 2.25, %v5992_v61  ;;  %4948 = vmatprep.subr.bf16.mxu0 %v5392_v10  ;;  %v5410_v18 = vld [vmem:[#allocation10 + $0x130] sm:$0xff]   ;;  %v5412_v20 = vld [vmem:[#allocation10 + $0x178] sm:$0xff]   ;;  %v5403_v46 = vld [vmem:[#allocation10 + $0x1a0] sm:$0xff]  }
 0x300   :  { %v2325_v34 = vpack.c.bf16 %v2324_v24, %v2324_v24  ;;  %v2257_v38 = vsub.f32 2.75, %v5992_v61  ;;  %v2353_v60 = vld [vmem:[#allocation3 + $0x8] sm:$0xff]  ;;  %v2279_v40 = vmul.f32 %v4493_v25, %v2232_v48  ;;  %v4501_v51 = vadd.f32 -0.16666667, %v5995_v62  ;;  %v5405_v21 = vld [vmem:[#allocation10 + $0x1e8] sm:$0xff]   ;;  %v5409_v25 = vld [vmem:[#allocation10 + $0x1f0] sm:$0xff]  }
 0x301   :  { %v2330_v39 = vpack.c.bf16 %v2329_v17, %v2329_v17  ;;  %v2235_v36 = vadd.f32 %v2234_v28, %v2233_v26  ;;  %v2238_v29 = vadd.f32 %v2237_v47, %v2236_v31  ;;  %v4507_v42 = vcombine.high %v2353_v60, %v2353_v60  ;;  %v5398_v61 = vld [vmem:[#allocation10 + $0x118] sm:$0xff]   ;;  %v5407_v26 = vld [vmem:[#allocation10 + $0x1a8] sm:$0xff]   ;;  %v5418_v17 = vld [vmem:[#allocation10 + $0x200] sm:$0xff]  }
 0x302   :  { %v4506_v43 = vcombine.low %v2353_v60, %v2353_v60  ;;  %2326 = vst [vmem:[#allocation3 + $0x10] sm:$0xf] %v2325_v34  ;;  %4949 = vmatpush3.bf16.msra.mxu0 %v5394_v27  ;;  %v4502_v45 = vadd.f32 -0.5, %v5995_v62  ;;  %v2300_v53 = vsub.f32 1.5, %v5995_v62  ;;  %v4503_v56 = vmul.f32 -1.442695, %v5986_v55 }
 0x303   :  { %2331 = vst [vmem:[#allocation3 + $0x14] sm:$0xf] %v2330_v39  ;;  %v2280_v49 = vmul.f32 %v2256_v37, %v2235_v36  ;;  %v2282_v44 = vmul.f32 %v4494_v35, %v2235_v36  ;;  %v2283_v50 = vmul.f32 %v2257_v38, %v2238_v29  ;;  %3037 = vmatprep.mubr.bf16.mxu1 %v4507_v42  ;;  %v2301_v16 = vsub.f32 1.8333334, %v5995_v62  ;;  %v5414_v23 = vld [vmem:[#allocation10 + $0x138] sm:$0xff]   ;;  %v5411_v31 = vld [vmem:[#allocation10 + $0x1b0] sm:$0xff]  }
 0x304   :  { %4950 = vmatprep.subr.bf16.mxu0 %v5396_v30  ;;  %3038 = vmatmul.mubr.bf16.vlgmr.msra.gmra.mrb[20].mxu1 %v4506_v43  ;;  %v2332_v48 = vmul.f32 %v4501_v51, %v2278_v8  ;;  %5516 = vpow2.f32 %v4503_v56  ;;  %v5413_v47 = vld [vmem:[#allocation10 + $0x1f8] sm:$0xff]   ;;  %v5419_v27 = vld [vmem:[#allocation10 + $0x208] sm:$0xff]   ;;  %v5420_v38 = vld [vmem:[#allocation10 + $0x210] sm:$0xff]  }
 0x305   :  { %v2281_v57 = vadd.f32 %v2280_v49, %v2279_v40  ;;  %v2284_v58 = vadd.f32 %v2283_v50, %v2282_v44  ;;  %4967 = vmatpush3.bf16.msra.mxu1 %v5385_v41  ;;  %v5415_v35 = vld [vmem:[#allocation10 + $0x1b8] sm:$0xff]   ;;  %v5422_v36 = vld [vmem:[#allocation10 + $0x220] sm:$0xff]   ;;  %v5424_v29 = vld [vmem:[#allocation10 + $0x230] sm:$0xff]  }
 0x306   :  { %4968 = vmatprep.subr.bf16.mxu1 %v5389_v52  ;;  %4951 = vmatpush3.bf16.msra.mxu0 %v5398_v61  ;;  %v5421_v39 = vld [vmem:[#allocation10 + $0x218] sm:$0xff]   ;;  %v5427_v43 = vld [vmem:[#allocation12 + $0x40] sm:$0xff]   ;;  %v5431_v50 = vld [vmem:[#allocation12 + $0x48] sm:$0xff]  }
 0x307   :  { %v2333_v59 = vmul.f32 %v2300_v53, %v2281_v57  ;;  %v2337_v63 = vmul.f32 %v4502_v45, %v2281_v57  ;;  %v2338_v0 = vmul.f32 %v2301_v16, %v2284_v58  ;;  %4952 = vmatprep.subr.bf16.mxu0 %v5400_v54  ;;  %v5425_v40 = vld [vmem:[#allocation10 + $0x238] sm:$0xff]   ;;  %v5428_v41 = vld [vmem:[#allocation12 + $0xc0] sm:$0xff]   ;;  %v5432_v51 = vld [vmem:[#allocation12 + $0xc8] sm:$0xff]  }
 0x308   :  { %v5429_v49 = vld [vmem:[#allocation12] sm:$0xff]   ;;  %v5433_v52 = vld [vmem:[#allocation12 + $0x8] sm:$0xff]   ;;  %v5435_v45 = vld [vmem:[#allocation12 + $0x50] sm:$0xff]  }
 0x309   :  { %v2334_v4 = vadd.f32 %v2333_v59, %v2332_v48  ;;  %v2339_v32 = vadd.f32 %v2338_v0, %v2337_v63  ;;  %4969 = vmatpush3.bf16.msra.mxu1 %v5391_v13  ;;  %v5430_v44 = vld [vmem:[#allocation12 + $0x80] sm:$0xff]   ;;  %v5434_v61 = vld [vmem:[#allocation12 + $0x88] sm:$0xff]   ;;  %v5436_v53 = vld [vmem:[#allocation12 + $0xd0] sm:$0xff]  }
 0x30a   :  { %v2354_v5 = vld [vmem:[#allocation3 + $0x10] sm:$0xff]  ;;  %4970 = vmatprep.subr.bf16.mxu1 %v5393_v1  ;;  %4953 = vmatpush3.bf16.msra.mxu0 %v5402_v2  ;;  %v5437_v54 = vld [vmem:[#allocation12 + $0x10] sm:$0xff]   ;;  %v5439_v57 = vld [vmem:[#allocation12 + $0x58] sm:$0xff]  }
 0x30b   :  { %v4509_v6 = vcombine.high %v2354_v5, %v2354_v5  ;;  %v2335_v62 = vpack.c.bf16 %v2334_v4, %v2334_v4  ;;  %v2340_v8 = vpack.c.bf16 %v2339_v32, %v2339_v32  ;;  %4954 = vmatprep.subr.bf16.mxu0 %v5404_v3  ;;  %v4508_v28 = vcombine.low %v2354_v5, %v2354_v5  ;;  %v5438_v56 = vld [vmem:[#allocation12 + $0x90] sm:$0xff]   ;;  %v5440_v58 = vld [vmem:[#allocation12 + $0xd8] sm:$0xff]   ;;  %v5443_v13 = vld [vmem:[#allocation12 + $0x60] sm:$0xff]  }
 0x30c   :  { %v5441_v16 = vld [vmem:[#allocation12 + $0x18] sm:$0xff]   ;;  %v5444_v59 = vld [vmem:[#allocation12 + $0xe0] sm:$0xff]   ;;  %v5447_v1 = vld [vmem:[#allocation12 + $0x68] sm:$0xff]  }
 0x30d   :  { %3077 = vmatprep.mubr.bf16.mxu0 %v4509_v6  ;;  %2336 = vst [vmem:[#allocation3 + $0x18] sm:$0xf] %v2335_v62  ;;  %2341 = vst [vmem:[#allocation3 + $0x1c] sm:$0xf] %v2340_v8  ;;  %4971 = vmatpush3.bf16.msra.mxu1 %v5395_v7  ;;  %v5442_v48 = vld [vmem:[#allocation12 + $0x98] sm:$0xff]   ;;  %v5445_v63 = vld [vmem:[#allocation12 + $0x20] sm:$0xff]  }
 0x30e   :  { %4972 = vmatprep.subr.bf16.mxu1 %v5397_v9  ;;  %4955 = vmatpush3.bf16.msra.mxu0 %v5406_v11  ;;  %v5517_v19 = vpop.eup %5516  ;;  %v5446_v0 = vld [vmem:[#allocation12 + $0xa0] sm:$0xff]   ;;  %v5448_v2 = vld [vmem:[#allocation12 + $0xe8] sm:$0xff]   ;;  %v5451_v32 = vld [vmem:[#allocation12 + $0x70] sm:$0xff]  }
 0x30f   :  { %4956 = vmatprep.subr.bf16.mxu0 %v5408_v12  ;;  %v2346_v10 = vadd.f32 1.0, %v5517_v19  ;;  %v5449_v3 = vld [vmem:[#allocation12 + $0x28] sm:$0xff]   ;;  %v5452_v5 = vld [vmem:[#allocation12 + $0xf0] sm:$0xff]   ;;  %v5455_v62 = vld [vmem:[#allocation12 + $0x78] sm:$0xff]  }
 0x310   :  { %v5450_v4 = vld [vmem:[#allocation12 + $0xa8] sm:$0xff]   ;;  %v5453_v7 = vld [vmem:[#allocation12 + $0x30] sm:$0xff]   ;;  %v5456_v8 = vld [vmem:[#allocation12 + $0xf8] sm:$0xff]  }
 0x311   :  { %4973 = vmatpush3.bf16.msra.mxu1 %v5399_v14  ;;  %5518 = vrcp.f32 %v2346_v10  ;;  %v5454_v6 = vld [vmem:[#allocation12 + $0xb0] sm:$0xff]   ;;  %v5457_v9 = vld [vmem:[#allocation12 + $0x38] sm:$0xff]   ;;  %v5463_v12 = vld [vmem:[#allocation12 + $0x140] sm:$0xff]  }
 0x312   :  { %4974 = vmatprep.subr.bf16.mxu1 %v5401_v15  ;;  %4957 = vmatpush3.bf16.msra.mxu0 %v5410_v18  ;;  %v5458_v11 = vld [vmem:[#allocation12 + $0xb8] sm:$0xff]   ;;  %v5464_v14 = vld [vmem:[#allocation12 + $0x1c0] sm:$0xff]  }
 0x313   :  { %4958 = vmatprep.subr.bf16.mxu0 %v5412_v20 }
 0x314   :  { %v2355_v22 = vld [vmem:[#allocation3 + $0x18] sm:$0xff] }
 0x315   :  { %v4511_v24 = vcombine.high %v2355_v22, %v2355_v22  ;;  %4975 = vmatpush3.bf16.msra.mxu1 %v5403_v46  ;;  %v4510_v60 = vcombine.low %v2355_v22, %v2355_v22 }
 0x316   :  { %4976 = vmatprep.subr.bf16.mxu1 %v5405_v21  ;;  %4959 = vmatpush3.bf16.msra.mxu0 %v5414_v23 }
 0x317   :  { %3117 = vmatprep.mubr.bf16.mxu1 %v4511_v24  ;;  %5134 = vmatprep.subr.bf16.mxu0 %v5675_v33 }
 0x319   :  { %4977 = vmatpush3.bf16.msra.mxu1 %v5407_v26  ;;  %3078 = vmatmul.mubr.bf16.vlgmr.msra.gmra.mrb[24].mxu0 %v4508_v28 }
 0x31a   :  { %4978 = vmatprep.subr.bf16.mxu1 %v5409_v25  ;;  %5135 = vmatpush3.bf16.msra.mxu0 %v5418_v17 }
 0x31b   :  { %5150 = vmatprep.mubr.msk.bf16.mxu0 %vm5676_vm12, %v5675_v33  ;;  %v5519_v34 = vpop.eup %5518  ;;  %5136 = vmatprep.subr.bf16.mxu0 %v5675_v33 }
 0x31c   :  { %v2349_v37 = vmul.f32 %v5519_v34, %v5986_v55  ;;  %v5423_v55 = vld [vmem:[#allocation10 + $0x228] sm:$0xff]  }
 0x31d   :  { %4979 = vmatpush3.bf16.msra.mxu1 %v5411_v31 }
 0x31e   :  { %4980 = vmatprep.subr.bf16.mxu1 %v5413_v47  ;;  %5137 = vmatpush3.bf16.msra.mxu0 %v5419_v27  ;;  %v2350_v30 = vpack.c.bf16 %v2349_v37, %v2349_v37 }
 0x31f   :  { %5138 = vmatprep.subr.bf16.mxu0 %v5675_v33 }
 0x320   :  { %2351 = vst [vmem:[#allocation3 + $0x20] sm:$0xf] %v2350_v30 }
 0x321   :  { %4981 = vmatpush3.bf16.msra.mxu1 %v5415_v35 }
 0x322   :  { %5139 = vmatpush3.bf16.msra.mxu0 %v5420_v38  ;;  %4997 = vmatprep.subr.bf16.mxu1 %v5427_v43 }
 0x323   :  { %5140 = vmatprep.subr.bf16.mxu0 %v5675_v33 }
 0x324   :  { %3118 = vmatmul.mubr.bf16.vlgmr.msra.gmra.mrb[24].mxu1 %v4510_v60 }
 0x325   :  { %4998 = vmatpush3.bf16.msra.mxu1 %v5429_v49 }
 0x326   :  { %5141 = vmatpush3.bf16.msra.mxu0 %v5421_v39  ;;  %4999 = vmatprep.subr.bf16.mxu1 %v5431_v50 }
 0x327   :  { %5142 = vmatprep.subr.bf16.mxu0 %v5675_v33  ;;  %v5426_v42 = vld [vmem:[#allocation3 + $0x20] ss:$0 sps:$4 sm:$0xff]  }
 0x329   :  { %5000 = vmatpush3.bf16.msra.mxu1 %v5433_v52 }
 0x32a   :  { %5143 = vmatpush3.bf16.msra.mxu0 %v5422_v36  ;;  %5001 = vmatprep.subr.bf16.mxu1 %v5435_v45 }
 0x32b   :  { %5144 = vmatprep.subr.bf16.mxu0 %v5675_v33 }
 0x32d   :  { %5002 = vmatpush3.bf16.msra.mxu1 %v5437_v54 }
 0x32e   :  { %5145 = vmatpush3.bf16.msra.mxu0 %v5423_v55  ;;  %5003 = vmatprep.subr.bf16.mxu1 %v5439_v57 }
 0x32f   :  { %5146 = vmatprep.subr.bf16.mxu0 %v5675_v33 }
 0x331   :  { %5004 = vmatpush3.bf16.msra.mxu1 %v5441_v16 }
 0x332   :  { %5147 = vmatpush3.bf16.msra.mxu0 %v5424_v29  ;;  %5005 = vmatprep.subr.bf16.mxu1 %v5443_v13 }
 0x333   :  { %5148 = vmatprep.subr.bf16.mxu0 %v5675_v33 }
 0x335   :  { %5006 = vmatpush3.bf16.msra.mxu1 %v5445_v63 }
 0x336   :  { %5149 = vmatpush3.bf16.msra.mxu0 %v5425_v40  ;;  %5007 = vmatprep.subr.bf16.mxu1 %v5447_v1 }
 0x337   :  { %5019 = vmatprep.subr.bf16.mxu0 %v5428_v41 }
 0x339   :  { %5151 = vmatmul.mubr.bf16.vlgmr.msra.gmra.mrb[28].mxu0 %v5426_v42  ;;  %5008 = vmatpush3.bf16.msra.mxu1 %v5449_v3 }
 0x33a   :  { %5020 = vmatpush3.bf16.msra.mxu0 %v5430_v44  ;;  %5009 = vmatprep.subr.bf16.mxu1 %v5451_v32 }
 0x33b   :  { %5021 = vmatprep.subr.bf16.mxu0 %v5432_v51 }
 0x33d   :  { %5010 = vmatpush3.bf16.msra.mxu1 %v5453_v7 }
 0x33e   :  { %5022 = vmatpush3.bf16.msra.mxu0 %v5434_v61  ;;  %5011 = vmatprep.subr.bf16.mxu1 %v5455_v62 }
 0x33f   :  { %5023 = vmatprep.subr.bf16.mxu0 %v5436_v53 }
 0x341   :  { %5012 = vmatpush3.bf16.msra.mxu1 %v5457_v9 }
 0x342   :  { %5024 = vmatpush3.bf16.msra.mxu0 %v5438_v56  ;;  %5041 = vmatprep.subr.bf16.mxu1 %v5463_v12 }
 0x343   :  { %5025 = vmatprep.subr.bf16.mxu0 %v5440_v58 }
 0x346   :  { %5026 = vmatpush3.bf16.msra.mxu0 %v5442_v48 }
 0x347   :  { %5027 = vmatprep.subr.bf16.mxu0 %v5444_v59 }
 0x34a   :  { %5028 = vmatpush3.bf16.msra.mxu0 %v5446_v0 }
 0x34b   :  { %5029 = vmatprep.subr.bf16.mxu0 %v5448_v2 }
 0x34e   :  { %5030 = vmatpush3.bf16.msra.mxu0 %v5450_v4 }
 0x34f   :  { %5031 = vmatprep.subr.bf16.mxu0 %v5452_v5 }
 0x352   :  { %5032 = vmatpush3.bf16.msra.mxu0 %v5454_v6 }
 0x353   :  { %5033 = vmatprep.subr.bf16.mxu0 %v5456_v8 }
 0x356   :  { %5034 = vmatpush3.bf16.msra.mxu0 %v5458_v11 }
 0x357   :  { %5063 = vmatprep.subr.bf16.mxu0 %v5464_v14 }
 0x3cc   :  { %v4916_v15 = vpop.f32.mrb[20].mxu0 }
 0x3cd   :  { %v4917_v18 = vpop.f32.mrb[21].mxu0 }
 0x3ce   :  { %v4918_v19 = vadd.f32 %v4917_v18, %v4916_v15  ;;  %v4919_v20 = vpop.f32.mrb[22].mxu0 }
 0x3cf   :  { %v4920_v10 = vpop.f32.mrb[23].mxu0 }
 0x3d7   :  { %v4938_v46 = vpop.f32.mrb[20].mxu1 }
 0x3d8   :  { %v4939_v21 = vpop.f32.mrb[21].mxu1 }
 0x3d9   :  { %v4940_v22 = vadd.f32 %v4939_v21, %v4938_v46  ;;  %v4941_v23 = vpop.f32.mrb[22].mxu1 }
 0x3da   :  { %v4942_v24 = vpop.f32.mrb[23].mxu1 }
 0x3db   :  { %v3040_v26 = vadd.f32 %v4940_v22, %v4918_v19 }
 0x3ec   :  { %v4960_v25 = vpop.f32.mrb[24].mxu0 }
 0x3ed   :  { %v4961_v17 = vpop.f32.mrb[25].mxu0 }
 0x3ee   :  { %v4962_v28 = vadd.f32 %v4961_v17, %v4960_v25  ;;  %v4963_v31 = vpop.f32.mrb[26].mxu0 }
 0x3ef   :  { %v4964_v47 = vpop.f32.mrb[27].mxu0 }
 0x3f0   :  { %v3080_v27 = vadd.f32 %v4962_v28, %v3040_v26 }
 0x3f7   :  { %v4982_v34 = vpop.f32.mrb[24].mxu1 }
 0x3f8   :  { %v4983_v35 = vpop.f32.mrb[25].mxu1 }
 0x3f9   :  { %v4984_v37 = vadd.f32 %v4983_v35, %v4982_v34  ;;  %v4985_v38 = vpop.f32.mrb[26].mxu1 }
 0x3fa   :  { %v4986_v30 = vpop.f32.mrb[27].mxu1 }
 0x3fb   :  { %v3120_v60 = vadd.f32 %v4984_v37, %v3080_v27 }
 0x40c   :  { %v3159_v39 = vpop.f32.mrb[28].mxu0 }
 0x40d   :  { %v6087_v36 = vadd.f32 %v3159_v39, %v3120_v60  ;;  %v5152_v55 = vpop.f32.mrb[29].mxu0 }
 0x40e   :  { %v3162_v29 = vpop.f32.mrb[30].mxu0 }
 0x40f   :  { %v6090_v40 = vmul.f32 2.5, %v6087_v36  ;;  %v6093_v42 = vmul.f32 1.25, %v6087_v36  ;;  %v6096_v43 = vmul.f32 0.8333333, %v6087_v36  ;;  %v5153_v41 = vpop.f32.mrb[31].mxu0  ;;  %vm3176_vm6 = vcmp.ge.f32.partialorder %v6087_v36, -1.0 }
 0x410   :  { %vm3167_vm7 = vcmp.ge.f32.partialorder %v6087_v36, -2.2  ;;  %vm3170_vm8 = vcmp.ge.f32.partialorder %v6087_v36, -1.8  ;;  %vm3173_vm9 = vcmp.ge.f32.partialorder %v6087_v36, -1.4 }
 0x411   :  { %v4585_v49 = vsel %vm3167_vm7, 1.0, %v5675_v33  ;;  %v4586_v44 = vsel %vm3170_vm8, 1.0, %v5675_v33  ;;  %v4587_v50 = vsel %vm3173_vm9, 1.0, %v5675_v33  ;;  %v4588_v51 = vsel %vm3176_vm6, 1.0, %v5675_v33 }
 0x412   :  { %vm3179_vm10 = vcmp.ge.f32.partialorder %v6087_v36, -0.6  ;;  %vm3182_vm11 = vcmp.ge.f32.partialorder %v6087_v36, -0.2  ;;  %v3203_v52 = vsub.f32 %v4585_v49, %v4586_v44  ;;  %v3204_v61 = vsub.f32 %v4586_v44, %v4587_v50 }
 0x413   :  { %v4589_v45 = vsel %vm3179_vm10, 1.0, %v5675_v33  ;;  %v4590_v53 = vsel %vm3182_vm11, 1.0, %v5675_v33  ;;  %v3205_v54 = vsub.f32 %v4587_v50, %v4588_v51  ;;  %v4597_v56 = vadd.f32 5.5, %v6090_v40 }
 0x414   :  { %v3206_v57 = vsub.f32 %v4588_v51, %v4589_v45  ;;  %v3207_v58 = vsub.f32 %v4589_v45, %v4590_v53  ;;  %v4598_v16 = vadd.f32 4.5, %v6090_v40  ;;  %v4599_v48 = vadd.f32 3.5, %v6090_v40 }
 0x415   :  { %v4600_v13 = vadd.f32 2.5, %v6090_v40  ;;  %v3225_v59 = vsub.f32 -3.5, %v6090_v40  ;;  %v3226_v63 = vsub.f32 -2.5, %v6090_v40  ;;  %v3227_v0 = vsub.f32 -1.5, %v6090_v40 }
 0x416   :  { %v3228_v1 = vsub.f32 -0.5, %v6090_v40  ;;  %v3235_v2 = vmul.f32 %v4597_v56, %v3203_v52  ;;  %v3238_v3 = vmul.f32 %v4598_v16, %v3204_v61  ;;  %v3241_v4 = vmul.f32 %v4599_v48, %v3205_v54 }
 0x417   :  { %v3236_v32 = vmul.f32 %v3225_v59, %v3204_v61  ;;  %v3239_v5 = vmul.f32 %v3226_v63, %v3205_v54  ;;  %v3242_v7 = vmul.f32 %v3227_v0, %v3206_v57  ;;  %v3244_v6 = vmul.f32 %v4600_v13, %v3206_v57 }
 0x418   :  { %v3245_v62 = vmul.f32 %v3228_v1, %v3207_v58  ;;  %v4607_v8 = vadd.f32 2.75, %v6093_v42  ;;  %v4608_v9 = vadd.f32 2.25, %v6093_v42  ;;  %v4609_v11 = vadd.f32 1.75, %v6093_v42 }
 0x419   :  { %v3237_v12 = vadd.f32 %v3236_v32, %v3235_v2  ;;  %v3240_v14 = vadd.f32 %v3239_v5, %v3238_v3  ;;  %v3243_v15 = vadd.f32 %v3242_v7, %v3241_v4  ;;  %v3275_v18 = vsub.f32 -1.25, %v6093_v42 }
 0x41a   :  { %v3246_v19 = vadd.f32 %v3245_v62, %v3244_v6  ;;  %v3276_v20 = vsub.f32 -0.75, %v6093_v42  ;;  %v3277_v10 = vsub.f32 -0.25, %v6093_v42  ;;  %v4616_v46 = vadd.f32 1.8333334, %v6096_v43 }
 0x41b   :  { %v3284_v21 = vmul.f32 %v4607_v8, %v3237_v12  ;;  %v3285_v22 = vmul.f32 %v3275_v18, %v3240_v14  ;;  %v3287_v23 = vmul.f32 %v4608_v9, %v3240_v14  ;;  %v3290_v24 = vmul.f32 %v4609_v11, %v3243_v15 }
 0x41c   :  { %v3288_v26 = vmul.f32 %v3276_v20, %v3243_v15  ;;  %v3291_v25 = vmul.f32 %v3277_v10, %v3246_v19  ;;  %v4617_v17 = vadd.f32 1.5, %v6096_v43  ;;  %v3320_v28 = vsub.f32 -0.5, %v6096_v43 }
 0x41d   :  { %v3286_v31 = vadd.f32 %v3285_v22, %v3284_v21  ;;  %v3321_v47 = vsub.f32 -0.16666667, %v6096_v43  ;;  %vm3185_vm13 = vcmp.ge.f32.partialorder %v6087_v36, 0.2  ;;  %vm3188_vm14 = vcmp.ge.f32.partialorder %v6087_v36, 0.6 }
 0x41e   :  { %v3289_v27 = vadd.f32 %v3288_v26, %v3287_v23  ;;  %v3292_v34 = vadd.f32 %v3291_v25, %v3290_v24  ;;  %v4591_v35 = vsel %vm3185_vm13, 1.0, %v5675_v33  ;;  %v4592_v37 = vsel %vm3188_vm14, 1.0, %v5675_v33 }
 0x41f   :  { %v3328_v38 = vmul.f32 %v4616_v46, %v3286_v31  ;;  %v3208_v30 = vsub.f32 %v4590_v53, %v4591_v35  ;;  %v3209_v60 = vsub.f32 %v4591_v35, %v4592_v37  ;;  %v4601_v39 = vadd.f32 1.5, %v6090_v40 }
 0x420   :  { %v3329_v55 = vmul.f32 %v3320_v28, %v3289_v27  ;;  %v3333_v29 = vmul.f32 %v4617_v17, %v3289_v27  ;;  %v3334_v41 = vmul.f32 %v3321_v47, %v3292_v34  ;;  %v4602_v49 = vadd.f32 0.5, %v6090_v40 }
 0x421   :  { %v3229_v44 = vsub.f32 0.5, %v6090_v40  ;;  %v3230_v50 = vsub.f32 1.5, %v6090_v40  ;;  %v3247_v51 = vmul.f32 %v4601_v39, %v3207_v58  ;;  %v4610_v52 = vadd.f32 1.25, %v6093_v42 }
 0x422   :  { %v3330_v61 = vadd.f32 %v3329_v55, %v3328_v38  ;;  %v3335_v45 = vadd.f32 %v3334_v41, %v3333_v29  ;;  %v3250_v54 = vmul.f32 %v4602_v49, %v3208_v30  ;;  %v4611_v53 = vadd.f32 0.75, %v6093_v42 }
 0x423   :  { %v3248_v56 = vmul.f32 %v3229_v44, %v3208_v30  ;;  %v3251_v57 = vmul.f32 %v3230_v50, %v3209_v60  ;;  %v3278_v16 = vsub.f32 0.25, %v6093_v42  ;;  %v3279_v48 = vsub.f32 0.75, %v6093_v42  ;;  %v5471_v50 = vld [vmem:[#allocation12 + $0x148] sm:$0xff]  }
 0x424   :  { %v3331_v13 = vpack.c.bf16 %v3330_v61, %v3330_v61  ;;  %v3336_v59 = vpack.c.bf16 %v3335_v45, %v3335_v45  ;;  %v3293_v63 = vmul.f32 %v4610_v52, %v3246_v19  ;;  %v4618_v0 = vadd.f32 1.1666666, %v6096_v43 }
 0x425   :  { %v3249_v1 = vadd.f32 %v3248_v56, %v3247_v51  ;;  %v3252_v58 = vadd.f32 %v3251_v57, %v3250_v54  ;;  %v4619_v2 = vadd.f32 0.8333333, %v6096_v43  ;;  %v3322_v3 = vsub.f32 0.16666667, %v6096_v43 }
 0x426   :  { %3332 = vst [vmem:[#allocation3] sm:$0xf] %v3331_v13  ;;  %3337 = vst [vmem:[#allocation3 + $0x4] sm:$0xf] %v3336_v59  ;;  %v3323_v4 = vsub.f32 0.5, %v6096_v43  ;;  %v3338_v32 = vmul.f32 %v4618_v0, %v3292_v34  ;;  %vm3191_vm15 = vcmp.ge.f32.partialorder %v6087_v36, 1.0 }
 0x427   :  { %vm3194_vm0 = vcmp.ge.f32.partialorder %v6087_v36, 1.4  ;;  %v3294_v5 = vmul.f32 %v3278_v16, %v3249_v1  ;;  %v3296_v7 = vmul.f32 %v4611_v53, %v3249_v1  ;;  %v3297_v6 = vmul.f32 %v3279_v48, %v3252_v58  ;;  %v5473_v13 = vld [vmem:[#allocation12 + $0x108] sm:$0xff]  }
 0x428   :  { %v4593_v62 = vsel %vm3191_vm15, 1.0, %v5675_v33  ;;  %v4594_v8 = vsel %vm3194_vm0, 1.0, %v5675_v33  ;;  %v4603_v11 = vadd.f32 -0.5, %v6090_v40  ;;  %v4604_v12 = vadd.f32 -1.5, %v6090_v40 }
 0x429   :  { %v3210_v9 = vsub.f32 %v4592_v37, %v4593_v62  ;;  %v3295_v14 = vadd.f32 %v3294_v5, %v3293_v63  ;;  %v3298_v15 = vadd.f32 %v3297_v6, %v3296_v7  ;;  %v3211_v18 = vsub.f32 %v4593_v62, %v4594_v8 }
 0x42a   :  { %v3231_v19 = vsub.f32 2.5, %v6090_v40  ;;  %v3232_v20 = vsub.f32 3.5, %v6090_v40  ;;  %v3253_v10 = vmul.f32 %v4603_v11, %v3209_v60  ;;  %v4612_v21 = vadd.f32 0.25, %v6093_v42  ;;  %v5465_v60 = vld [vmem:[#allocation12 + $0x100] sm:$0xff]  }
 0x42b   :  { %v3256_v46 = vmul.f32 %v4604_v12, %v3210_v9  ;;  %v3339_v22 = vmul.f32 %v3322_v3, %v3295_v14  ;;  %v3343_v23 = vmul.f32 %v4619_v2, %v3295_v14  ;;  %v3344_v24 = vmul.f32 %v3323_v4, %v3298_v15 }
 0x42c   :  { %v3254_v26 = vmul.f32 %v3231_v19, %v3210_v9  ;;  %v3257_v25 = vmul.f32 %v3232_v20, %v3211_v18  ;;  %v4613_v17 = vadd.f32 -0.25, %v6093_v42  ;;  %v3280_v28 = vsub.f32 1.25, %v6093_v42 }
 0x42d   :  { %v3281_v31 = vsub.f32 1.75, %v6093_v42  ;;  %v3378_v47 = vld [vmem:[#allocation3] sm:$0xff]  ;;  %v3340_v27 = vadd.f32 %v3339_v22, %v3338_v32  ;;  %v3345_v34 = vadd.f32 %v3344_v24, %v3343_v23  ;;  %v3299_v37 = vmul.f32 %v4612_v21, %v3252_v58 }
 0x42e   :  { %v3255_v35 = vadd.f32 %v3254_v26, %v3253_v10  ;;  %v4625_v38 = vcombine.low %v3378_v47, %v3378_v47  ;;  %v4626_v30 = vcombine.high %v3378_v47, %v3378_v47  ;;  %v3258_v39 = vadd.f32 %v3257_v25, %v3256_v46  ;;  %v5475_v58 = vld [vmem:[#allocation12 + $0x150] sm:$0xff]   ;;  %v5479_v10 = vld [vmem:[#allocation12 + $0x158] sm:$0xff]   ;;  %v5466_v26 = vld [vmem:[#allocation12 + $0x180] sm:$0xff]  }
 0x42f   :  { %v4620_v55 = vadd.f32 0.5, %v6096_v43  ;;  %v3341_v29 = vpack.c.bf16 %v3340_v27, %v3340_v27  ;;  %v3346_v41 = vpack.c.bf16 %v3345_v34, %v3345_v34  ;;  %v4621_v52 = vadd.f32 0.16666667, %v6096_v43  ;;  %v5472_v47 = vld [vmem:[#allocation12 + $0x1c8] sm:$0xff]  }
 0x430   :  { %v3300_v49 = vmul.f32 %v3280_v28, %v3255_v35  ;;  %v3302_v44 = vmul.f32 %v4613_v17, %v3255_v35  ;;  %4023 = vmatprep.mubr.bf16.mxu1 %v4626_v30  ;;  %v3303_v51 = vmul.f32 %v3281_v31, %v3258_v39  ;;  %v3324_v61 = vsub.f32 0.8333333, %v6096_v43  ;;  %v5483_v35 = vld [vmem:[#allocation12 + $0x160] sm:$0xff]  }
 0x431   :  { %v3325_v45 = vsub.f32 1.1666666, %v6096_v43  ;;  %3342 = vst [vmem:[#allocation3 + $0x8] sm:$0xf] %v3341_v29  ;;  %3347 = vst [vmem:[#allocation3 + $0xc] sm:$0xf] %v3346_v41  ;;  %4024 = vmatmul.mubr.bf16.vlgmr.msra.gmra.mrb[28].mxu1 %v4625_v38  ;;  %v3348_v53 = vmul.f32 %v4620_v55, %v3298_v15 }
 0x432   :  { %v3301_v54 = vadd.f32 %v3300_v49, %v3299_v37  ;;  %vm3197_vm1 = vcmp.ge.f32.partialorder %v6087_v36, 1.8  ;;  %vm3200_vm2 = vcmp.ge.f32.partialorder %v6087_v36, 2.2  ;;  %5042 = vmatpush3.bf16.msra.mxu1 %v5465_v60  ;;  %v3304_v56 = vadd.f32 %v3303_v51, %v3302_v44  ;;  %v5474_v55 = vld [vmem:[#allocation12 + $0x188] sm:$0xff]   ;;  %v5476_v44 = vld [vmem:[#allocation12 + $0x1d0] sm:$0xff]  }
 0x433   :  { %v4595_v57 = vsel %vm3197_vm1, 1.0, %v5675_v33  ;;  %v4596_v16 = vsel %vm3200_vm2, 1.0, %v5675_v33  ;;  %v4605_v48 = vadd.f32 -2.5, %v6090_v40  ;;  %5043 = vmatprep.subr.bf16.mxu1 %v5471_v50  ;;  %v4606_v3 = vadd.f32 -3.5, %v6090_v40  ;;  %v5485_v50 = vld [vmem:[#allocation12 + $0x120] sm:$0xff]  }
 0x434   :  { %v3349_v59 = vmul.f32 %v3324_v61, %v3301_v54  ;;  %v3353_v63 = vmul.f32 %v4621_v52, %v3301_v54  ;;  %v3212_v0 = vsub.f32 %v4594_v8, %v4595_v57  ;;  %v3213_v1 = vsub.f32 %v4595_v57, %v4596_v16  ;;  %v5477_v8 = vld [vmem:[#allocation12 + $0x110] sm:$0xff]   ;;  %v5487_v61 = vld [vmem:[#allocation12 + $0x168] sm:$0xff]   ;;  %v5480_v57 = vld [vmem:[#allocation12 + $0x1d8] sm:$0xff]  }
 0x435   :  { %v3354_v2 = vmul.f32 %v3325_v45, %v3304_v56  ;;  %v3233_v4 = vsub.f32 4.5, %v6090_v40  ;;  %v3234_v32 = vsub.f32 5.5, %v6090_v40  ;;  %v3259_v7 = vmul.f32 %v4605_v48, %v3211_v18  ;;  %v5478_v54 = vld [vmem:[#allocation12 + $0x190] sm:$0xff]   ;;  %v5489_v16 = vld [vmem:[#allocation12 + $0x128] sm:$0xff]  }
 0x436   :  { %v3350_v5 = vadd.f32 %v3349_v59, %v3348_v53  ;;  %v4614_v6 = vadd.f32 -0.75, %v6093_v42  ;;  %v3262_v11 = vmul.f32 %v4606_v3, %v3212_v0  ;;  %5044 = vmatpush3.bf16.msra.mxu1 %v5473_v13  ;;  %v4615_v15 = vadd.f32 -1.25, %v6093_v42  ;;  %v5491_v48 = vld [vmem:[#allocation12 + $0x170] sm:$0xff]   ;;  %v5482_v13 = vld [vmem:[#allocation12 + $0x198] sm:$0xff]   ;;  %v5484_v59 = vld [vmem:[#allocation12 + $0x1e0] sm:$0xff]  }
 0x437   :  { %v3355_v62 = vadd.f32 %v3354_v2, %v3353_v63  ;;  %v3260_v9 = vmul.f32 %v3233_v4, %v3212_v0  ;;  %v3263_v12 = vmul.f32 %v3234_v32, %v3213_v1  ;;  %v3282_v19 = vsub.f32 2.25, %v6093_v42  ;;  %5045 = vmatprep.subr.bf16.mxu1 %v5475_v58  ;;  %v5493_v0 = vld [vmem:[#allocation12 + $0x130] sm:$0xff]   ;;  %v5495_v1 = vld [vmem:[#allocation12 + $0x178] sm:$0xff]   ;;  %v5486_v2 = vld [vmem:[#allocation12 + $0x1a0] sm:$0xff]  }
 0x438   :  { %v3351_v14 = vpack.c.bf16 %v3350_v5, %v3350_v5  ;;  %v3283_v20 = vsub.f32 2.75, %v6093_v42  ;;  %v3379_v40 = vld [vmem:[#allocation3 + $0x8] sm:$0xff]  ;;  %v3305_v22 = vmul.f32 %v4614_v6, %v3258_v39  ;;  %v4622_v31 = vadd.f32 -0.16666667, %v6096_v43  ;;  %v5488_v3 = vld [vmem:[#allocation12 + $0x1e8] sm:$0xff]   ;;  %v5492_v6 = vld [vmem:[#allocation12 + $0x1f0] sm:$0xff]  }
 0x439   :  { %v3356_v46 = vpack.c.bf16 %v3355_v62, %v3355_v62  ;;  %v3261_v18 = vadd.f32 %v3260_v9, %v3259_v7  ;;  %v3264_v21 = vadd.f32 %v3263_v12, %v3262_v11  ;;  %v4627_v23 = vcombine.low %v3379_v40, %v3379_v40  ;;  %v5481_v42 = vld [vmem:[#allocation12 + $0x118] sm:$0xff]   ;;  %v5490_v7 = vld [vmem:[#allocation12 + $0x1a8] sm:$0xff]   ;;  %v5499_v62 = vld [vmem:[#allocation12 + $0x200] sm:$0xff]  }
 0x43a   :  { %v4628_v24 = vcombine.high %v3379_v40, %v3379_v40  ;;  %3352 = vst [vmem:[#allocation3 + $0x10] sm:$0xf] %v3351_v14  ;;  %5046 = vmatpush3.bf16.msra.mxu1 %v5477_v8  ;;  %v4623_v27 = vadd.f32 -0.5, %v6096_v43  ;;  %v3326_v34 = vsub.f32 1.5, %v6096_v43  ;;  %v4624_v37 = vmul.f32 -1.442695, %v6087_v36 }
 0x43b   :  { %3357 = vst [vmem:[#allocation3 + $0x14] sm:$0xf] %v3356_v46  ;;  %v3306_v25 = vmul.f32 %v3282_v19, %v3261_v18  ;;  %v3308_v17 = vmul.f32 %v4615_v15, %v3261_v18  ;;  %v3309_v28 = vmul.f32 %v3283_v20, %v3264_v21  ;;  %5047 = vmatprep.subr.bf16.mxu1 %v5479_v10  ;;  %v3327_v60 = vsub.f32 1.8333334, %v6096_v43  ;;  %v5497_v32 = vld [vmem:[#allocation12 + $0x138] sm:$0xff]   ;;  %v5494_v11 = vld [vmem:[#allocation12 + $0x1b0] sm:$0xff]  }
 0x43c   :  { %4063 = vmatprep.mubr.bf16.mxu0 %v4628_v24  ;;  %v3358_v39 = vmul.f32 %v4622_v31, %v3304_v56  ;;  %5520 = vpow2.f32 %v4624_v37  ;;  %v5496_v12 = vld [vmem:[#allocation12 + $0x1f8] sm:$0xff]   ;;  %v5500_v8 = vld [vmem:[#allocation12 + $0x208] sm:$0xff]   ;;  %v5501_v20 = vld [vmem:[#allocation12 + $0x210] sm:$0xff]  }
 0x43d   :  { %4064 = vmatmul.mubr.bf16.vlgmr.msra.gmra.mrb[32].mxu0 %v4627_v23  ;;  %v3307_v38 = vadd.f32 %v3306_v25, %v3305_v22  ;;  %v3310_v30 = vadd.f32 %v3309_v28, %v3308_v17  ;;  %v5498_v15 = vld [vmem:[#allocation12 + $0x1b8] sm:$0xff]   ;;  %v5503_v18 = vld [vmem:[#allocation12 + $0x220] sm:$0xff]   ;;  %v5505_v21 = vld [vmem:[#allocation12 + $0x230] sm:$0xff]  }
 0x43e   :  { %5064 = vmatpush3.bf16.msra.mxu0 %v5466_v26  ;;  %5048 = vmatpush3.bf16.msra.mxu1 %v5481_v42  ;;  %v5502_v46 = vld [vmem:[#allocation12 + $0x218] sm:$0xff]  }
 0x43f   :  { %v3359_v29 = vmul.f32 %v3326_v34, %v3307_v38  ;;  %v3363_v41 = vmul.f32 %v4623_v27, %v3307_v38  ;;  %v3364_v49 = vmul.f32 %v3327_v60, %v3310_v30  ;;  %5065 = vmatprep.subr.bf16.mxu0 %v5472_v47  ;;  %5049 = vmatprep.subr.bf16.mxu1 %v5483_v35  ;;  %v5506_v22 = vld [vmem:[#allocation12 + $0x238] sm:$0xff]  }
 0x441   :  { %v3360_v51 = vadd.f32 %v3359_v29, %v3358_v39  ;;  %v3365_v52 = vadd.f32 %v3364_v49, %v3363_v41 }
 0x442   :  { %v3380_v45 = vld [vmem:[#allocation3 + $0x10] sm:$0xff]  ;;  %5066 = vmatpush3.bf16.msra.mxu0 %v5474_v55  ;;  %5050 = vmatpush3.bf16.msra.mxu1 %v5485_v50 }
 0x443   :  { %v4630_v53 = vcombine.high %v3380_v45, %v3380_v45  ;;  %v3361_v43 = vpack.c.bf16 %v3360_v51, %v3360_v51  ;;  %v3366_v56 = vpack.c.bf16 %v3365_v52, %v3365_v52  ;;  %5067 = vmatprep.subr.bf16.mxu0 %v5476_v44  ;;  %5051 = vmatprep.subr.bf16.mxu1 %v5487_v61  ;;  %v4191_v51 = vlaneseq }
 0x444   :  { %v4629_v9 = vcombine.low %v3380_v45, %v3380_v45 }
 0x445   :  { %4103 = vmatprep.mubr.bf16.mxu1 %v4630_v53  ;;  %3362 = vst [vmem:[#allocation3 + $0x18] sm:$0xf] %v3361_v43  ;;  %3367 = vst [vmem:[#allocation3 + $0x1c] sm:$0xf] %v3366_v56  ;;  %v4192_v52 = vand.u32 127, %v4191_v51 }
 0x446   :  { %5068 = vmatpush3.bf16.msra.mxu0 %v5478_v54  ;;  %v5521_v63 = vpop.eup %5520  ;;  %5052 = vmatpush3.bf16.msra.mxu1 %v5489_v16 }
 0x447   :  { %5069 = vmatprep.subr.bf16.mxu0 %v5480_v57  ;;  %5053 = vmatprep.subr.bf16.mxu1 %v5491_v48  ;;  %v3372_v58 = vadd.f32 1.0, %v5521_v63 }
 0x449   :  { %5522 = vrcp.f32 %v3372_v58 }
 0x44a   :  { %5070 = vmatpush3.bf16.msra.mxu0 %v5482_v13  ;;  %5054 = vmatpush3.bf16.msra.mxu1 %v5493_v0 }
 0x44b   :  { %5071 = vmatprep.subr.bf16.mxu0 %v5484_v59  ;;  %5055 = vmatprep.subr.bf16.mxu1 %v5495_v1 }
 0x44c   :  { %v3381_v4 = vld [vmem:[#allocation3 + $0x18] sm:$0xff] }
 0x44d   :  { %v4632_v5 = vcombine.high %v3381_v4, %v3381_v4  ;;  %v4631_v40 = vcombine.low %v3381_v4, %v3381_v4 }
 0x44e   :  { %5072 = vmatpush3.bf16.msra.mxu0 %v5486_v2  ;;  %5056 = vmatpush3.bf16.msra.mxu1 %v5497_v32 }
 0x44f   :  { %4143 = vmatprep.mubr.bf16.mxu0 %v4632_v5  ;;  %5073 = vmatprep.subr.bf16.mxu0 %v5488_v3 }
 0x450   :  { %5154 = vmatprep.subr.bf16.mxu1 %v5675_v33 }
 0x451   :  { %4104 = vmatmul.mubr.bf16.vlgmr.msra.gmra.mrb[32].mxu1 %v4629_v9 }
 0x452   :  { %5074 = vmatpush3.bf16.msra.mxu0 %v5490_v7  ;;  %5155 = vmatpush3.bf16.msra.mxu1 %v5499_v62 }
 0x453   :  { %5075 = vmatprep.subr.bf16.mxu0 %v5492_v6  ;;  %5170 = vmatprep.mubr.msk.bf16.mxu1 %vm5676_vm12, %v5675_v33  ;;  %v5523_v14 = vpop.eup %5522  ;;  %vm4193_vm12 = vcmp.lt.s32.totalorder %v4192_v52, 4 }
 0x454   :  { %5156 = vmatprep.subr.bf16.mxu1 %v5675_v33  ;;  %v3375_v19 = vmul.f32 %v5523_v14, %v6087_v36  ;;  %v5504_v36 = vld [vmem:[#allocation12 + $0x228] sm:$0xff]  }
 0x456   :  { %5076 = vmatpush3.bf16.msra.mxu0 %v5494_v11  ;;  %5157 = vmatpush3.bf16.msra.mxu1 %v5500_v8  ;;  %v3376_v10 = vpack.c.bf16 %v3375_v19, %v3375_v19 }
 0x457   :  { %5077 = vmatprep.subr.bf16.mxu0 %v5496_v12  ;;  %5158 = vmatprep.subr.bf16.mxu1 %v5675_v33 }
 0x458   :  { %3377 = vst [vmem:[#allocation3 + $0x20] sm:$0xf] %v3376_v10 }
 0x45a   :  { %5078 = vmatpush3.bf16.msra.mxu0 %v5498_v15  ;;  %5159 = vmatpush3.bf16.msra.mxu1 %v5501_v20 }
 0x45b   :  { %5160 = vmatprep.subr.bf16.mxu1 %v5675_v33 }
 0x45d   :  { %4144 = vmatmul.mubr.bf16.vlgmr.msra.gmra.mrb[36].mxu0 %v4631_v40 }
 0x45e   :  { %5161 = vmatpush3.bf16.msra.mxu1 %v5502_v46 }
 0x45f   :  { %5162 = vmatprep.subr.bf16.mxu1 %v5675_v33  ;;  %v5507_v23 = vld [vmem:[#allocation3 + $0x20] ss:$0 sps:$4 sm:$0xff]  }
 0x462   :  { %5163 = vmatpush3.bf16.msra.mxu1 %v5503_v18 }
 0x463   :  { %5164 = vmatprep.subr.bf16.mxu1 %v5675_v33 }
 0x466   :  { %5165 = vmatpush3.bf16.msra.mxu1 %v5504_v36 }
 0x467   :  { %5166 = vmatprep.subr.bf16.mxu1 %v5675_v33 }
 0x46a   :  { %5167 = vmatpush3.bf16.msra.mxu1 %v5505_v21 }
 0x46b   :  { %5168 = vmatprep.subr.bf16.mxu1 %v5675_v33 }
 0x46e   :  { %5169 = vmatpush3.bf16.msra.mxu1 %v5506_v22 }
 0x471   :  { %5171 = vmatmul.mubr.bf16.vlgmr.msra.gmra.mrb[36].mxu1 %v5507_v23 }
 0x504   :  { %v5013_v24 = vpop.f32.mrb[28].mxu1 }
 0x505   :  { %v5014_v26 = vpop.f32.mrb[29].mxu1 }
 0x506   :  { %v5015_v25 = vadd.f32 %v5014_v26, %v5013_v24  ;;  %v5016_v17 = vpop.f32.mrb[30].mxu1 }
 0x507   :  { %v5017_v28 = vpop.f32.mrb[31].mxu1 }
 0x510   :  { %v5035_v31 = vpop.f32.mrb[32].mxu0 }
 0x511   :  { %v5036_v47 = vpop.f32.mrb[33].mxu0 }
 0x512   :  { %v5037_v42 = vadd.f32 %v5036_v47, %v5035_v31  ;;  %v5038_v27 = vpop.f32.mrb[34].mxu0 }
 0x513   :  { %v5039_v34 = vpop.f32.mrb[35].mxu0 }
 0x514   :  { %v4066_v35 = vadd.f32 %v5037_v42, %v5015_v25 }
 0x524   :  { %v5057_v37 = vpop.f32.mrb[32].mxu1 }
 0x525   :  { %v5058_v38 = vpop.f32.mrb[33].mxu1 }
 0x526   :  { %v5059_v30 = vadd.f32 %v5058_v38, %v5057_v37  ;;  %v5060_v60 = vpop.f32.mrb[34].mxu1 }
 0x527   :  { %v5061_v39 = vpop.f32.mrb[35].mxu1 }
 0x528   :  { %v4106_v33 = vadd.f32 %v5059_v30, %v4066_v35 }
 0x530   :  { %v5079_v55 = vpop.f32.mrb[36].mxu0 }
 0x531   :  { %v5080_v29 = vpop.f32.mrb[37].mxu0 }
 0x532   :  { %v5081_v41 = vadd.f32 %v5080_v29, %v5079_v55  ;;  %v5082_v49 = vpop.f32.mrb[38].mxu0 }
 0x533   :  { %v5083_v44 = vpop.f32.mrb[39].mxu0 }
 0x534   :  { %v4146_v50 = vadd.f32 %v5081_v41, %v4106_v33 }
 0x544   :  { %v4185_v61 = vpop.f32.mrb[36].mxu1 }
 0x545   :  { %v4186_v45 = vadd.f32 %v4185_v61, %v4146_v50  ;;  %v5172_v54 = vpop.f32.mrb[37].mxu1 }
 0x546   :  { %v4188_v53 = vpop.f32.mrb[38].mxu1 }
 0x547   :  { %v5173_v43 = vpop.f32.mrb[39].mxu1  ;;  %v4194_v56 = vsel %vm4193_vm12, %v4186_v45, -1e+30 }
 0x548   :  { %4195 = vmax.xlane.f32.xlu0 %v4194_v56 }
 0x5d5   :  { %v4196_v57 = vpop.xlane.xlu0 %4195 }
 0x5d6   :  { %v4197_v16 = vsub.f32 %v4194_v56, %v4196_v57 }
 0x5d8   :  { %v4198_v48 = vmul.f32 1.442695, %v4197_v16 }
 0x5da   :  { %5524 = vpow2.f32 %v4198_v48 }
 0x5e4   :  { %v5525_v13 = vpop.eup %5524 }
 0x5e5   :  { %4200 = vadd.xlane.f32.xlu0 %v5525_v13 }
 0x672   :  { %v4201_v59 = vpop.xlane.xlu0 %4200 }
 0x673   :  { %5526 = vrcp.f32 %v4201_v59 }
 0x67d   :  { %v5527_v63 = vpop.eup %5526 }
 0x67e   :  { %v4203_v0 = vmul.f32 %v5527_v63, %v5525_v13 }
 0x680   :  { %4204 = vst [vmem:[#allocation13] sm:$0xff] %v4203_v0 }
 0x681   :  { %5649 = shalt.err (!%p5646_p2)
}
 0x682   :  { %s5650_s30 = scalar_lea.hbm %s6205_s5, 128 }
 0x683   :  { %p5651_p3 = scmp.ne.s32.totalorder %s6205_s5, %s5650_s30  ;;  %p5654_p4 = scmp.lt.u32.totalorder %s5650_s30, %s6205_s5 }
 0x685   :  { %p5656_p5 = pnand %p5654_p4, %p5651_p3 }
 0x687   :  { %5659 = shalt.err (!%p5656_p5)
}
 0x688   :  { %4214 = dma.vmem_to_hbm [thread:$0]  %s4212_s28, 128, %s6205_s5, [#allocation6]  }
 0x689   :  { %5666 = dma.done.wait [#allocation6], 128  }
 0x68a   :  { %5667 = vsyncadd [#allocation6], 4294967168 }
 0x68b   :  { %4218 = vsyncpa [#allocation5], 1 }
 0x68c   :  { %4219 = vsyncpa [#allocation8], 1 }
 0x68d   :  { %4220 = vsyncpa [#allocation11], 1 }
 0x68e   :  { %4221 = vsyncpa [#allocation6], 1 }

</bundles_post_ra>
